<compile_context>
chip_gen: v5e
topology: v5e:2x2
jax: 0.10.0
libtpu: 0.0.40
codegen_flags: <defaults>
</compile_context>

<pallas_src>
import jax
import jax.numpy as jnp
from jax import lax
from jax.experimental import pallas as pl
from jax.experimental.pallas import tpu as pltpu

# --- config (stands in for config.yml) ---
VOCAB = 50
EMBED = 16
HIDDEN = 32
BATCH = 2
SEQ = 8
LSTM_LAYERS = 2
DROPOUT = 0.0

VPAD = 128      # vocab padded to one full lane row (dense stores / dense log-softmax reduce)
NEG_BIG = -1e9  # bias for padded vocab columns: exp underflows to 0, log-softmax unchanged


def _full_spec(shape):
    n = len(shape)
    return pl.BlockSpec(shape, lambda i, _n=n: (0,) * _n)


def decoder_kernel(words_ref, h0_ref, c0_ref, ah0_ref, enc_ref, enc_wa_ref, maskb_ref,
                   ew0_ref, wcat_ref, bl_ref, wcT_ref, wcb_ref, outT_ref, outb_ref,
                   logp_ref, attnh_ref, hnew_ref, cnew_ref,
                   st_sc, c_sc, ctx_sc, eg_sc, ah_all_sc):
    TB = words_ref.shape[0]
    L, B, H = c0_ref.shape
    T = TB // B
    V = ew0_ref.shape[0]
    f32 = jnp.float32

    # ---- init recurrent state (kept in VMEM scratch across the in-kernel time loop) ----
    c_sc[...] = c0_ref[...]
    st_sc[0, :, 0:H] = ah0_ref[...]                      # layer-0 "input" half = attn.hidden
    for l in range(L):
        st_sc[l, :, H:2 * H] = h0_ref[l]                 # recurrent h half
        if l >= 1:
            st_sc[l, :, 0:H] = jnp.zeros((B, H), f32)    # written each step before being read

    # ---- hoisted: embedding gather folded into the layer-0 input-gate matmul, all T steps ----
    lane_iota = lax.broadcasted_iota(jnp.int32, (TB, V), 1)
    onehot = (lane_iota == words_ref[...]).astype(f32)                            # (T*B, V)
    eg_sc[...] = jnp.dot(onehot, ew0_ref[...], preferred_element_type=f32)        # (T*B, 4H)

    def lstm_cell(gates, c_prev):
        # whole 128-lane vreg through EUP once per nonlinearity, then slice
        sig = jax.nn.sigmoid(gates)
        tnh = jnp.tanh(gates)
        i_g = sig[:, 0 * H:1 * H]
        f_g = sig[:, 1 * H:2 * H]
        g_g = tnh[:, 2 * H:3 * H]
        o_g = sig[:, 3 * H:4 * H]
        c_new = f_g * c_prev + i_g * g_g
        h_new = o_g * jnp.tanh(c_new)
        return h_new, c_new

    @pl.loop(0, T, unroll=True)
    def _decode_step(t):
        emb_g = eg_sc[pl.ds(t * B, B), :]                                         # (B, 4H)

        # ---- LSTM stack: one fused (B,2H)@(2H,4H) dot per layer ----
        h_new = None
        for l in range(L):
            lhs = st_sc[l]                                                        # (B, 2H)
            gates = jnp.dot(lhs, wcat_ref[l], preferred_element_type=f32) + bl_ref[l]
            if l == 0:
                gates = gates + emb_g
            h_new, c_new = lstm_cell(gates, c_sc[l])
            c_sc[l] = c_new
            st_sc[l, :, H:2 * H] = h_new                                          # own h for next step
            if l + 1 < L:
                st_sc[l + 1, :, 0:H] = h_new                                      # feeds next layer now
        lo = h_new                                                                # lstm_output (B, H)

        # ---- attention: Wa(enc)+b precomputed; mask is an additive bias ----
        scores = jnp.sum(enc_wa_ref[...] * lo[:, None, :], axis=-1) + maskb_ref[...]   # (B, S)
        m = jnp.max(scores, axis=-1, keepdims=True)
        e = jnp.exp(scores - m)
        denom = jnp.sum(e, axis=-1, keepdims=True)
        c_raw = jnp.sum(enc_ref[...] * e[:, :, None], axis=1)                     # (B, H)
        c_vec = c_raw * pl.reciprocal(denom, approx=False)                        # softmax norm folded here

        # ---- Wc on [context ; lstm_output] as ONE dot via a combined (B,2H) scratch ----
        ctx_sc[:, 0:H] = c_vec
        ctx_sc[:, H:2 * H] = lo
        ah = jnp.tanh(jnp.dot(ctx_sc[...], wcT_ref[...], preferred_element_type=f32)
                      + wcb_ref[...])                                             # (B, H)
        st_sc[0, :, 0:H] = ah
        ah_all_sc[pl.ds(t * B, B), :] = ah

    # ---- deferred output projection + log-softmax (lane-dense, one matmul for all T steps) ----
    logits = jnp.dot(ah_all_sc[...], outT_ref[...], preferred_element_type=f32) + outb_ref[...]
    lm = jnp.max(logits, axis=-1, keepdims=True)
    ls = logits - lm
    logp_ref[...] = ls - jnp.log(jnp.sum(jnp.exp(ls), axis=-1, keepdims=True))

    # ---- final recurrent state out ----
    attnh_ref[...] = st_sc[0, :, 0:H]
    for l in range(L):
        hnew_ref[l] = st_sc[l, :, H:2 * H]
    cnew_ref[...] = c_sc[...]


def init_params(key):
    keys = iter(jax.random.split(key, 32))

    def rnd(shape, scale=0.1):
        return jax.random.normal(next(keys), shape, jnp.float32) * scale

    emb = rnd((VOCAB, EMBED))
    emb = emb.at[0].set(0.0)  # padding_idx = 0

    w_ih, w_hh, b_ih, b_hh = [], [], [], []
    for l in range(LSTM_LAYERS):
        in_dim = EMBED + HIDDEN if l == 0 else HIDDEN
        w_ih.append(rnd((4 * HIDDEN, in_dim)))
        w_hh.append(rnd((4 * HIDDEN, HIDDEN)))
        b_ih.append(rnd((4 * HIDDEN,)))
        b_hh.append(rnd((4 * HIDDEN,)))

    return dict(
        emb=emb, w_ih=w_ih, w_hh=w_hh, b_ih=b_ih, b_hh=b_hh,
        wa_w=rnd((HIDDEN, HIDDEN)), wa_b=rnd((HIDDEN,)),
        wc_w=rnd((HIDDEN, 2 * HIDDEN)), wc_b=rnd((HIDDEN,)),
        out_w=rnd((VOCAB, HIDDEN)), out_b=rnd((VOCAB,)),
    )


def prepare_params(params):
    """One-time (hoisted) weight preprocessing.  Kernel math stays strictly f32."""
    H, E, V, L = HIDDEN, EMBED, VOCAB, LSTM_LAYERS
    f32 = jnp.float32
    w_ih0 = params['w_ih'][0]                                   # (4H, E+H); input = [embedded ; attn.hidden]
    ew0 = jnp.dot(params['emb'], w_ih0[:, :E].T)                # (V, 4H) embedding gather folded into gates
    wcat = [jnp.concatenate([w_ih0[:, E:].T, params['w_hh'][0].T], axis=0)]        # (2H, 4H)
    for l in range(1, L):
        wcat.append(jnp.concatenate([params['w_ih'][l].T, params['w_hh'][l].T], axis=0))
    wcat = jnp.stack(wcat)                                      # (L, 2H, 4H)
    bl = jnp.stack([(params['b_ih'][l] + params['b_hh'][l]).reshape(1, 4 * H)
                    for l in range(L)])                         # (L, 1, 4H)
    wcT = params['wc_w'].T                                      # (2H, H) acts on [context ; lstm_out]
    outT = jnp.zeros((H, VPAD), f32).at[:, :V].set(params['out_w'].T)              # (H, VPAD)
    outb = jnp.full((1, VPAD), NEG_BIG, f32).at[0, :V].set(params['out_b'])        # (1, VPAD)
    return dict(
        ew0=ew0.astype(f32), wcat=wcat.astype(f32), bl=bl.astype(f32),
        wa_w=params['wa_w'].astype(f32), wa_b=params['wa_b'].astype(f32),
        wcT=wcT.astype(f32), wc_b=params['wc_b'].reshape(1, H).astype(f32),
        outT=outT.astype(f32), outb=outb.astype(f32),
    )


@jax.jit
def decoder_forward_seq(prepped, words_bt, encoder_output, mask_bool, attn_hidden_prev, h0, c0):
    """Run T teacher-forced decode steps (== T sequential Decoder.forward calls) in ONE kernel."""
    B, T = words_bt.shape
    _, S, H = encoder_output.shape
    words_flat = jnp.transpose(words_bt).reshape(T * B, 1).astype(jnp.int32)       # row t*B+b
    mask_bias = jnp.where(mask_bool, -10000.0, 0.0).astype(jnp.float32)            # additive mask bias
    # Wa(encoder_output) + b is loop-invariant: computed once per call, not per decode step.
    enc_wa = jnp.einsum('bsh,kh->bsk', encoder_output, prepped['wa_w']) + prepped['wa_b']

    inputs = (words_flat, h0, c0, attn_hidden_prev, encoder_output, enc_wa, mask_bias,
              prepped['ew0'], prepped['wcat'], prepped['bl'],
              prepped['wcT'], prepped['wc_b'], prepped['outT'], prepped['outb'])

    out_shapes = (
        jax.ShapeDtypeStruct((T * B, VPAD), jnp.float32),            # per-step log-probs (lane/sublane dense)
        jax.ShapeDtypeStruct((B, H), jnp.float32),                   # final attn.hidden
        jax.ShapeDtypeStruct((LSTM_LAYERS, B, H), jnp.float32),      # final h
        jax.ShapeDtypeStruct((LSTM_LAYERS, B, H), jnp.float32),      # final c
    )

    logp_flat, attnh, hnew, cnew = pl.pallas_call(
        decoder_kernel,
        out_shape=out_shapes,
        grid=(1,),
        in_specs=[_full_spec(a.shape) for a in inputs],
        out_specs=tuple(_full_spec(s.shape) for s in out_shapes),
        scratch_shapes=[pltpu.VMEM((LSTM_LAYERS, B, 2 * H), jnp.float32),   # [layer-in ; h] per layer
                        pltpu.VMEM((LSTM_LAYERS, B, H), jnp.float32),       # cell states
                        pltpu.VMEM((B, 2 * H), jnp.float32),                # [context ; lstm_out]
                        pltpu.VMEM((T * B, 4 * HIDDEN), jnp.float32),       # hoisted embedding gate term
                        pltpu.VMEM((T * B, H), jnp.float32)],               # per-step attn hidden
        compiler_params=pltpu.CompilerParams(dimension_semantics=("arbitrary",)),
    )(*inputs)
    logp = logp_flat.reshape(T, B, VPAD)[:, :, :VOCAB]
    return logp, attnh, (hnew, cnew)


def decoder_forward(prepped, words, encoder_output, mask_bool, attn_hidden_prev, h0, c0):
    """Single decode step -- same signature/semantics as Decoder.forward (words shape (B, 1))."""
    logp, attnh, (hn, cn) = decoder_forward_seq(
        prepped, words, encoder_output, mask_bool, attn_hidden_prev, h0, c0)
    return logp[0], attnh, (hn, cn)


def reference(params, words, enc, mask_bool, attn_h_prev, h0, c0):
    """Pure-JAX mirror of the PyTorch forward (one decode step, for verification)."""
    H = HIDDEN
    emb = params['emb'][words[:, 0]]
    inp = jnp.concatenate([emb, attn_h_prev], axis=1)
    h_list, c_list = [], []
    for l in range(LSTM_LAYERS):
        b = params['b_ih'][l] + params['b_hh'][l]
        gates = inp @ params['w_ih'][l].T + h0[l] @ params['w_hh'][l].T + b
        i = jax.nn.sigmoid(gates[:, :H]); f = jax.nn.sigmoid(gates[:, H:2 * H])
        g = jnp.tanh(gates[:, 2 * H:3 * H]); o = jax.nn.sigmoid(gates[:, 3 * H:])
        c = f * c0[l] + i * g
        h = o * jnp.tanh(c)
        h_list.append(h); c_list.append(c); inp = h
    lo = h_list[-1]
    y = enc @ params['wa_w'].T + params['wa_b']                    # Wa(encoder_output)
    scores = jnp.einsum('bh,bsh->bs', lo, y)
    scores = jnp.where(mask_bool, -10000.0, scores)
    a = jax.nn.softmax(scores, axis=-1)
    c_vec = jnp.einsum('bs,bsh->bh', a, enc)
    hcat = jnp.concatenate([c_vec, lo], axis=1)
    ah = jnp.tanh(hcat @ params['wc_w'].T + params['wc_b'])
    logits = ah @ params['out_w'].T + params['out_b']
    logp = jax.nn.log_softmax(logits, axis=1)
    return logp, ah, jnp.stack(h_list), jnp.stack(c_list)


if __name__ == "__main__":
    key = jax.random.PRNGKey(0)
    pkey, dkey = jax.random.split(key)
    params = init_params(pkey)
    prepped = prepare_params(params)   # hoisted once

    T_DEC = 6
    ks = iter(jax.random.split(dkey, 8))
    words_bt = jax.random.randint(next(ks), (BATCH, T_DEC), 1, VOCAB, dtype=jnp.int32)
    enc = jax.random.normal(next(ks), (BATCH, SEQ, HIDDEN), jnp.float32)
    lengths = jnp.array([SEQ, SEQ - 3])
    mask_bool = jnp.arange(SEQ)[None, :] >= lengths[:, None]       # True = padded position
    attn_h_prev = jax.random.normal(next(ks), (BATCH, HIDDEN), jnp.float32) * 0.1
    h0 = jax.random.normal(next(ks), (LSTM_LAYERS, BATCH, HIDDEN), jnp.float32) * 0.1
    c0 = jax.random.normal(next(ks), (LSTM_LAYERS, BATCH, HIDDEN), jnp.float32) * 0.1

    # fused multi-step decode: T Decoder.forward() steps in one pallas_call
    logp_seq, attnh, (hn, cn) = decoder_forward_seq(
        prepped, words_bt, enc, mask_bool, attn_h_prev, h0, c0)
    jax.block_until_ready((logp_seq, attnh, hn, cn))

    # iterative pure-JAX reference (one forward per step)
    r_ah, r_h, r_c = attn_h_prev, h0, c0
    ref_lp = []
    for t in range(T_DEC):
        lp, r_ah, r_h, r_c = reference(params, words_bt[:, t:t + 1], enc, mask_bool, r_ah, r_h, r_c)
        ref_lp.append(lp)
    ref_lp = jnp.stack(ref_lp)

    assert jnp.allclose(logp_seq, ref_lp, atol=1e-3), "log-softmax sequence mismatch"
    assert jnp.allclose(attnh, r_ah, atol=1e-3), "attention hidden mismatch"
    assert jnp.allclose(hn, r_h, atol=1e-3), "LSTM h mismatch"
    assert jnp.allclose(cn, r_c, atol=1e-3), "LSTM c mismatch"

    # single-step call (exact module semantics: words shape (B, 1))
    lp1, ah1, (h1, c1) = decoder_forward(prepped, words_bt[:, 0:1], enc, mask_bool,
                                         attn_h_prev, h0, c0)
    r_lp1, r_ah1, r_h1, r_c1 = reference(params, words_bt[:, 0:1], enc, mask_bool,
                                         attn_h_prev, h0, c0)
    assert jnp.allclose(lp1, r_lp1, atol=3e-4), "single-step log-softmax mismatch"
    assert jnp.allclose(ah1, r_ah1, atol=3e-4), "single-step attention hidden mismatch"

    print("KERNEL_OK")
</pallas_src>

<mosaic_0001>
module attributes {stable_mosaic.version = 11 : i64} {
  func.func @decoder_kernel(%arg0: i32, %arg1: memref<12x1xi32, #tpu.memory_space<vmem>>, %arg2: memref<2x2x32xf32, #tpu.memory_space<vmem>>, %arg3: memref<2x2x32xf32, #tpu.memory_space<vmem>>, %arg4: memref<2x32xf32, #tpu.memory_space<vmem>>, %arg5: memref<2x8x32xf32, #tpu.memory_space<vmem>>, %arg6: memref<2x8x32xf32, #tpu.memory_space<vmem>>, %arg7: memref<2x8xf32, #tpu.memory_space<vmem>>, %arg8: memref<50x128xf32, #tpu.memory_space<vmem>>, %arg9: memref<2x64x128xf32, #tpu.memory_space<vmem>>, %arg10: memref<2x1x128xf32, #tpu.memory_space<vmem>>, %arg11: memref<64x32xf32, #tpu.memory_space<vmem>>, %arg12: memref<1x32xf32, #tpu.memory_space<vmem>>, %arg13: memref<32x128xf32, #tpu.memory_space<vmem>>, %arg14: memref<1x128xf32, #tpu.memory_space<vmem>>, %arg15: memref<12x128xf32, #tpu.memory_space<vmem>>, %arg16: memref<2x32xf32, #tpu.memory_space<vmem>>, %arg17: memref<2x2x32xf32, #tpu.memory_space<vmem>>, %arg18: memref<2x2x32xf32, #tpu.memory_space<vmem>>, %arg19: memref<2x2x64xf32, #tpu.memory_space<vmem>>, %arg20: memref<2x2x32xf32, #tpu.memory_space<vmem>>, %arg21: memref<2x64xf32, #tpu.memory_space<vmem>>, %arg22: memref<12x128xf32, #tpu.memory_space<vmem>>, %arg23: memref<12x32xf32, #tpu.memory_space<vmem>>) attributes {dimension_semantics = [#tpu.dimension_semantics<arbitrary>], iteration_bounds = array<i64: 1>, scalar_prefetch = 0 : i64, scratch_operands = 5 : i64, tpu.core_type = #tpu.core_type<tc>, window_params = [{pipeline_mode = #tpu.pipeline_mode<synchronous>, transform_indices = @transform_0, window_bounds = array<i64: 12, 1>}, {pipeline_mode = #tpu.pipeline_mode<synchronous>, transform_indices = @transform_1, window_bounds = array<i64: 2, 2, 32>}, {pipeline_mode = #tpu.pipeline_mode<synchronous>, transform_indices = @transform_2, window_bounds = array<i64: 2, 2, 32>}, {pipeline_mode = #tpu.pipeline_mode<synchronous>, transform_indices = @transform_3, window_bounds = array<i64: 2, 32>}, {pipeline_mode = #tpu.pipeline_mode<synchronous>, transform_indices = @transform_4, window_bounds = array<i64: 2, 8, 32>}, {pipeline_mode = #tpu.pipeline_mode<synchronous>, transform_indices = @transform_5, window_bounds = array<i64: 2, 8, 32>}, {pipeline_mode = #tpu.pipeline_mode<synchronous>, transform_indices = @transform_6, window_bounds = array<i64: 2, 8>}, {pipeline_mode = #tpu.pipeline_mode<synchronous>, transform_indices = @transform_7, window_bounds = array<i64: 50, 128>}, {pipeline_mode = #tpu.pipeline_mode<synchronous>, transform_indices = @transform_8, window_bounds = array<i64: 2, 64, 128>}, {pipeline_mode = #tpu.pipeline_mode<synchronous>, transform_indices = @transform_9, window_bounds = array<i64: 2, 1, 128>}, {pipeline_mode = #tpu.pipeline_mode<synchronous>, transform_indices = @transform_10, window_bounds = array<i64: 64, 32>}, {pipeline_mode = #tpu.pipeline_mode<synchronous>, transform_indices = @transform_11, window_bounds = array<i64: 1, 32>}, {pipeline_mode = #tpu.pipeline_mode<synchronous>, transform_indices = @transform_12, window_bounds = array<i64: 32, 128>}, {pipeline_mode = #tpu.pipeline_mode<synchronous>, transform_indices = @transform_13, window_bounds = array<i64: 1, 128>}, {pipeline_mode = #tpu.pipeline_mode<synchronous>, transform_indices = @transform_14, window_bounds = array<i64: 12, 128>}, {pipeline_mode = #tpu.pipeline_mode<synchronous>, transform_indices = @transform_15, window_bounds = array<i64: 2, 32>}, {pipeline_mode = #tpu.pipeline_mode<synchronous>, transform_indices = @transform_16, window_bounds = array<i64: 2, 2, 32>}, {pipeline_mode = #tpu.pipeline_mode<synchronous>, transform_indices = @transform_17, window_bounds = array<i64: 2, 2, 32>}]} {
    %c0 = arith.constant 0 : index
    %c0_0 = arith.constant 0 : index
    %c0_1 = arith.constant 0 : index
    %0 = vector.load %arg3[%c0, %c0_0, %c0_1] : memref<2x2x32xf32, #tpu.memory_space<vmem>>, vector<2x2x32xf32>
    %c0_2 = arith.constant 0 : index
    %c0_3 = arith.constant 0 : index
    %c0_4 = arith.constant 0 : index
    %1 = vector.load %arg20[%c0_2, %c0_3, %c0_4] : memref<2x2x32xf32, #tpu.memory_space<vmem>>, vector<2x2x32xf32>
    tpu.vector_store %arg20[%c0_2, %c0_3, %c0_4], %0 {strides = array<i32>} : memref<2x2x32xf32, #tpu.memory_space<vmem>>, vector<2x2x32xf32>,
    %c0_5 = arith.constant 0 : index
    %c0_6 = arith.constant 0 : index
    %2 = vector.load %arg4[%c0_5, %c0_6] : memref<2x32xf32, #tpu.memory_space<vmem>>, vector<2x32xf32>
    %c0_7 = arith.constant 0 : index
    %c0_8 = arith.constant 0 : index
    %c0_9 = arith.constant 0 : index
    %3 = vector.load %arg19[%c0_7, %c0_8, %c0_9] : memref<2x2x64xf32, #tpu.memory_space<vmem>>, vector<1x2x32xf32>
    %4 = vector.shape_cast %3 : vector<1x2x32xf32> to vector<2x32xf32>
    %5 = vector.shape_cast %2 : vector<2x32xf32> to vector<1x2x32xf32>
    tpu.vector_store %arg19[%c0_7, %c0_8, %c0_9], %5 {strides = array<i32>} : memref<2x2x64xf32, #tpu.memory_space<vmem>>, vector<1x2x32xf32>,
    %c0_10 = arith.constant 0 : index
    %c0_11 = arith.constant 0 : index
    %c0_12 = arith.constant 0 : index
    %6 = vector.load %arg2[%c0_10, %c0_11, %c0_12] : memref<2x2x32xf32, #tpu.memory_space<vmem>>, vector<1x2x32xf32>
    %7 = vector.shape_cast %6 : vector<1x2x32xf32> to vector<2x32xf32>
    %c0_13 = arith.constant 0 : index
    %c0_14 = arith.constant 0 : index
    %c32 = arith.constant 32 : index
    %8 = vector.load %arg19[%c0_13, %c0_14, %c32] : memref<2x2x64xf32, #tpu.memory_space<vmem>>, vector<1x2x32xf32>
    %9 = vector.shape_cast %8 : vector<1x2x32xf32> to vector<2x32xf32>
    %10 = vector.shape_cast %7 : vector<2x32xf32> to vector<1x2x32xf32>
    tpu.vector_store %arg19[%c0_13, %c0_14, %c32], %10 {strides = array<i32>} : memref<2x2x64xf32, #tpu.memory_space<vmem>>, vector<1x2x32xf32>,
    %c1 = arith.constant 1 : index
    %c0_15 = arith.constant 0 : index
    %c0_16 = arith.constant 0 : index
    %11 = vector.load %arg2[%c1, %c0_15, %c0_16] : memref<2x2x32xf32, #tpu.memory_space<vmem>>, vector<1x2x32xf32>
    %12 = vector.shape_cast %11 : vector<1x2x32xf32> to vector<2x32xf32>
    %c1_17 = arith.constant 1 : index
    %c0_18 = arith.constant 0 : index
    %c32_19 = arith.constant 32 : index
    %13 = vector.load %arg19[%c1_17, %c0_18, %c32_19] : memref<2x2x64xf32, #tpu.memory_space<vmem>>, vector<1x2x32xf32>
    %14 = vector.shape_cast %13 : vector<1x2x32xf32> to vector<2x32xf32>
    %15 = vector.shape_cast %12 : vector<2x32xf32> to vector<1x2x32xf32>
    tpu.vector_store %arg19[%c1_17, %c0_18, %c32_19], %15 {strides = array<i32>} : memref<2x2x64xf32, #tpu.memory_space<vmem>>, vector<1x2x32xf32>,
    %cst = arith.constant 0.000000e+00 : f32
    %16 = vector.broadcast %cst : f32 to vector<2x32xf32>
    %c1_20 = arith.constant 1 : index
    %c0_21 = arith.constant 0 : index
    %c0_22 = arith.constant 0 : index
    %17 = vector.load %arg19[%c1_20, %c0_21, %c0_22] : memref<2x2x64xf32, #tpu.memory_space<vmem>>, vector<1x2x32xf32>
    %18 = vector.shape_cast %17 : vector<1x2x32xf32> to vector<2x32xf32>
    %19 = vector.shape_cast %16 : vector<2x32xf32> to vector<1x2x32xf32>
    tpu.vector_store %arg19[%c1_20, %c0_21, %c0_22], %19 {strides = array<i32>} : memref<2x2x64xf32, #tpu.memory_space<vmem>>, vector<1x2x32xf32>,
    %20 = tpu.iota {dimensions = array<i32: 1>} : vector<12x50xi32>
    %c0_23 = arith.constant 0 : index
    %c0_24 = arith.constant 0 : index
    %21 = vector.load %arg1[%c0_23, %c0_24] : memref<12x1xi32, #tpu.memory_space<vmem>>, vector<12x1xi32>
    %22 = vector.broadcast %21 : vector<12x1xi32> to vector<12x50xi32>
    %23 = arith.cmpi eq, %20, %22 : vector<12x50xi32>
    %24 = arith.extui %23 : vector<12x50xi1> to vector<12x50xi32>
    %25 = arith.sitofp %24 : vector<12x50xi32> to vector<12x50xf32>
    %c0_25 = arith.constant 0 : index
    %c0_26 = arith.constant 0 : index
    %26 = vector.load %arg8[%c0_25, %c0_26] : memref<50x128xf32, #tpu.memory_space<vmem>>, vector<50x128xf32>
    %cst_27 = arith.constant dense<0.000000e+00> : vector<12x128xf32>
    %27 = tpu.matmul %25, %26, %cst_27 {dimension_numbers = #tpu.dot_dimension_numbers<[1], [0], [0], [1], [0, 0, 1, 1], [], []>} : vector<12x50xf32>, vector<50x128xf32>, vector<12x128xf32> -> vector<12x128xf32>
    %c0_28 = arith.constant 0 : index
    %c0_29 = arith.constant 0 : index
    %28 = vector.load %arg22[%c0_28, %c0_29] : memref<12x128xf32, #tpu.memory_space<vmem>>, vector<12x128xf32>
    tpu.vector_store %arg22[%c0_28, %c0_29], %27 {strides = array<i32>} : memref<12x128xf32, #tpu.memory_space<vmem>>, vector<12x128xf32>,
    %c0_i32 = arith.constant 0 : i32
    %c1_i32 = arith.constant 1 : i32
    %29 = arith.muli %c0_i32, %c1_i32 : i32
    %c0_i32_30 = arith.constant 0 : i32
    %30 = arith.addi %c0_i32_30, %29 : i32
    %c2_i32 = arith.constant 2 : i32
    %31 = arith.muli %30, %c2_i32 : i32
    %32 = arith.index_cast %31 : i32 to index
    %c0_31 = arith.constant 0 : index
    %33 = vector.load %arg22[%32, %c0_31] : memref<12x128xf32, #tpu.memory_space<vmem>>, vector<2x128xf32>
    %c0_32 = arith.constant 0 : index
    %c0_33 = arith.constant 0 : index
    %c0_34 = arith.constant 0 : index
    %34 = vector.load %arg19[%c0_32, %c0_33, %c0_34] : memref<2x2x64xf32, #tpu.memory_space<vmem>>, vector<1x2x64xf32>
    %35 = vector.shape_cast %34 : vector<1x2x64xf32> to vector<2x64xf32>
    %c0_35 = arith.constant 0 : index
    %c0_36 = arith.constant 0 : index
    %c0_37 = arith.constant 0 : index
    %36 = vector.load %arg9[%c0_35, %c0_36, %c0_37] : memref<2x64x128xf32, #tpu.memory_space<vmem>>, vector<1x64x128xf32>
    %37 = vector.shape_cast %36 : vector<1x64x128xf32> to vector<64x128xf32>
    %cst_38 = arith.constant dense<0.000000e+00> : vector<2x128xf32>
    %38 = tpu.matmul %35, %37, %cst_38 {dimension_numbers = #tpu.dot_dimension_numbers<[1], [0], [0], [1], [0, 0, 1, 1], [], []>} : vector<2x64xf32>, vector<64x128xf32>, vector<2x128xf32> -> vector<2x128xf32>
    %c0_39 = arith.constant 0 : index
    %c0_40 = arith.constant 0 : index
    %c0_41 = arith.constant 0 : index
    %39 = vector.load %arg10[%c0_39, %c0_40, %c0_41] : memref<2x1x128xf32, #tpu.memory_space<vmem>>, vector<1x1x128xf32>
    %40 = vector.shape_cast %39 : vector<1x1x128xf32> to vector<1x128xf32>
    %41 = vector.broadcast %40 : vector<1x128xf32> to vector<2x128xf32>
    %42 = arith.addf %38, %41 : vector<2x128xf32>
    %43 = arith.addf %42, %33 : vector<2x128xf32>
    %c0_42 = arith.constant 0 : index
    %c0_43 = arith.constant 0 : index
    %c0_44 = arith.constant 0 : index
    %44 = vector.load %arg20[%c0_42, %c0_43, %c0_44] : memref<2x2x32xf32, #tpu.memory_space<vmem>>, vector<1x2x32xf32>
    %45 = vector.shape_cast %44 : vector<1x2x32xf32> to vector<2x32xf32>
    %46 = arith.negf %43 : vector<2x128xf32>
    %47 = math.exp %46 : vector<2x128xf32>
    %cst_45 = arith.constant 1.000000e+00 : f32
    %48 = vector.broadcast %cst_45 : f32 to vector<2x128xf32>
    %49 = arith.addf %48, %47 : vector<2x128xf32>
    %50 = arith.divf %48, %49 : vector<2x128xf32>
    %51 = math.tanh %43 : vector<2x128xf32>
    %52 = vector.extract_strided_slice %50 {offsets = [0, 0], sizes = [2, 32], strides = [1, 1]} : vector<2x128xf32> to vector<2x32xf32>
    %53 = vector.extract_strided_slice %50 {offsets = [0, 32], sizes = [2, 32], strides = [1, 1]} : vector<2x128xf32> to vector<2x32xf32>
    %54 = vector.extract_strided_slice %51 {offsets = [0, 64], sizes = [2, 32], strides = [1, 1]} : vector<2x128xf32> to vector<2x32xf32>
    %55 = vector.extract_strided_slice %50 {offsets = [0, 96], sizes = [2, 32], strides = [1, 1]} : vector<2x128xf32> to vector<2x32xf32>
    %56 = arith.mulf %53, %45 : vector<2x32xf32>
    %57 = arith.mulf %52, %54 : vector<2x32xf32>
    %58 = arith.addf %56, %57 : vector<2x32xf32>
    %59 = math.tanh %58 : vector<2x32xf32>
    %60 = arith.mulf %55, %59 : vector<2x32xf32>
    %c0_46 = arith.constant 0 : index
    %c0_47 = arith.constant 0 : index
    %c0_48 = arith.constant 0 : index
    %61 = vector.load %arg20[%c0_46, %c0_47, %c0_48] : memref<2x2x32xf32, #tpu.memory_space<vmem>>, vector<1x2x32xf32>
    %62 = vector.shape_cast %61 : vector<1x2x32xf32> to vector<2x32xf32>
    %63 = vector.shape_cast %58 : vector<2x32xf32> to vector<1x2x32xf32>
    tpu.vector_store %arg20[%c0_46, %c0_47, %c0_48], %63 {strides = array<i32>} : memref<2x2x32xf32, #tpu.memory_space<vmem>>, vector<1x2x32xf32>,
    %c0_49 = arith.constant 0 : index
    %c0_50 = arith.constant 0 : index
    %c32_51 = arith.constant 32 : index
    %64 = vector.load %arg19[%c0_49, %c0_50, %c32_51] : memref<2x2x64xf32, #tpu.memory_space<vmem>>, vector<1x2x32xf32>
    %65 = vector.shape_cast %64 : vector<1x2x32xf32> to vector<2x32xf32>
    %66 = vector.shape_cast %60 : vector<2x32xf32> to vector<1x2x32xf32>
    tpu.vector_store %arg19[%c0_49, %c0_50, %c32_51], %66 {strides = array<i32>} : memref<2x2x64xf32, #tpu.memory_space<vmem>>, vector<1x2x32xf32>,
    %c1_52 = arith.constant 1 : index
    %c0_53 = arith.constant 0 : index
    %c0_54 = arith.constant 0 : index
    %67 = vector.load %arg19[%c1_52, %c0_53, %c0_54] : memref<2x2x64xf32, #tpu.memory_space<vmem>>, vector<1x2x32xf32>
    %68 = vector.shape_cast %67 : vector<1x2x32xf32> to vector<2x32xf32>
    %69 = vector.shape_cast %60 : vector<2x32xf32> to vector<1x2x32xf32>
    tpu.vector_store %arg19[%c1_52, %c0_53, %c0_54], %69 {strides = array<i32>} : memref<2x2x64xf32, #tpu.memory_space<vmem>>, vector<1x2x32xf32>,
    %c1_55 = arith.constant 1 : index
    %c0_56 = arith.constant 0 : index
    %c0_57 = arith.constant 0 : index
    %70 = vector.load %arg19[%c1_55, %c0_56, %c0_57] : memref<2x2x64xf32, #tpu.memory_space<vmem>>, vector<1x2x64xf32>
    %71 = vector.shape_cast %70 : vector<1x2x64xf32> to vector<2x64xf32>
    %c1_58 = arith.constant 1 : index
    %c0_59 = arith.constant 0 : index
    %c0_60 = arith.constant 0 : index
    %72 = vector.load %arg9[%c1_58, %c0_59, %c0_60] : memref<2x64x128xf32, #tpu.memory_space<vmem>>, vector<1x64x128xf32>
    %73 = vector.shape_cast %72 : vector<1x64x128xf32> to vector<64x128xf32>
    %cst_61 = arith.constant dense<0.000000e+00> : vector<2x128xf32>
    %74 = tpu.matmul %71, %73, %cst_61 {dimension_numbers = #tpu.dot_dimension_numbers<[1], [0], [0], [1], [0, 0, 1, 1], [], []>} : vector<2x64xf32>, vector<64x128xf32>, vector<2x128xf32> -> vector<2x128xf32>
    %c1_62 = arith.constant 1 : index
    %c0_63 = arith.constant 0 : index
    %c0_64 = arith.constant 0 : index
    %75 = vector.load %arg10[%c1_62, %c0_63, %c0_64] : memref<2x1x128xf32, #tpu.memory_space<vmem>>, vector<1x1x128xf32>
    %76 = vector.shape_cast %75 : vector<1x1x128xf32> to vector<1x128xf32>
    %77 = vector.broadcast %76 : vector<1x128xf32> to vector<2x128xf32>
    %78 = arith.addf %74, %77 : vector<2x128xf32>
    %c1_65 = arith.constant 1 : index
    %c0_66 = arith.constant 0 : index
    %c0_67 = arith.constant 0 : index
    %79 = vector.load %arg20[%c1_65, %c0_66, %c0_67] : memref<2x2x32xf32, #tpu.memory_space<vmem>>, vector<1x2x32xf32>
    %80 = vector.shape_cast %79 : vector<1x2x32xf32> to vector<2x32xf32>
    %81 = arith.negf %78 : vector<2x128xf32>
    %82 = math.exp %81 : vector<2x128xf32>
    %cst_68 = arith.constant 1.000000e+00 : f32
    %83 = vector.broadcast %cst_68 : f32 to vector<2x128xf32>
    %84 = arith.addf %83, %82 : vector<2x128xf32>
    %85 = arith.divf %83, %84 : vector<2x128xf32>
    %86 = math.tanh %78 : vector<2x128xf32>
    %87 = vector.extract_strided_slice %85 {offsets = [0, 0], sizes = [2, 32], strides = [1, 1]} : vector<2x128xf32> to vector<2x32xf32>
    %88 = vector.extract_strided_slice %85 {offsets = [0, 32], sizes = [2, 32], strides = [1, 1]} : vector<2x128xf32> to vector<2x32xf32>
    %89 = vector.extract_strided_slice %86 {offsets = [0, 64], sizes = [2, 32], strides = [1, 1]} : vector<2x128xf32> to vector<2x32xf32>
    %90 = vector.extract_strided_slice %85 {offsets = [0, 96], sizes = [2, 32], strides = [1, 1]} : vector<2x128xf32> to vector<2x32xf32>
    %91 = arith.mulf %88, %80 : vector<2x32xf32>
    %92 = arith.mulf %87, %89 : vector<2x32xf32>
    %93 = arith.addf %91, %92 : vector<2x32xf32>
    %94 = math.tanh %93 : vector<2x32xf32>
    %95 = arith.mulf %90, %94 : vector<2x32xf32>
    %c1_69 = arith.constant 1 : index
    %c0_70 = arith.constant 0 : index
    %c0_71 = arith.constant 0 : index
    %96 = vector.load %arg20[%c1_69, %c0_70, %c0_71] : memref<2x2x32xf32, #tpu.memory_space<vmem>>, vector<1x2x32xf32>
    %97 = vector.shape_cast %96 : vector<1x2x32xf32> to vector<2x32xf32>
    %98 = vector.shape_cast %93 : vector<2x32xf32> to vector<1x2x32xf32>
    tpu.vector_store %arg20[%c1_69, %c0_70, %c0_71], %98 {strides = array<i32>} : memref<2x2x32xf32, #tpu.memory_space<vmem>>, vector<1x2x32xf32>,
    %c1_72 = arith.constant 1 : index
    %c0_73 = arith.constant 0 : index
    %c32_74 = arith.constant 32 : index
    %99 = vector.load %arg19[%c1_72, %c0_73, %c32_74] : memref<2x2x64xf32, #tpu.memory_space<vmem>>, vector<1x2x32xf32>
    %100 = vector.shape_cast %99 : vector<1x2x32xf32> to vector<2x32xf32>
    %101 = vector.shape_cast %95 : vector<2x32xf32> to vector<1x2x32xf32>
    tpu.vector_store %arg19[%c1_72, %c0_73, %c32_74], %101 {strides = array<i32>} : memref<2x2x64xf32, #tpu.memory_space<vmem>>, vector<1x2x32xf32>,
    %c0_75 = arith.constant 0 : index
    %c0_76 = arith.constant 0 : index
    %c0_77 = arith.constant 0 : index
    %102 = vector.load %arg6[%c0_75, %c0_76, %c0_77] : memref<2x8x32xf32, #tpu.memory_space<vmem>>, vector<2x8x32xf32>
    %103 = vector.shape_cast %95 : vector<2x32xf32> to vector<2x1x32xf32>
    %104 = vector.broadcast %103 : vector<2x1x32xf32> to vector<2x8x32xf32>
    %105 = arith.mulf %102, %104 : vector<2x8x32xf32>
    %cst_78 = arith.constant dense<0.000000e+00> : vector<2x8xf32>
    %106 = vector.multi_reduction <add>, %105, %cst_78 [2] : vector<2x8x32xf32> to vector<2x8xf32>
    %c0_79 = arith.constant 0 : index
    %c0_80 = arith.constant 0 : index
    %107 = vector.load %arg7[%c0_79, %c0_80] : memref<2x8xf32, #tpu.memory_space<vmem>>, vector<2x8xf32>
    %108 = arith.addf %106, %107 : vector<2x8xf32>
    %cst_81 = arith.constant dense<0xFF800000> : vector<2xf32>
    %109 = vector.multi_reduction <maximumf>, %108, %cst_81 [1] : vector<2x8xf32> to vector<2xf32>
    %110 = vector.shape_cast %109 : vector<2xf32> to vector<2x1xf32>
    %111 = vector.broadcast %110 : vector<2x1xf32> to vector<2x8xf32>
    %112 = arith.subf %108, %111 : vector<2x8xf32>
    %113 = math.exp %112 : vector<2x8xf32>
    %cst_82 = arith.constant dense<0.000000e+00> : vector<2xf32>
    %114 = vector.multi_reduction <add>, %113, %cst_82 [1] : vector<2x8xf32> to vector<2xf32>
    %115 = vector.shape_cast %114 : vector<2xf32> to vector<2x1xf32>
    %c0_83 = arith.constant 0 : index
    %c0_84 = arith.constant 0 : index
    %c0_85 = arith.constant 0 : index
    %116 = vector.load %arg5[%c0_83, %c0_84, %c0_85] : memref<2x8x32xf32, #tpu.memory_space<vmem>>, vector<2x8x32xf32>
    %117 = vector.shape_cast %113 : vector<2x8xf32> to vector<2x8x1xf32>
    %118 = vector.broadcast %117 : vector<2x8x1xf32> to vector<2x8x32xf32>
    %119 = arith.mulf %116, %118 : vector<2x8x32xf32>
    %cst_86 = arith.constant dense<0.000000e+00> : vector<2x32xf32>
    %120 = vector.multi_reduction <add>, %119, %cst_86 [1] : vector<2x8x32xf32> to vector<2x32xf32>
    %121 = tpu.reciprocal %115 : vector<2x1xf32> -> vector<2x1xf32>
    %122 = vector.broadcast %121 : vector<2x1xf32> to vector<2x32xf32>
    %123 = arith.mulf %120, %122 : vector<2x32xf32>
    %c0_87 = arith.constant 0 : index
    %c0_88 = arith.constant 0 : index
    %124 = vector.load %arg21[%c0_87, %c0_88] : memref<2x64xf32, #tpu.memory_space<vmem>>, vector<2x32xf32>
    tpu.vector_store %arg21[%c0_87, %c0_88], %123 {strides = array<i32>} : memref<2x64xf32, #tpu.memory_space<vmem>>, vector<2x32xf32>,
    %c0_89 = arith.constant 0 : index
    %c32_90 = arith.constant 32 : index
    %125 = vector.load %arg21[%c0_89, %c32_90] : memref<2x64xf32, #tpu.memory_space<vmem>>, vector<2x32xf32>
    tpu.vector_store %arg21[%c0_89, %c32_90], %95 {strides = array<i32>} : memref<2x64xf32, #tpu.memory_space<vmem>>, vector<2x32xf32>,
    %c0_91 = arith.constant 0 : index
    %c0_92 = arith.constant 0 : index
    %126 = vector.load %arg21[%c0_91, %c0_92] : memref<2x64xf32, #tpu.memory_space<vmem>>, vector<2x64xf32>
    %c0_93 = arith.constant 0 : index
    %c0_94 = arith.constant 0 : index
    %127 = vector.load %arg11[%c0_93, %c0_94] : memref<64x32xf32, #tpu.memory_space<vmem>>, vector<64x32xf32>
    %cst_95 = arith.constant dense<0.000000e+00> : vector<2x32xf32>
    %128 = tpu.matmul %126, %127, %cst_95 {dimension_numbers = #tpu.dot_dimension_numbers<[1], [0], [0], [1], [0, 0, 1, 1], [], []>} : vector<2x64xf32>, vector<64x32xf32>, vector<2x32xf32> -> vector<2x32xf32>
    %c0_96 = arith.constant 0 : index
    %c0_97 = arith.constant 0 : index
    %129 = vector.load %arg12[%c0_96, %c0_97] : memref<1x32xf32, #tpu.memory_space<vmem>>, vector<1x32xf32>
    %130 = vector.broadcast %129 : vector<1x32xf32> to vector<2x32xf32>
    %131 = arith.addf %128, %130 : vector<2x32xf32>
    %132 = math.tanh %131 : vector<2x32xf32>
    %c0_98 = arith.constant 0 : index
    %c0_99 = arith.constant 0 : index
    %c0_100 = arith.constant 0 : index
    %133 = vector.load %arg19[%c0_98, %c0_99, %c0_100] : memref<2x2x64xf32, #tpu.memory_space<vmem>>, vector<1x2x32xf32>
    %134 = vector.shape_cast %133 : vector<1x2x32xf32> to vector<2x32xf32>
    %135 = vector.shape_cast %132 : vector<2x32xf32> to vector<1x2x32xf32>
    tpu.vector_store %arg19[%c0_98, %c0_99, %c0_100], %135 {strides = array<i32>} : memref<2x2x64xf32, #tpu.memory_space<vmem>>, vector<1x2x32xf32>,
    %c2_i32_101 = arith.constant 2 : i32
    %136 = arith.muli %30, %c2_i32_101 : i32
    %137 = arith.index_cast %136 : i32 to index
    %c0_102 = arith.constant 0 : index
    %138 = vector.load %arg23[%137, %c0_102] : memref<12x32xf32, #tpu.memory_space<vmem>>, vector<2x32xf32>
    tpu.vector_store %arg23[%137, %c0_102], %132 {strides = array<i32>} : memref<12x32xf32, #tpu.memory_space<vmem>>, vector<2x32xf32>,
    %c1_i32_103 = arith.constant 1 : i32
    %c1_i32_104 = arith.constant 1 : i32
    %139 = arith.muli %c1_i32_103, %c1_i32_104 : i32
    %c0_i32_105 = arith.constant 0 : i32
    %140 = arith.addi %c0_i32_105, %139 : i32
    %c2_i32_106 = arith.constant 2 : i32
    %141 = arith.muli %140, %c2_i32_106 : i32
    %142 = arith.index_cast %141 : i32 to index
    %c0_107 = arith.constant 0 : index
    %143 = vector.load %arg22[%142, %c0_107] : memref<12x128xf32, #tpu.memory_space<vmem>>, vector<2x128xf32>
    %c0_108 = arith.constant 0 : index
    %c0_109 = arith.constant 0 : index
    %c0_110 = arith.constant 0 : index
    %144 = vector.load %arg19[%c0_108, %c0_109, %c0_110] : memref<2x2x64xf32, #tpu.memory_space<vmem>>, vector<1x2x64xf32>
    %145 = vector.shape_cast %144 : vector<1x2x64xf32> to vector<2x64xf32>
    %c0_111 = arith.constant 0 : index
    %c0_112 = arith.constant 0 : index
    %c0_113 = arith.constant 0 : index
    %146 = vector.load %arg9[%c0_111, %c0_112, %c0_113] : memref<2x64x128xf32, #tpu.memory_space<vmem>>, vector<1x64x128xf32>
    %147 = vector.shape_cast %146 : vector<1x64x128xf32> to vector<64x128xf32>
    %cst_114 = arith.constant dense<0.000000e+00> : vector<2x128xf32>
    %148 = tpu.matmul %145, %147, %cst_114 {dimension_numbers = #tpu.dot_dimension_numbers<[1], [0], [0], [1], [0, 0, 1, 1], [], []>} : vector<2x64xf32>, vector<64x128xf32>, vector<2x128xf32> -> vector<2x128xf32>
    %c0_115 = arith.constant 0 : index
    %c0_116 = arith.constant 0 : index
    %c0_117 = arith.constant 0 : index
    %149 = vector.load %arg10[%c0_115, %c0_116, %c0_117] : memref<2x1x128xf32, #tpu.memory_space<vmem>>, vector<1x1x128xf32>
    %150 = vector.shape_cast %149 : vector<1x1x128xf32> to vector<1x128xf32>
    %151 = vector.broadcast %150 : vector<1x128xf32> to vector<2x128xf32>
    %152 = arith.addf %148, %151 : vector<2x128xf32>
    %153 = arith.addf %152, %143 : vector<2x128xf32>
    %c0_118 = arith.constant 0 : index
    %c0_119 = arith.constant 0 : index
    %c0_120 = arith.constant 0 : index
    %154 = vector.load %arg20[%c0_118, %c0_119, %c0_120] : memref<2x2x32xf32, #tpu.memory_space<vmem>>, vector<1x2x32xf32>
    %155 = vector.shape_cast %154 : vector<1x2x32xf32> to vector<2x32xf32>
    %156 = arith.negf %153 : vector<2x128xf32>
    %157 = math.exp %156 : vector<2x128xf32>
    %cst_121 = arith.constant 1.000000e+00 : f32
    %158 = vector.broadcast %cst_121 : f32 to vector<2x128xf32>
    %159 = arith.addf %158, %157 : vector<2x128xf32>
    %160 = arith.divf %158, %159 : vector<2x128xf32>
    %161 = math.tanh %153 : vector<2x128xf32>
    %162 = vector.extract_strided_slice %160 {offsets = [0, 0], sizes = [2, 32], strides = [1, 1]} : vector<2x128xf32> to vector<2x32xf32>
    %163 = vector.extract_strided_slice %160 {offsets = [0, 32], sizes = [2, 32], strides = [1, 1]} : vector<2x128xf32> to vector<2x32xf32>
    %164 = vector.extract_strided_slice %161 {offsets = [0, 64], sizes = [2, 32], strides = [1, 1]} : vector<2x128xf32> to vector<2x32xf32>
    %165 = vector.extract_strided_slice %160 {offsets = [0, 96], sizes = [2, 32], strides = [1, 1]} : vector<2x128xf32> to vector<2x32xf32>
    %166 = arith.mulf %163, %155 : vector<2x32xf32>
    %167 = arith.mulf %162, %164 : vector<2x32xf32>
    %168 = arith.addf %166, %167 : vector<2x32xf32>
    %169 = math.tanh %168 : vector<2x32xf32>
    %170 = arith.mulf %165, %169 : vector<2x32xf32>
    %c0_122 = arith.constant 0 : index
    %c0_123 = arith.constant 0 : index
    %c0_124 = arith.constant 0 : index
    %171 = vector.load %arg20[%c0_122, %c0_123, %c0_124] : memref<2x2x32xf32, #tpu.memory_space<vmem>>, vector<1x2x32xf32>
    %172 = vector.shape_cast %171 : vector<1x2x32xf32> to vector<2x32xf32>
    %173 = vector.shape_cast %168 : vector<2x32xf32> to vector<1x2x32xf32>
    tpu.vector_store %arg20[%c0_122, %c0_123, %c0_124], %173 {strides = array<i32>} : memref<2x2x32xf32, #tpu.memory_space<vmem>>, vector<1x2x32xf32>,
    %c0_125 = arith.constant 0 : index
    %c0_126 = arith.constant 0 : index
    %c32_127 = arith.constant 32 : index
    %174 = vector.load %arg19[%c0_125, %c0_126, %c32_127] : memref<2x2x64xf32, #tpu.memory_space<vmem>>, vector<1x2x32xf32>
    %175 = vector.shape_cast %174 : vector<1x2x32xf32> to vector<2x32xf32>
    %176 = vector.shape_cast %170 : vector<2x32xf32> to vector<1x2x32xf32>
    tpu.vector_store %arg19[%c0_125, %c0_126, %c32_127], %176 {strides = array<i32>} : memref<2x2x64xf32, #tpu.memory_space<vmem>>, vector<1x2x32xf32>,
    %c1_128 = arith.constant 1 : index
    %c0_129 = arith.constant 0 : index
    %c0_130 = arith.constant 0 : index
    %177 = vector.load %arg19[%c1_128, %c0_129, %c0_130] : memref<2x2x64xf32, #tpu.memory_space<vmem>>, vector<1x2x32xf32>
    %178 = vector.shape_cast %177 : vector<1x2x32xf32> to vector<2x32xf32>
    %179 = vector.shape_cast %170 : vector<2x32xf32> to vector<1x2x32xf32>
    tpu.vector_store %arg19[%c1_128, %c0_129, %c0_130], %179 {strides = array<i32>} : memref<2x2x64xf32, #tpu.memory_space<vmem>>, vector<1x2x32xf32>,
    %c1_131 = arith.constant 1 : index
    %c0_132 = arith.constant 0 : index
    %c0_133 = arith.constant 0 : index
    %180 = vector.load %arg19[%c1_131, %c0_132, %c0_133] : memref<2x2x64xf32, #tpu.memory_space<vmem>>, vector<1x2x64xf32>
    %181 = vector.shape_cast %180 : vector<1x2x64xf32> to vector<2x64xf32>
    %c1_134 = arith.constant 1 : index
    %c0_135 = arith.constant 0 : index
    %c0_136 = arith.constant 0 : index
    %182 = vector.load %arg9[%c1_134, %c0_135, %c0_136] : memref<2x64x128xf32, #tpu.memory_space<vmem>>, vector<1x64x128xf32>
    %183 = vector.shape_cast %182 : vector<1x64x128xf32> to vector<64x128xf32>
    %cst_137 = arith.constant dense<0.000000e+00> : vector<2x128xf32>
    %184 = tpu.matmul %181, %183, %cst_137 {dimension_numbers = #tpu.dot_dimension_numbers<[1], [0], [0], [1], [0, 0, 1, 1], [], []>} : vector<2x64xf32>, vector<64x128xf32>, vector<2x128xf32> -> vector<2x128xf32>
    %c1_138 = arith.constant 1 : index
    %c0_139 = arith.constant 0 : index
    %c0_140 = arith.constant 0 : index
    %185 = vector.load %arg10[%c1_138, %c0_139, %c0_140] : memref<2x1x128xf32, #tpu.memory_space<vmem>>, vector<1x1x128xf32>
    %186 = vector.shape_cast %185 : vector<1x1x128xf32> to vector<1x128xf32>
    %187 = vector.broadcast %186 : vector<1x128xf32> to vector<2x128xf32>
    %188 = arith.addf %184, %187 : vector<2x128xf32>
    %c1_141 = arith.constant 1 : index
    %c0_142 = arith.constant 0 : index
    %c0_143 = arith.constant 0 : index
    %189 = vector.load %arg20[%c1_141, %c0_142, %c0_143] : memref<2x2x32xf32, #tpu.memory_space<vmem>>, vector<1x2x32xf32>
    %190 = vector.shape_cast %189 : vector<1x2x32xf32> to vector<2x32xf32>
    %191 = arith.negf %188 : vector<2x128xf32>
    %192 = math.exp %191 : vector<2x128xf32>
    %cst_144 = arith.constant 1.000000e+00 : f32
    %193 = vector.broadcast %cst_144 : f32 to vector<2x128xf32>
    %194 = arith.addf %193, %192 : vector<2x128xf32>
    %195 = arith.divf %193, %194 : vector<2x128xf32>
    %196 = math.tanh %188 : vector<2x128xf32>
    %197 = vector.extract_strided_slice %195 {offsets = [0, 0], sizes = [2, 32], strides = [1, 1]} : vector<2x128xf32> to vector<2x32xf32>
    %198 = vector.extract_strided_slice %195 {offsets = [0, 32], sizes = [2, 32], strides = [1, 1]} : vector<2x128xf32> to vector<2x32xf32>
    %199 = vector.extract_strided_slice %196 {offsets = [0, 64], sizes = [2, 32], strides = [1, 1]} : vector<2x128xf32> to vector<2x32xf32>
    %200 = vector.extract_strided_slice %195 {offsets = [0, 96], sizes = [2, 32], strides = [1, 1]} : vector<2x128xf32> to vector<2x32xf32>
    %201 = arith.mulf %198, %190 : vector<2x32xf32>
    %202 = arith.mulf %197, %199 : vector<2x32xf32>
    %203 = arith.addf %201, %202 : vector<2x32xf32>
    %204 = math.tanh %203 : vector<2x32xf32>
    %205 = arith.mulf %200, %204 : vector<2x32xf32>
    %c1_145 = arith.constant 1 : index
    %c0_146 = arith.constant 0 : index
    %c0_147 = arith.constant 0 : index
    %206 = vector.load %arg20[%c1_145, %c0_146, %c0_147] : memref<2x2x32xf32, #tpu.memory_space<vmem>>, vector<1x2x32xf32>
    %207 = vector.shape_cast %206 : vector<1x2x32xf32> to vector<2x32xf32>
    %208 = vector.shape_cast %203 : vector<2x32xf32> to vector<1x2x32xf32>
    tpu.vector_store %arg20[%c1_145, %c0_146, %c0_147], %208 {strides = array<i32>} : memref<2x2x32xf32, #tpu.memory_space<vmem>>, vector<1x2x32xf32>,
    %c1_148 = arith.constant 1 : index
    %c0_149 = arith.constant 0 : index
    %c32_150 = arith.constant 32 : index
    %209 = vector.load %arg19[%c1_148, %c0_149, %c32_150] : memref<2x2x64xf32, #tpu.memory_space<vmem>>, vector<1x2x32xf32>
    %210 = vector.shape_cast %209 : vector<1x2x32xf32> to vector<2x32xf32>
    %211 = vector.shape_cast %205 : vector<2x32xf32> to vector<1x2x32xf32>
    tpu.vector_store %arg19[%c1_148, %c0_149, %c32_150], %211 {strides = array<i32>} : memref<2x2x64xf32, #tpu.memory_space<vmem>>, vector<1x2x32xf32>,
    %c0_151 = arith.constant 0 : index
    %c0_152 = arith.constant 0 : index
    %c0_153 = arith.constant 0 : index
    %212 = vector.load %arg6[%c0_151, %c0_152, %c0_153] : memref<2x8x32xf32, #tpu.memory_space<vmem>>, vector<2x8x32xf32>
    %213 = vector.shape_cast %205 : vector<2x32xf32> to vector<2x1x32xf32>
    %214 = vector.broadcast %213 : vector<2x1x32xf32> to vector<2x8x32xf32>
    %215 = arith.mulf %212, %214 : vector<2x8x32xf32>
    %cst_154 = arith.constant dense<0.000000e+00> : vector<2x8xf32>
    %216 = vector.multi_reduction <add>, %215, %cst_154 [2] : vector<2x8x32xf32> to vector<2x8xf32>
    %c0_155 = arith.constant 0 : index
    %c0_156 = arith.constant 0 : index
    %217 = vector.load %arg7[%c0_155, %c0_156] : memref<2x8xf32, #tpu.memory_space<vmem>>, vector<2x8xf32>
    %218 = arith.addf %216, %217 : vector<2x8xf32>
    %cst_157 = arith.constant dense<0xFF800000> : vector<2xf32>
    %219 = vector.multi_reduction <maximumf>, %218, %cst_157 [1] : vector<2x8xf32> to vector<2xf32>
    %220 = vector.shape_cast %219 : vector<2xf32> to vector<2x1xf32>
    %221 = vector.broadcast %220 : vector<2x1xf32> to vector<2x8xf32>
    %222 = arith.subf %218, %221 : vector<2x8xf32>
    %223 = math.exp %222 : vector<2x8xf32>
    %cst_158 = arith.constant dense<0.000000e+00> : vector<2xf32>
    %224 = vector.multi_reduction <add>, %223, %cst_158 [1] : vector<2x8xf32> to vector<2xf32>
    %225 = vector.shape_cast %224 : vector<2xf32> to vector<2x1xf32>
    %c0_159 = arith.constant 0 : index
    %c0_160 = arith.constant 0 : index
    %c0_161 = arith.constant 0 : index
    %226 = vector.load %arg5[%c0_159, %c0_160, %c0_161] : memref<2x8x32xf32, #tpu.memory_space<vmem>>, vector<2x8x32xf32>
    %227 = vector.shape_cast %223 : vector<2x8xf32> to vector<2x8x1xf32>
    %228 = vector.broadcast %227 : vector<2x8x1xf32> to vector<2x8x32xf32>
    %229 = arith.mulf %226, %228 : vector<2x8x32xf32>
    %cst_162 = arith.constant dense<0.000000e+00> : vector<2x32xf32>
    %230 = vector.multi_reduction <add>, %229, %cst_162 [1] : vector<2x8x32xf32> to vector<2x32xf32>
    %231 = tpu.reciprocal %225 : vector<2x1xf32> -> vector<2x1xf32>
    %232 = vector.broadcast %231 : vector<2x1xf32> to vector<2x32xf32>
    %233 = arith.mulf %230, %232 : vector<2x32xf32>
    %c0_163 = arith.constant 0 : index
    %c0_164 = arith.constant 0 : index
    %234 = vector.load %arg21[%c0_163, %c0_164] : memref<2x64xf32, #tpu.memory_space<vmem>>, vector<2x32xf32>
    tpu.vector_store %arg21[%c0_163, %c0_164], %233 {strides = array<i32>} : memref<2x64xf32, #tpu.memory_space<vmem>>, vector<2x32xf32>,
    %c0_165 = arith.constant 0 : index
    %c32_166 = arith.constant 32 : index
    %235 = vector.load %arg21[%c0_165, %c32_166] : memref<2x64xf32, #tpu.memory_space<vmem>>, vector<2x32xf32>
    tpu.vector_store %arg21[%c0_165, %c32_166], %205 {strides = array<i32>} : memref<2x64xf32, #tpu.memory_space<vmem>>, vector<2x32xf32>,
    %c0_167 = arith.constant 0 : index
    %c0_168 = arith.constant 0 : index
    %236 = vector.load %arg21[%c0_167, %c0_168] : memref<2x64xf32, #tpu.memory_space<vmem>>, vector<2x64xf32>
    %c0_169 = arith.constant 0 : index
    %c0_170 = arith.constant 0 : index
    %237 = vector.load %arg11[%c0_169, %c0_170] : memref<64x32xf32, #tpu.memory_space<vmem>>, vector<64x32xf32>
    %cst_171 = arith.constant dense<0.000000e+00> : vector<2x32xf32>
    %238 = tpu.matmul %236, %237, %cst_171 {dimension_numbers = #tpu.dot_dimension_numbers<[1], [0], [0], [1], [0, 0, 1, 1], [], []>} : vector<2x64xf32>, vector<64x32xf32>, vector<2x32xf32> -> vector<2x32xf32>
    %c0_172 = arith.constant 0 : index
    %c0_173 = arith.constant 0 : index
    %239 = vector.load %arg12[%c0_172, %c0_173] : memref<1x32xf32, #tpu.memory_space<vmem>>, vector<1x32xf32>
    %240 = vector.broadcast %239 : vector<1x32xf32> to vector<2x32xf32>
    %241 = arith.addf %238, %240 : vector<2x32xf32>
    %242 = math.tanh %241 : vector<2x32xf32>
    %c0_174 = arith.constant 0 : index
    %c0_175 = arith.constant 0 : index
    %c0_176 = arith.constant 0 : index
    %243 = vector.load %arg19[%c0_174, %c0_175, %c0_176] : memref<2x2x64xf32, #tpu.memory_space<vmem>>, vector<1x2x32xf32>
    %244 = vector.shape_cast %243 : vector<1x2x32xf32> to vector<2x32xf32>
    %245 = vector.shape_cast %242 : vector<2x32xf32> to vector<1x2x32xf32>
    tpu.vector_store %arg19[%c0_174, %c0_175, %c0_176], %245 {strides = array<i32>} : memref<2x2x64xf32, #tpu.memory_space<vmem>>, vector<1x2x32xf32>,
    %c2_i32_177 = arith.constant 2 : i32
    %246 = arith.muli %140, %c2_i32_177 : i32
    %247 = arith.index_cast %246 : i32 to index
    %c0_178 = arith.constant 0 : index
    %248 = vector.load %arg23[%247, %c0_178] : memref<12x32xf32, #tpu.memory_space<vmem>>, vector<2x32xf32>
    tpu.vector_store %arg23[%247, %c0_178], %242 {strides = array<i32>} : memref<12x32xf32, #tpu.memory_space<vmem>>, vector<2x32xf32>,
    %c2_i32_179 = arith.constant 2 : i32
    %c1_i32_180 = arith.constant 1 : i32
    %249 = arith.muli %c2_i32_179, %c1_i32_180 : i32
    %c0_i32_181 = arith.constant 0 : i32
    %250 = arith.addi %c0_i32_181, %249 : i32
    %c2_i32_182 = arith.constant 2 : i32
    %251 = arith.muli %250, %c2_i32_182 : i32
    %252 = arith.index_cast %251 : i32 to index
    %c0_183 = arith.constant 0 : index
    %253 = vector.load %arg22[%252, %c0_183] : memref<12x128xf32, #tpu.memory_space<vmem>>, vector<2x128xf32>
    %c0_184 = arith.constant 0 : index
    %c0_185 = arith.constant 0 : index
    %c0_186 = arith.constant 0 : index
    %254 = vector.load %arg19[%c0_184, %c0_185, %c0_186] : memref<2x2x64xf32, #tpu.memory_space<vmem>>, vector<1x2x64xf32>
    %255 = vector.shape_cast %254 : vector<1x2x64xf32> to vector<2x64xf32>
    %c0_187 = arith.constant 0 : index
    %c0_188 = arith.constant 0 : index
    %c0_189 = arith.constant 0 : index
    %256 = vector.load %arg9[%c0_187, %c0_188, %c0_189] : memref<2x64x128xf32, #tpu.memory_space<vmem>>, vector<1x64x128xf32>
    %257 = vector.shape_cast %256 : vector<1x64x128xf32> to vector<64x128xf32>
    %cst_190 = arith.constant dense<0.000000e+00> : vector<2x128xf32>
    %258 = tpu.matmul %255, %257, %cst_190 {dimension_numbers = #tpu.dot_dimension_numbers<[1], [0], [0], [1], [0, 0, 1, 1], [], []>} : vector<2x64xf32>, vector<64x128xf32>, vector<2x128xf32> -> vector<2x128xf32>
    %c0_191 = arith.constant 0 : index
    %c0_192 = arith.constant 0 : index
    %c0_193 = arith.constant 0 : index
    %259 = vector.load %arg10[%c0_191, %c0_192, %c0_193] : memref<2x1x128xf32, #tpu.memory_space<vmem>>, vector<1x1x128xf32>
    %260 = vector.shape_cast %259 : vector<1x1x128xf32> to vector<1x128xf32>
    %261 = vector.broadcast %260 : vector<1x128xf32> to vector<2x128xf32>
    %262 = arith.addf %258, %261 : vector<2x128xf32>
    %263 = arith.addf %262, %253 : vector<2x128xf32>
    %c0_194 = arith.constant 0 : index
    %c0_195 = arith.constant 0 : index
    %c0_196 = arith.constant 0 : index
    %264 = vector.load %arg20[%c0_194, %c0_195, %c0_196] : memref<2x2x32xf32, #tpu.memory_space<vmem>>, vector<1x2x32xf32>
    %265 = vector.shape_cast %264 : vector<1x2x32xf32> to vector<2x32xf32>
    %266 = arith.negf %263 : vector<2x128xf32>
    %267 = math.exp %266 : vector<2x128xf32>
    %cst_197 = arith.constant 1.000000e+00 : f32
    %268 = vector.broadcast %cst_197 : f32 to vector<2x128xf32>
    %269 = arith.addf %268, %267 : vector<2x128xf32>
    %270 = arith.divf %268, %269 : vector<2x128xf32>
    %271 = math.tanh %263 : vector<2x128xf32>
    %272 = vector.extract_strided_slice %270 {offsets = [0, 0], sizes = [2, 32], strides = [1, 1]} : vector<2x128xf32> to vector<2x32xf32>
    %273 = vector.extract_strided_slice %270 {offsets = [0, 32], sizes = [2, 32], strides = [1, 1]} : vector<2x128xf32> to vector<2x32xf32>
    %274 = vector.extract_strided_slice %271 {offsets = [0, 64], sizes = [2, 32], strides = [1, 1]} : vector<2x128xf32> to vector<2x32xf32>
    %275 = vector.extract_strided_slice %270 {offsets = [0, 96], sizes = [2, 32], strides = [1, 1]} : vector<2x128xf32> to vector<2x32xf32>
    %276 = arith.mulf %273, %265 : vector<2x32xf32>
    %277 = arith.mulf %272, %274 : vector<2x32xf32>
    %278 = arith.addf %276, %277 : vector<2x32xf32>
    %279 = math.tanh %278 : vector<2x32xf32>
    %280 = arith.mulf %275, %279 : vector<2x32xf32>
    %c0_198 = arith.constant 0 : index
    %c0_199 = arith.constant 0 : index
    %c0_200 = arith.constant 0 : index
    %281 = vector.load %arg20[%c0_198, %c0_199, %c0_200] : memref<2x2x32xf32, #tpu.memory_space<vmem>>, vector<1x2x32xf32>
    %282 = vector.shape_cast %281 : vector<1x2x32xf32> to vector<2x32xf32>
    %283 = vector.shape_cast %278 : vector<2x32xf32> to vector<1x2x32xf32>
    tpu.vector_store %arg20[%c0_198, %c0_199, %c0_200], %283 {strides = array<i32>} : memref<2x2x32xf32, #tpu.memory_space<vmem>>, vector<1x2x32xf32>,
    %c0_201 = arith.constant 0 : index
    %c0_202 = arith.constant 0 : index
    %c32_203 = arith.constant 32 : index
    %284 = vector.load %arg19[%c0_201, %c0_202, %c32_203] : memref<2x2x64xf32, #tpu.memory_space<vmem>>, vector<1x2x32xf32>
    %285 = vector.shape_cast %284 : vector<1x2x32xf32> to vector<2x32xf32>
    %286 = vector.shape_cast %280 : vector<2x32xf32> to vector<1x2x32xf32>
    tpu.vector_store %arg19[%c0_201, %c0_202, %c32_203], %286 {strides = array<i32>} : memref<2x2x64xf32, #tpu.memory_space<vmem>>, vector<1x2x32xf32>,
    %c1_204 = arith.constant 1 : index
    %c0_205 = arith.constant 0 : index
    %c0_206 = arith.constant 0 : index
    %287 = vector.load %arg19[%c1_204, %c0_205, %c0_206] : memref<2x2x64xf32, #tpu.memory_space<vmem>>, vector<1x2x32xf32>
    %288 = vector.shape_cast %287 : vector<1x2x32xf32> to vector<2x32xf32>
    %289 = vector.shape_cast %280 : vector<2x32xf32> to vector<1x2x32xf32>
    tpu.vector_store %arg19[%c1_204, %c0_205, %c0_206], %289 {strides = array<i32>} : memref<2x2x64xf32, #tpu.memory_space<vmem>>, vector<1x2x32xf32>,
    %c1_207 = arith.constant 1 : index
    %c0_208 = arith.constant 0 : index
    %c0_209 = arith.constant 0 : index
    %290 = vector.load %arg19[%c1_207, %c0_208, %c0_209] : memref<2x2x64xf32, #tpu.memory_space<vmem>>, vector<1x2x64xf32>
    %291 = vector.shape_cast %290 : vector<1x2x64xf32> to vector<2x64xf32>
    %c1_210 = arith.constant 1 : index
    %c0_211 = arith.constant 0 : index
    %c0_212 = arith.constant 0 : index
    %292 = vector.load %arg9[%c1_210, %c0_211, %c0_212] : memref<2x64x128xf32, #tpu.memory_space<vmem>>, vector<1x64x128xf32>
    %293 = vector.shape_cast %292 : vector<1x64x128xf32> to vector<64x128xf32>
    %cst_213 = arith.constant dense<0.000000e+00> : vector<2x128xf32>
    %294 = tpu.matmul %291, %293, %cst_213 {dimension_numbers = #tpu.dot_dimension_numbers<[1], [0], [0], [1], [0, 0, 1, 1], [], []>} : vector<2x64xf32>, vector<64x128xf32>, vector<2x128xf32> -> vector<2x128xf32>
    %c1_214 = arith.constant 1 : index
    %c0_215 = arith.constant 0 : index
    %c0_216 = arith.constant 0 : index
    %295 = vector.load %arg10[%c1_214, %c0_215, %c0_216] : memref<2x1x128xf32, #tpu.memory_space<vmem>>, vector<1x1x128xf32>
    %296 = vector.shape_cast %295 : vector<1x1x128xf32> to vector<1x128xf32>
    %297 = vector.broadcast %296 : vector<1x128xf32> to vector<2x128xf32>
    %298 = arith.addf %294, %297 : vector<2x128xf32>
    %c1_217 = arith.constant 1 : index
    %c0_218 = arith.constant 0 : index
    %c0_219 = arith.constant 0 : index
    %299 = vector.load %arg20[%c1_217, %c0_218, %c0_219] : memref<2x2x32xf32, #tpu.memory_space<vmem>>, vector<1x2x32xf32>
    %300 = vector.shape_cast %299 : vector<1x2x32xf32> to vector<2x32xf32>
    %301 = arith.negf %298 : vector<2x128xf32>
    %302 = math.exp %301 : vector<2x128xf32>
    %cst_220 = arith.constant 1.000000e+00 : f32
    %303 = vector.broadcast %cst_220 : f32 to vector<2x128xf32>
    %304 = arith.addf %303, %302 : vector<2x128xf32>
    %305 = arith.divf %303, %304 : vector<2x128xf32>
    %306 = math.tanh %298 : vector<2x128xf32>
    %307 = vector.extract_strided_slice %305 {offsets = [0, 0], sizes = [2, 32], strides = [1, 1]} : vector<2x128xf32> to vector<2x32xf32>
    %308 = vector.extract_strided_slice %305 {offsets = [0, 32], sizes = [2, 32], strides = [1, 1]} : vector<2x128xf32> to vector<2x32xf32>
    %309 = vector.extract_strided_slice %306 {offsets = [0, 64], sizes = [2, 32], strides = [1, 1]} : vector<2x128xf32> to vector<2x32xf32>
    %310 = vector.extract_strided_slice %305 {offsets = [0, 96], sizes = [2, 32], strides = [1, 1]} : vector<2x128xf32> to vector<2x32xf32>
    %311 = arith.mulf %308, %300 : vector<2x32xf32>
    %312 = arith.mulf %307, %309 : vector<2x32xf32>
    %313 = arith.addf %311, %312 : vector<2x32xf32>
    %314 = math.tanh %313 : vector<2x32xf32>
    %315 = arith.mulf %310, %314 : vector<2x32xf32>
    %c1_221 = arith.constant 1 : index
    %c0_222 = arith.constant 0 : index
    %c0_223 = arith.constant 0 : index
    %316 = vector.load %arg20[%c1_221, %c0_222, %c0_223] : memref<2x2x32xf32, #tpu.memory_space<vmem>>, vector<1x2x32xf32>
    %317 = vector.shape_cast %316 : vector<1x2x32xf32> to vector<2x32xf32>
    %318 = vector.shape_cast %313 : vector<2x32xf32> to vector<1x2x32xf32>
    tpu.vector_store %arg20[%c1_221, %c0_222, %c0_223], %318 {strides = array<i32>} : memref<2x2x32xf32, #tpu.memory_space<vmem>>, vector<1x2x32xf32>,
    %c1_224 = arith.constant 1 : index
    %c0_225 = arith.constant 0 : index
    %c32_226 = arith.constant 32 : index
    %319 = vector.load %arg19[%c1_224, %c0_225, %c32_226] : memref<2x2x64xf32, #tpu.memory_space<vmem>>, vector<1x2x32xf32>
    %320 = vector.shape_cast %319 : vector<1x2x32xf32> to vector<2x32xf32>
    %321 = vector.shape_cast %315 : vector<2x32xf32> to vector<1x2x32xf32>
    tpu.vector_store %arg19[%c1_224, %c0_225, %c32_226], %321 {strides = array<i32>} : memref<2x2x64xf32, #tpu.memory_space<vmem>>, vector<1x2x32xf32>,
    %c0_227 = arith.constant 0 : index
    %c0_228 = arith.constant 0 : index
    %c0_229 = arith.constant 0 : index
    %322 = vector.load %arg6[%c0_227, %c0_228, %c0_229] : memref<2x8x32xf32, #tpu.memory_space<vmem>>, vector<2x8x32xf32>
    %323 = vector.shape_cast %315 : vector<2x32xf32> to vector<2x1x32xf32>
    %324 = vector.broadcast %323 : vector<2x1x32xf32> to vector<2x8x32xf32>
    %325 = arith.mulf %322, %324 : vector<2x8x32xf32>
    %cst_230 = arith.constant dense<0.000000e+00> : vector<2x8xf32>
    %326 = vector.multi_reduction <add>, %325, %cst_230 [2] : vector<2x8x32xf32> to vector<2x8xf32>
    %c0_231 = arith.constant 0 : index
    %c0_232 = arith.constant 0 : index
    %327 = vector.load %arg7[%c0_231, %c0_232] : memref<2x8xf32, #tpu.memory_space<vmem>>, vector<2x8xf32>
    %328 = arith.addf %326, %327 : vector<2x8xf32>
    %cst_233 = arith.constant dense<0xFF800000> : vector<2xf32>
    %329 = vector.multi_reduction <maximumf>, %328, %cst_233 [1] : vector<2x8xf32> to vector<2xf32>
    %330 = vector.shape_cast %329 : vector<2xf32> to vector<2x1xf32>
    %331 = vector.broadcast %330 : vector<2x1xf32> to vector<2x8xf32>
    %332 = arith.subf %328, %331 : vector<2x8xf32>
    %333 = math.exp %332 : vector<2x8xf32>
    %cst_234 = arith.constant dense<0.000000e+00> : vector<2xf32>
    %334 = vector.multi_reduction <add>, %333, %cst_234 [1] : vector<2x8xf32> to vector<2xf32>
    %335 = vector.shape_cast %334 : vector<2xf32> to vector<2x1xf32>
    %c0_235 = arith.constant 0 : index
    %c0_236 = arith.constant 0 : index
    %c0_237 = arith.constant 0 : index
    %336 = vector.load %arg5[%c0_235, %c0_236, %c0_237] : memref<2x8x32xf32, #tpu.memory_space<vmem>>, vector<2x8x32xf32>
    %337 = vector.shape_cast %333 : vector<2x8xf32> to vector<2x8x1xf32>
    %338 = vector.broadcast %337 : vector<2x8x1xf32> to vector<2x8x32xf32>
    %339 = arith.mulf %336, %338 : vector<2x8x32xf32>
    %cst_238 = arith.constant dense<0.000000e+00> : vector<2x32xf32>
    %340 = vector.multi_reduction <add>, %339, %cst_238 [1] : vector<2x8x32xf32> to vector<2x32xf32>
    %341 = tpu.reciprocal %335 : vector<2x1xf32> -> vector<2x1xf32>
    %342 = vector.broadcast %341 : vector<2x1xf32> to vector<2x32xf32>
    %343 = arith.mulf %340, %342 : vector<2x32xf32>
    %c0_239 = arith.constant 0 : index
    %c0_240 = arith.constant 0 : index
    %344 = vector.load %arg21[%c0_239, %c0_240] : memref<2x64xf32, #tpu.memory_space<vmem>>, vector<2x32xf32>
    tpu.vector_store %arg21[%c0_239, %c0_240], %343 {strides = array<i32>} : memref<2x64xf32, #tpu.memory_space<vmem>>, vector<2x32xf32>,
    %c0_241 = arith.constant 0 : index
    %c32_242 = arith.constant 32 : index
    %345 = vector.load %arg21[%c0_241, %c32_242] : memref<2x64xf32, #tpu.memory_space<vmem>>, vector<2x32xf32>
    tpu.vector_store %arg21[%c0_241, %c32_242], %315 {strides = array<i32>} : memref<2x64xf32, #tpu.memory_space<vmem>>, vector<2x32xf32>,
    %c0_243 = arith.constant 0 : index
    %c0_244 = arith.constant 0 : index
    %346 = vector.load %arg21[%c0_243, %c0_244] : memref<2x64xf32, #tpu.memory_space<vmem>>, vector<2x64xf32>
    %c0_245 = arith.constant 0 : index
    %c0_246 = arith.constant 0 : index
    %347 = vector.load %arg11[%c0_245, %c0_246] : memref<64x32xf32, #tpu.memory_space<vmem>>, vector<64x32xf32>
    %cst_247 = arith.constant dense<0.000000e+00> : vector<2x32xf32>
    %348 = tpu.matmul %346, %347, %cst_247 {dimension_numbers = #tpu.dot_dimension_numbers<[1], [0], [0], [1], [0, 0, 1, 1], [], []>} : vector<2x64xf32>, vector<64x32xf32>, vector<2x32xf32> -> vector<2x32xf32>
    %c0_248 = arith.constant 0 : index
    %c0_249 = arith.constant 0 : index
    %349 = vector.load %arg12[%c0_248, %c0_249] : memref<1x32xf32, #tpu.memory_space<vmem>>, vector<1x32xf32>
    %350 = vector.broadcast %349 : vector<1x32xf32> to vector<2x32xf32>
    %351 = arith.addf %348, %350 : vector<2x32xf32>
    %352 = math.tanh %351 : vector<2x32xf32>
    %c0_250 = arith.constant 0 : index
    %c0_251 = arith.constant 0 : index
    %c0_252 = arith.constant 0 : index
    %353 = vector.load %arg19[%c0_250, %c0_251, %c0_252] : memref<2x2x64xf32, #tpu.memory_space<vmem>>, vector<1x2x32xf32>
    %354 = vector.shape_cast %353 : vector<1x2x32xf32> to vector<2x32xf32>
    %355 = vector.shape_cast %352 : vector<2x32xf32> to vector<1x2x32xf32>
    tpu.vector_store %arg19[%c0_250, %c0_251, %c0_252], %355 {strides = array<i32>} : memref<2x2x64xf32, #tpu.memory_space<vmem>>, vector<1x2x32xf32>,
    %c2_i32_253 = arith.constant 2 : i32
    %356 = arith.muli %250, %c2_i32_253 : i32
    %357 = arith.index_cast %356 : i32 to index
    %c0_254 = arith.constant 0 : index
    %358 = vector.load %arg23[%357, %c0_254] : memref<12x32xf32, #tpu.memory_space<vmem>>, vector<2x32xf32>
    tpu.vector_store %arg23[%357, %c0_254], %352 {strides = array<i32>} : memref<12x32xf32, #tpu.memory_space<vmem>>, vector<2x32xf32>,
    %c3_i32 = arith.constant 3 : i32
    %c1_i32_255 = arith.constant 1 : i32
    %359 = arith.muli %c3_i32, %c1_i32_255 : i32
    %c0_i32_256 = arith.constant 0 : i32
    %360 = arith.addi %c0_i32_256, %359 : i32
    %c2_i32_257 = arith.constant 2 : i32
    %361 = arith.muli %360, %c2_i32_257 : i32
    %362 = arith.index_cast %361 : i32 to index
    %c0_258 = arith.constant 0 : index
    %363 = vector.load %arg22[%362, %c0_258] : memref<12x128xf32, #tpu.memory_space<vmem>>, vector<2x128xf32>
    %c0_259 = arith.constant 0 : index
    %c0_260 = arith.constant 0 : index
    %c0_261 = arith.constant 0 : index
    %364 = vector.load %arg19[%c0_259, %c0_260, %c0_261] : memref<2x2x64xf32, #tpu.memory_space<vmem>>, vector<1x2x64xf32>
    %365 = vector.shape_cast %364 : vector<1x2x64xf32> to vector<2x64xf32>
    %c0_262 = arith.constant 0 : index
    %c0_263 = arith.constant 0 : index
    %c0_264 = arith.constant 0 : index
    %366 = vector.load %arg9[%c0_262, %c0_263, %c0_264] : memref<2x64x128xf32, #tpu.memory_space<vmem>>, vector<1x64x128xf32>
    %367 = vector.shape_cast %366 : vector<1x64x128xf32> to vector<64x128xf32>
    %cst_265 = arith.constant dense<0.000000e+00> : vector<2x128xf32>
    %368 = tpu.matmul %365, %367, %cst_265 {dimension_numbers = #tpu.dot_dimension_numbers<[1], [0], [0], [1], [0, 0, 1, 1], [], []>} : vector<2x64xf32>, vector<64x128xf32>, vector<2x128xf32> -> vector<2x128xf32>
    %c0_266 = arith.constant 0 : index
    %c0_267 = arith.constant 0 : index
    %c0_268 = arith.constant 0 : index
    %369 = vector.load %arg10[%c0_266, %c0_267, %c0_268] : memref<2x1x128xf32, #tpu.memory_space<vmem>>, vector<1x1x128xf32>
    %370 = vector.shape_cast %369 : vector<1x1x128xf32> to vector<1x128xf32>
    %371 = vector.broadcast %370 : vector<1x128xf32> to vector<2x128xf32>
    %372 = arith.addf %368, %371 : vector<2x128xf32>
    %373 = arith.addf %372, %363 : vector<2x128xf32>
    %c0_269 = arith.constant 0 : index
    %c0_270 = arith.constant 0 : index
    %c0_271 = arith.constant 0 : index
    %374 = vector.load %arg20[%c0_269, %c0_270, %c0_271] : memref<2x2x32xf32, #tpu.memory_space<vmem>>, vector<1x2x32xf32>
    %375 = vector.shape_cast %374 : vector<1x2x32xf32> to vector<2x32xf32>
    %376 = arith.negf %373 : vector<2x128xf32>
    %377 = math.exp %376 : vector<2x128xf32>
    %cst_272 = arith.constant 1.000000e+00 : f32
    %378 = vector.broadcast %cst_272 : f32 to vector<2x128xf32>
    %379 = arith.addf %378, %377 : vector<2x128xf32>
    %380 = arith.divf %378, %379 : vector<2x128xf32>
    %381 = math.tanh %373 : vector<2x128xf32>
    %382 = vector.extract_strided_slice %380 {offsets = [0, 0], sizes = [2, 32], strides = [1, 1]} : vector<2x128xf32> to vector<2x32xf32>
    %383 = vector.extract_strided_slice %380 {offsets = [0, 32], sizes = [2, 32], strides = [1, 1]} : vector<2x128xf32> to vector<2x32xf32>
    %384 = vector.extract_strided_slice %381 {offsets = [0, 64], sizes = [2, 32], strides = [1, 1]} : vector<2x128xf32> to vector<2x32xf32>
    %385 = vector.extract_strided_slice %380 {offsets = [0, 96], sizes = [2, 32], strides = [1, 1]} : vector<2x128xf32> to vector<2x32xf32>
    %386 = arith.mulf %383, %375 : vector<2x32xf32>
    %387 = arith.mulf %382, %384 : vector<2x32xf32>
    %388 = arith.addf %386, %387 : vector<2x32xf32>
    %389 = math.tanh %388 : vector<2x32xf32>
    %390 = arith.mulf %385, %389 : vector<2x32xf32>
    %c0_273 = arith.constant 0 : index
    %c0_274 = arith.constant 0 : index
    %c0_275 = arith.constant 0 : index
    %391 = vector.load %arg20[%c0_273, %c0_274, %c0_275] : memref<2x2x32xf32, #tpu.memory_space<vmem>>, vector<1x2x32xf32>
    %392 = vector.shape_cast %391 : vector<1x2x32xf32> to vector<2x32xf32>
    %393 = vector.shape_cast %388 : vector<2x32xf32> to vector<1x2x32xf32>
    tpu.vector_store %arg20[%c0_273, %c0_274, %c0_275], %393 {strides = array<i32>} : memref<2x2x32xf32, #tpu.memory_space<vmem>>, vector<1x2x32xf32>,
    %c0_276 = arith.constant 0 : index
    %c0_277 = arith.constant 0 : index
    %c32_278 = arith.constant 32 : index
    %394 = vector.load %arg19[%c0_276, %c0_277, %c32_278] : memref<2x2x64xf32, #tpu.memory_space<vmem>>, vector<1x2x32xf32>
    %395 = vector.shape_cast %394 : vector<1x2x32xf32> to vector<2x32xf32>
    %396 = vector.shape_cast %390 : vector<2x32xf32> to vector<1x2x32xf32>
    tpu.vector_store %arg19[%c0_276, %c0_277, %c32_278], %396 {strides = array<i32>} : memref<2x2x64xf32, #tpu.memory_space<vmem>>, vector<1x2x32xf32>,
    %c1_279 = arith.constant 1 : index
    %c0_280 = arith.constant 0 : index
    %c0_281 = arith.constant 0 : index
    %397 = vector.load %arg19[%c1_279, %c0_280, %c0_281] : memref<2x2x64xf32, #tpu.memory_space<vmem>>, vector<1x2x32xf32>
    %398 = vector.shape_cast %397 : vector<1x2x32xf32> to vector<2x32xf32>
    %399 = vector.shape_cast %390 : vector<2x32xf32> to vector<1x2x32xf32>
    tpu.vector_store %arg19[%c1_279, %c0_280, %c0_281], %399 {strides = array<i32>} : memref<2x2x64xf32, #tpu.memory_space<vmem>>, vector<1x2x32xf32>,
    %c1_282 = arith.constant 1 : index
    %c0_283 = arith.constant 0 : index
    %c0_284 = arith.constant 0 : index
    %400 = vector.load %arg19[%c1_282, %c0_283, %c0_284] : memref<2x2x64xf32, #tpu.memory_space<vmem>>, vector<1x2x64xf32>
    %401 = vector.shape_cast %400 : vector<1x2x64xf32> to vector<2x64xf32>
    %c1_285 = arith.constant 1 : index
    %c0_286 = arith.constant 0 : index
    %c0_287 = arith.constant 0 : index
    %402 = vector.load %arg9[%c1_285, %c0_286, %c0_287] : memref<2x64x128xf32, #tpu.memory_space<vmem>>, vector<1x64x128xf32>
    %403 = vector.shape_cast %402 : vector<1x64x128xf32> to vector<64x128xf32>
    %cst_288 = arith.constant dense<0.000000e+00> : vector<2x128xf32>
    %404 = tpu.matmul %401, %403, %cst_288 {dimension_numbers = #tpu.dot_dimension_numbers<[1], [0], [0], [1], [0, 0, 1, 1], [], []>} : vector<2x64xf32>, vector<64x128xf32>, vector<2x128xf32> -> vector<2x128xf32>
    %c1_289 = arith.constant 1 : index
    %c0_290 = arith.constant 0 : index
    %c0_291 = arith.constant 0 : index
    %405 = vector.load %arg10[%c1_289, %c0_290, %c0_291] : memref<2x1x128xf32, #tpu.memory_space<vmem>>, vector<1x1x128xf32>
    %406 = vector.shape_cast %405 : vector<1x1x128xf32> to vector<1x128xf32>
    %407 = vector.broadcast %406 : vector<1x128xf32> to vector<2x128xf32>
    %408 = arith.addf %404, %407 : vector<2x128xf32>
    %c1_292 = arith.constant 1 : index
    %c0_293 = arith.constant 0 : index
    %c0_294 = arith.constant 0 : index
    %409 = vector.load %arg20[%c1_292, %c0_293, %c0_294] : memref<2x2x32xf32, #tpu.memory_space<vmem>>, vector<1x2x32xf32>
    %410 = vector.shape_cast %409 : vector<1x2x32xf32> to vector<2x32xf32>
    %411 = arith.negf %408 : vector<2x128xf32>
    %412 = math.exp %411 : vector<2x128xf32>
    %cst_295 = arith.constant 1.000000e+00 : f32
    %413 = vector.broadcast %cst_295 : f32 to vector<2x128xf32>
    %414 = arith.addf %413, %412 : vector<2x128xf32>
    %415 = arith.divf %413, %414 : vector<2x128xf32>
    %416 = math.tanh %408 : vector<2x128xf32>
    %417 = vector.extract_strided_slice %415 {offsets = [0, 0], sizes = [2, 32], strides = [1, 1]} : vector<2x128xf32> to vector<2x32xf32>
    %418 = vector.extract_strided_slice %415 {offsets = [0, 32], sizes = [2, 32], strides = [1, 1]} : vector<2x128xf32> to vector<2x32xf32>
    %419 = vector.extract_strided_slice %416 {offsets = [0, 64], sizes = [2, 32], strides = [1, 1]} : vector<2x128xf32> to vector<2x32xf32>
    %420 = vector.extract_strided_slice %415 {offsets = [0, 96], sizes = [2, 32], strides = [1, 1]} : vector<2x128xf32> to vector<2x32xf32>
    %421 = arith.mulf %418, %410 : vector<2x32xf32>
    %422 = arith.mulf %417, %419 : vector<2x32xf32>
    %423 = arith.addf %421, %422 : vector<2x32xf32>
    %424 = math.tanh %423 : vector<2x32xf32>
    %425 = arith.mulf %420, %424 : vector<2x32xf32>
    %c1_296 = arith.constant 1 : index
    %c0_297 = arith.constant 0 : index
    %c0_298 = arith.constant 0 : index
    %426 = vector.load %arg20[%c1_296, %c0_297, %c0_298] : memref<2x2x32xf32, #tpu.memory_space<vmem>>, vector<1x2x32xf32>
    %427 = vector.shape_cast %426 : vector<1x2x32xf32> to vector<2x32xf32>
    %428 = vector.shape_cast %423 : vector<2x32xf32> to vector<1x2x32xf32>
    tpu.vector_store %arg20[%c1_296, %c0_297, %c0_298], %428 {strides = array<i32>} : memref<2x2x32xf32, #tpu.memory_space<vmem>>, vector<1x2x32xf32>,
    %c1_299 = arith.constant 1 : index
    %c0_300 = arith.constant 0 : index
    %c32_301 = arith.constant 32 : index
    %429 = vector.load %arg19[%c1_299, %c0_300, %c32_301] : memref<2x2x64xf32, #tpu.memory_space<vmem>>, vector<1x2x32xf32>
    %430 = vector.shape_cast %429 : vector<1x2x32xf32> to vector<2x32xf32>
    %431 = vector.shape_cast %425 : vector<2x32xf32> to vector<1x2x32xf32>
    tpu.vector_store %arg19[%c1_299, %c0_300, %c32_301], %431 {strides = array<i32>} : memref<2x2x64xf32, #tpu.memory_space<vmem>>, vector<1x2x32xf32>,
    %c0_302 = arith.constant 0 : index
    %c0_303 = arith.constant 0 : index
    %c0_304 = arith.constant 0 : index
    %432 = vector.load %arg6[%c0_302, %c0_303, %c0_304] : memref<2x8x32xf32, #tpu.memory_space<vmem>>, vector<2x8x32xf32>
    %433 = vector.shape_cast %425 : vector<2x32xf32> to vector<2x1x32xf32>
    %434 = vector.broadcast %433 : vector<2x1x32xf32> to vector<2x8x32xf32>
    %435 = arith.mulf %432, %434 : vector<2x8x32xf32>
    %cst_305 = arith.constant dense<0.000000e+00> : vector<2x8xf32>
    %436 = vector.multi_reduction <add>, %435, %cst_305 [2] : vector<2x8x32xf32> to vector<2x8xf32>
    %c0_306 = arith.constant 0 : index
    %c0_307 = arith.constant 0 : index
    %437 = vector.load %arg7[%c0_306, %c0_307] : memref<2x8xf32, #tpu.memory_space<vmem>>, vector<2x8xf32>
    %438 = arith.addf %436, %437 : vector<2x8xf32>
    %cst_308 = arith.constant dense<0xFF800000> : vector<2xf32>
    %439 = vector.multi_reduction <maximumf>, %438, %cst_308 [1] : vector<2x8xf32> to vector<2xf32>
    %440 = vector.shape_cast %439 : vector<2xf32> to vector<2x1xf32>
    %441 = vector.broadcast %440 : vector<2x1xf32> to vector<2x8xf32>
    %442 = arith.subf %438, %441 : vector<2x8xf32>
    %443 = math.exp %442 : vector<2x8xf32>
    %cst_309 = arith.constant dense<0.000000e+00> : vector<2xf32>
    %444 = vector.multi_reduction <add>, %443, %cst_309 [1] : vector<2x8xf32> to vector<2xf32>
    %445 = vector.shape_cast %444 : vector<2xf32> to vector<2x1xf32>
    %c0_310 = arith.constant 0 : index
    %c0_311 = arith.constant 0 : index
    %c0_312 = arith.constant 0 : index
    %446 = vector.load %arg5[%c0_310, %c0_311, %c0_312] : memref<2x8x32xf32, #tpu.memory_space<vmem>>, vector<2x8x32xf32>
    %447 = vector.shape_cast %443 : vector<2x8xf32> to vector<2x8x1xf32>
    %448 = vector.broadcast %447 : vector<2x8x1xf32> to vector<2x8x32xf32>
    %449 = arith.mulf %446, %448 : vector<2x8x32xf32>
    %cst_313 = arith.constant dense<0.000000e+00> : vector<2x32xf32>
    %450 = vector.multi_reduction <add>, %449, %cst_313 [1] : vector<2x8x32xf32> to vector<2x32xf32>
    %451 = tpu.reciprocal %445 : vector<2x1xf32> -> vector<2x1xf32>
    %452 = vector.broadcast %451 : vector<2x1xf32> to vector<2x32xf32>
    %453 = arith.mulf %450, %452 : vector<2x32xf32>
    %c0_314 = arith.constant 0 : index
    %c0_315 = arith.constant 0 : index
    %454 = vector.load %arg21[%c0_314, %c0_315] : memref<2x64xf32, #tpu.memory_space<vmem>>, vector<2x32xf32>
    tpu.vector_store %arg21[%c0_314, %c0_315], %453 {strides = array<i32>} : memref<2x64xf32, #tpu.memory_space<vmem>>, vector<2x32xf32>,
    %c0_316 = arith.constant 0 : index
    %c32_317 = arith.constant 32 : index
    %455 = vector.load %arg21[%c0_316, %c32_317] : memref<2x64xf32, #tpu.memory_space<vmem>>, vector<2x32xf32>
    tpu.vector_store %arg21[%c0_316, %c32_317], %425 {strides = array<i32>} : memref<2x64xf32, #tpu.memory_space<vmem>>, vector<2x32xf32>,
    %c0_318 = arith.constant 0 : index
    %c0_319 = arith.constant 0 : index
    %456 = vector.load %arg21[%c0_318, %c0_319] : memref<2x64xf32, #tpu.memory_space<vmem>>, vector<2x64xf32>
    %c0_320 = arith.constant 0 : index
    %c0_321 = arith.constant 0 : index
    %457 = vector.load %arg11[%c0_320, %c0_321] : memref<64x32xf32, #tpu.memory_space<vmem>>, vector<64x32xf32>
    %cst_322 = arith.constant dense<0.000000e+00> : vector<2x32xf32>
    %458 = tpu.matmul %456, %457, %cst_322 {dimension_numbers = #tpu.dot_dimension_numbers<[1], [0], [0], [1], [0, 0, 1, 1], [], []>} : vector<2x64xf32>, vector<64x32xf32>, vector<2x32xf32> -> vector<2x32xf32>
    %c0_323 = arith.constant 0 : index
    %c0_324 = arith.constant 0 : index
    %459 = vector.load %arg12[%c0_323, %c0_324] : memref<1x32xf32, #tpu.memory_space<vmem>>, vector<1x32xf32>
    %460 = vector.broadcast %459 : vector<1x32xf32> to vector<2x32xf32>
    %461 = arith.addf %458, %460 : vector<2x32xf32>
    %462 = math.tanh %461 : vector<2x32xf32>
    %c0_325 = arith.constant 0 : index
    %c0_326 = arith.constant 0 : index
    %c0_327 = arith.constant 0 : index
    %463 = vector.load %arg19[%c0_325, %c0_326, %c0_327] : memref<2x2x64xf32, #tpu.memory_space<vmem>>, vector<1x2x32xf32>
    %464 = vector.shape_cast %463 : vector<1x2x32xf32> to vector<2x32xf32>
    %465 = vector.shape_cast %462 : vector<2x32xf32> to vector<1x2x32xf32>
    tpu.vector_store %arg19[%c0_325, %c0_326, %c0_327], %465 {strides = array<i32>} : memref<2x2x64xf32, #tpu.memory_space<vmem>>, vector<1x2x32xf32>,
    %c2_i32_328 = arith.constant 2 : i32
    %466 = arith.muli %360, %c2_i32_328 : i32
    %467 = arith.index_cast %466 : i32 to index
    %c0_329 = arith.constant 0 : index
    %468 = vector.load %arg23[%467, %c0_329] : memref<12x32xf32, #tpu.memory_space<vmem>>, vector<2x32xf32>
    tpu.vector_store %arg23[%467, %c0_329], %462 {strides = array<i32>} : memref<12x32xf32, #tpu.memory_space<vmem>>, vector<2x32xf32>,
    %c4_i32 = arith.constant 4 : i32
    %c1_i32_330 = arith.constant 1 : i32
    %469 = arith.muli %c4_i32, %c1_i32_330 : i32
    %c0_i32_331 = arith.constant 0 : i32
    %470 = arith.addi %c0_i32_331, %469 : i32
    %c2_i32_332 = arith.constant 2 : i32
    %471 = arith.muli %470, %c2_i32_332 : i32
    %472 = arith.index_cast %471 : i32 to index
    %c0_333 = arith.constant 0 : index
    %473 = vector.load %arg22[%472, %c0_333] : memref<12x128xf32, #tpu.memory_space<vmem>>, vector<2x128xf32>
    %c0_334 = arith.constant 0 : index
    %c0_335 = arith.constant 0 : index
    %c0_336 = arith.constant 0 : index
    %474 = vector.load %arg19[%c0_334, %c0_335, %c0_336] : memref<2x2x64xf32, #tpu.memory_space<vmem>>, vector<1x2x64xf32>
    %475 = vector.shape_cast %474 : vector<1x2x64xf32> to vector<2x64xf32>
    %c0_337 = arith.constant 0 : index
    %c0_338 = arith.constant 0 : index
    %c0_339 = arith.constant 0 : index
    %476 = vector.load %arg9[%c0_337, %c0_338, %c0_339] : memref<2x64x128xf32, #tpu.memory_space<vmem>>, vector<1x64x128xf32>
    %477 = vector.shape_cast %476 : vector<1x64x128xf32> to vector<64x128xf32>
    %cst_340 = arith.constant dense<0.000000e+00> : vector<2x128xf32>
    %478 = tpu.matmul %475, %477, %cst_340 {dimension_numbers = #tpu.dot_dimension_numbers<[1], [0], [0], [1], [0, 0, 1, 1], [], []>} : vector<2x64xf32>, vector<64x128xf32>, vector<2x128xf32> -> vector<2x128xf32>
    %c0_341 = arith.constant 0 : index
    %c0_342 = arith.constant 0 : index
    %c0_343 = arith.constant 0 : index
    %479 = vector.load %arg10[%c0_341, %c0_342, %c0_343] : memref<2x1x128xf32, #tpu.memory_space<vmem>>, vector<1x1x128xf32>
    %480 = vector.shape_cast %479 : vector<1x1x128xf32> to vector<1x128xf32>
    %481 = vector.broadcast %480 : vector<1x128xf32> to vector<2x128xf32>
    %482 = arith.addf %478, %481 : vector<2x128xf32>
    %483 = arith.addf %482, %473 : vector<2x128xf32>
    %c0_344 = arith.constant 0 : index
    %c0_345 = arith.constant 0 : index
    %c0_346 = arith.constant 0 : index
    %484 = vector.load %arg20[%c0_344, %c0_345, %c0_346] : memref<2x2x32xf32, #tpu.memory_space<vmem>>, vector<1x2x32xf32>
    %485 = vector.shape_cast %484 : vector<1x2x32xf32> to vector<2x32xf32>
    %486 = arith.negf %483 : vector<2x128xf32>
    %487 = math.exp %486 : vector<2x128xf32>
    %cst_347 = arith.constant 1.000000e+00 : f32
    %488 = vector.broadcast %cst_347 : f32 to vector<2x128xf32>
    %489 = arith.addf %488, %487 : vector<2x128xf32>
    %490 = arith.divf %488, %489 : vector<2x128xf32>
    %491 = math.tanh %483 : vector<2x128xf32>
    %492 = vector.extract_strided_slice %490 {offsets = [0, 0], sizes = [2, 32], strides = [1, 1]} : vector<2x128xf32> to vector<2x32xf32>
    %493 = vector.extract_strided_slice %490 {offsets = [0, 32], sizes = [2, 32], strides = [1, 1]} : vector<2x128xf32> to vector<2x32xf32>
    %494 = vector.extract_strided_slice %491 {offsets = [0, 64], sizes = [2, 32], strides = [1, 1]} : vector<2x128xf32> to vector<2x32xf32>
    %495 = vector.extract_strided_slice %490 {offsets = [0, 96], sizes = [2, 32], strides = [1, 1]} : vector<2x128xf32> to vector<2x32xf32>
    %496 = arith.mulf %493, %485 : vector<2x32xf32>
    %497 = arith.mulf %492, %494 : vector<2x32xf32>
    %498 = arith.addf %496, %497 : vector<2x32xf32>
    %499 = math.tanh %498 : vector<2x32xf32>
    %500 = arith.mulf %495, %499 : vector<2x32xf32>
    %c0_348 = arith.constant 0 : index
    %c0_349 = arith.constant 0 : index
    %c0_350 = arith.constant 0 : index
    %501 = vector.load %arg20[%c0_348, %c0_349, %c0_350] : memref<2x2x32xf32, #tpu.memory_space<vmem>>, vector<1x2x32xf32>
    %502 = vector.shape_cast %501 : vector<1x2x32xf32> to vector<2x32xf32>
    %503 = vector.shape_cast %498 : vector<2x32xf32> to vector<1x2x32xf32>
    tpu.vector_store %arg20[%c0_348, %c0_349, %c0_350], %503 {strides = array<i32>} : memref<2x2x32xf32, #tpu.memory_space<vmem>>, vector<1x2x32xf32>,
    %c0_351 = arith.constant 0 : index
    %c0_352 = arith.constant 0 : index
    %c32_353 = arith.constant 32 : index
    %504 = vector.load %arg19[%c0_351, %c0_352, %c32_353] : memref<2x2x64xf32, #tpu.memory_space<vmem>>, vector<1x2x32xf32>
    %505 = vector.shape_cast %504 : vector<1x2x32xf32> to vector<2x32xf32>
    %506 = vector.shape_cast %500 : vector<2x32xf32> to vector<1x2x32xf32>
    tpu.vector_store %arg19[%c0_351, %c0_352, %c32_353], %506 {strides = array<i32>} : memref<2x2x64xf32, #tpu.memory_space<vmem>>, vector<1x2x32xf32>,
    %c1_354 = arith.constant 1 : index
    %c0_355 = arith.constant 0 : index
    %c0_356 = arith.constant 0 : index
    %507 = vector.load %arg19[%c1_354, %c0_355, %c0_356] : memref<2x2x64xf32, #tpu.memory_space<vmem>>, vector<1x2x32xf32>
    %508 = vector.shape_cast %507 : vector<1x2x32xf32> to vector<2x32xf32>
    %509 = vector.shape_cast %500 : vector<2x32xf32> to vector<1x2x32xf32>
    tpu.vector_store %arg19[%c1_354, %c0_355, %c0_356], %509 {strides = array<i32>} : memref<2x2x64xf32, #tpu.memory_space<vmem>>, vector<1x2x32xf32>,
    %c1_357 = arith.constant 1 : index
    %c0_358 = arith.constant 0 : index
    %c0_359 = arith.constant 0 : index
    %510 = vector.load %arg19[%c1_357, %c0_358, %c0_359] : memref<2x2x64xf32, #tpu.memory_space<vmem>>, vector<1x2x64xf32>
    %511 = vector.shape_cast %510 : vector<1x2x64xf32> to vector<2x64xf32>
    %c1_360 = arith.constant 1 : index
    %c0_361 = arith.constant 0 : index
    %c0_362 = arith.constant 0 : index
    %512 = vector.load %arg9[%c1_360, %c0_361, %c0_362] : memref<2x64x128xf32, #tpu.memory_space<vmem>>, vector<1x64x128xf32>
    %513 = vector.shape_cast %512 : vector<1x64x128xf32> to vector<64x128xf32>
    %cst_363 = arith.constant dense<0.000000e+00> : vector<2x128xf32>
    %514 = tpu.matmul %511, %513, %cst_363 {dimension_numbers = #tpu.dot_dimension_numbers<[1], [0], [0], [1], [0, 0, 1, 1], [], []>} : vector<2x64xf32>, vector<64x128xf32>, vector<2x128xf32> -> vector<2x128xf32>
    %c1_364 = arith.constant 1 : index
    %c0_365 = arith.constant 0 : index
    %c0_366 = arith.constant 0 : index
    %515 = vector.load %arg10[%c1_364, %c0_365, %c0_366] : memref<2x1x128xf32, #tpu.memory_space<vmem>>, vector<1x1x128xf32>
    %516 = vector.shape_cast %515 : vector<1x1x128xf32> to vector<1x128xf32>
    %517 = vector.broadcast %516 : vector<1x128xf32> to vector<2x128xf32>
    %518 = arith.addf %514, %517 : vector<2x128xf32>
    %c1_367 = arith.constant 1 : index
    %c0_368 = arith.constant 0 : index
    %c0_369 = arith.constant 0 : index
    %519 = vector.load %arg20[%c1_367, %c0_368, %c0_369] : memref<2x2x32xf32, #tpu.memory_space<vmem>>, vector<1x2x32xf32>
    %520 = vector.shape_cast %519 : vector<1x2x32xf32> to vector<2x32xf32>
    %521 = arith.negf %518 : vector<2x128xf32>
    %522 = math.exp %521 : vector<2x128xf32>
    %cst_370 = arith.constant 1.000000e+00 : f32
    %523 = vector.broadcast %cst_370 : f32 to vector<2x128xf32>
    %524 = arith.addf %523, %522 : vector<2x128xf32>
    %525 = arith.divf %523, %524 : vector<2x128xf32>
    %526 = math.tanh %518 : vector<2x128xf32>
    %527 = vector.extract_strided_slice %525 {offsets = [0, 0], sizes = [2, 32], strides = [1, 1]} : vector<2x128xf32> to vector<2x32xf32>
    %528 = vector.extract_strided_slice %525 {offsets = [0, 32], sizes = [2, 32], strides = [1, 1]} : vector<2x128xf32> to vector<2x32xf32>
    %529 = vector.extract_strided_slice %526 {offsets = [0, 64], sizes = [2, 32], strides = [1, 1]} : vector<2x128xf32> to vector<2x32xf32>
    %530 = vector.extract_strided_slice %525 {offsets = [0, 96], sizes = [2, 32], strides = [1, 1]} : vector<2x128xf32> to vector<2x32xf32>
    %531 = arith.mulf %528, %520 : vector<2x32xf32>
    %532 = arith.mulf %527, %529 : vector<2x32xf32>
    %533 = arith.addf %531, %532 : vector<2x32xf32>
    %534 = math.tanh %533 : vector<2x32xf32>
    %535 = arith.mulf %530, %534 : vector<2x32xf32>
    %c1_371 = arith.constant 1 : index
    %c0_372 = arith.constant 0 : index
    %c0_373 = arith.constant 0 : index
    %536 = vector.load %arg20[%c1_371, %c0_372, %c0_373] : memref<2x2x32xf32, #tpu.memory_space<vmem>>, vector<1x2x32xf32>
    %537 = vector.shape_cast %536 : vector<1x2x32xf32> to vector<2x32xf32>
    %538 = vector.shape_cast %533 : vector<2x32xf32> to vector<1x2x32xf32>
    tpu.vector_store %arg20[%c1_371, %c0_372, %c0_373], %538 {strides = array<i32>} : memref<2x2x32xf32, #tpu.memory_space<vmem>>, vector<1x2x32xf32>,
    %c1_374 = arith.constant 1 : index
    %c0_375 = arith.constant 0 : index
    %c32_376 = arith.constant 32 : index
    %539 = vector.load %arg19[%c1_374, %c0_375, %c32_376] : memref<2x2x64xf32, #tpu.memory_space<vmem>>, vector<1x2x32xf32>
    %540 = vector.shape_cast %539 : vector<1x2x32xf32> to vector<2x32xf32>
    %541 = vector.shape_cast %535 : vector<2x32xf32> to vector<1x2x32xf32>
    tpu.vector_store %arg19[%c1_374, %c0_375, %c32_376], %541 {strides = array<i32>} : memref<2x2x64xf32, #tpu.memory_space<vmem>>, vector<1x2x32xf32>,
    %c0_377 = arith.constant 0 : index
    %c0_378 = arith.constant 0 : index
    %c0_379 = arith.constant 0 : index
    %542 = vector.load %arg6[%c0_377, %c0_378, %c0_379] : memref<2x8x32xf32, #tpu.memory_space<vmem>>, vector<2x8x32xf32>
    %543 = vector.shape_cast %535 : vector<2x32xf32> to vector<2x1x32xf32>
    %544 = vector.broadcast %543 : vector<2x1x32xf32> to vector<2x8x32xf32>
    %545 = arith.mulf %542, %544 : vector<2x8x32xf32>
    %cst_380 = arith.constant dense<0.000000e+00> : vector<2x8xf32>
    %546 = vector.multi_reduction <add>, %545, %cst_380 [2] : vector<2x8x32xf32> to vector<2x8xf32>
    %c0_381 = arith.constant 0 : index
    %c0_382 = arith.constant 0 : index
    %547 = vector.load %arg7[%c0_381, %c0_382] : memref<2x8xf32, #tpu.memory_space<vmem>>, vector<2x8xf32>
    %548 = arith.addf %546, %547 : vector<2x8xf32>
    %cst_383 = arith.constant dense<0xFF800000> : vector<2xf32>
    %549 = vector.multi_reduction <maximumf>, %548, %cst_383 [1] : vector<2x8xf32> to vector<2xf32>
    %550 = vector.shape_cast %549 : vector<2xf32> to vector<2x1xf32>
    %551 = vector.broadcast %550 : vector<2x1xf32> to vector<2x8xf32>
    %552 = arith.subf %548, %551 : vector<2x8xf32>
    %553 = math.exp %552 : vector<2x8xf32>
    %cst_384 = arith.constant dense<0.000000e+00> : vector<2xf32>
    %554 = vector.multi_reduction <add>, %553, %cst_384 [1] : vector<2x8xf32> to vector<2xf32>
    %555 = vector.shape_cast %554 : vector<2xf32> to vector<2x1xf32>
    %c0_385 = arith.constant 0 : index
    %c0_386 = arith.constant 0 : index
    %c0_387 = arith.constant 0 : index
    %556 = vector.load %arg5[%c0_385, %c0_386, %c0_387] : memref<2x8x32xf32, #tpu.memory_space<vmem>>, vector<2x8x32xf32>
    %557 = vector.shape_cast %553 : vector<2x8xf32> to vector<2x8x1xf32>
    %558 = vector.broadcast %557 : vector<2x8x1xf32> to vector<2x8x32xf32>
    %559 = arith.mulf %556, %558 : vector<2x8x32xf32>
    %cst_388 = arith.constant dense<0.000000e+00> : vector<2x32xf32>
    %560 = vector.multi_reduction <add>, %559, %cst_388 [1] : vector<2x8x32xf32> to vector<2x32xf32>
    %561 = tpu.reciprocal %555 : vector<2x1xf32> -> vector<2x1xf32>
    %562 = vector.broadcast %561 : vector<2x1xf32> to vector<2x32xf32>
    %563 = arith.mulf %560, %562 : vector<2x32xf32>
    %c0_389 = arith.constant 0 : index
    %c0_390 = arith.constant 0 : index
    %564 = vector.load %arg21[%c0_389, %c0_390] : memref<2x64xf32, #tpu.memory_space<vmem>>, vector<2x32xf32>
    tpu.vector_store %arg21[%c0_389, %c0_390], %563 {strides = array<i32>} : memref<2x64xf32, #tpu.memory_space<vmem>>, vector<2x32xf32>,
    %c0_391 = arith.constant 0 : index
    %c32_392 = arith.constant 32 : index
    %565 = vector.load %arg21[%c0_391, %c32_392] : memref<2x64xf32, #tpu.memory_space<vmem>>, vector<2x32xf32>
    tpu.vector_store %arg21[%c0_391, %c32_392], %535 {strides = array<i32>} : memref<2x64xf32, #tpu.memory_space<vmem>>, vector<2x32xf32>,
    %c0_393 = arith.constant 0 : index
    %c0_394 = arith.constant 0 : index
    %566 = vector.load %arg21[%c0_393, %c0_394] : memref<2x64xf32, #tpu.memory_space<vmem>>, vector<2x64xf32>
    %c0_395 = arith.constant 0 : index
    %c0_396 = arith.constant 0 : index
    %567 = vector.load %arg11[%c0_395, %c0_396] : memref<64x32xf32, #tpu.memory_space<vmem>>, vector<64x32xf32>
    %cst_397 = arith.constant dense<0.000000e+00> : vector<2x32xf32>
    %568 = tpu.matmul %566, %567, %cst_397 {dimension_numbers = #tpu.dot_dimension_numbers<[1], [0], [0], [1], [0, 0, 1, 1], [], []>} : vector<2x64xf32>, vector<64x32xf32>, vector<2x32xf32> -> vector<2x32xf32>
    %c0_398 = arith.constant 0 : index
    %c0_399 = arith.constant 0 : index
    %569 = vector.load %arg12[%c0_398, %c0_399] : memref<1x32xf32, #tpu.memory_space<vmem>>, vector<1x32xf32>
    %570 = vector.broadcast %569 : vector<1x32xf32> to vector<2x32xf32>
    %571 = arith.addf %568, %570 : vector<2x32xf32>
    %572 = math.tanh %571 : vector<2x32xf32>
    %c0_400 = arith.constant 0 : index
    %c0_401 = arith.constant 0 : index
    %c0_402 = arith.constant 0 : index
    %573 = vector.load %arg19[%c0_400, %c0_401, %c0_402] : memref<2x2x64xf32, #tpu.memory_space<vmem>>, vector<1x2x32xf32>
    %574 = vector.shape_cast %573 : vector<1x2x32xf32> to vector<2x32xf32>
    %575 = vector.shape_cast %572 : vector<2x32xf32> to vector<1x2x32xf32>
    tpu.vector_store %arg19[%c0_400, %c0_401, %c0_402], %575 {strides = array<i32>} : memref<2x2x64xf32, #tpu.memory_space<vmem>>, vector<1x2x32xf32>,
    %c2_i32_403 = arith.constant 2 : i32
    %576 = arith.muli %470, %c2_i32_403 : i32
    %577 = arith.index_cast %576 : i32 to index
    %c0_404 = arith.constant 0 : index
    %578 = vector.load %arg23[%577, %c0_404] : memref<12x32xf32, #tpu.memory_space<vmem>>, vector<2x32xf32>
    tpu.vector_store %arg23[%577, %c0_404], %572 {strides = array<i32>} : memref<12x32xf32, #tpu.memory_space<vmem>>, vector<2x32xf32>,
    %c5_i32 = arith.constant 5 : i32
    %c1_i32_405 = arith.constant 1 : i32
    %579 = arith.muli %c5_i32, %c1_i32_405 : i32
    %c0_i32_406 = arith.constant 0 : i32
    %580 = arith.addi %c0_i32_406, %579 : i32
    %c2_i32_407 = arith.constant 2 : i32
    %581 = arith.muli %580, %c2_i32_407 : i32
    %582 = arith.index_cast %581 : i32 to index
    %c0_408 = arith.constant 0 : index
    %583 = vector.load %arg22[%582, %c0_408] : memref<12x128xf32, #tpu.memory_space<vmem>>, vector<2x128xf32>
    %c0_409 = arith.constant 0 : index
    %c0_410 = arith.constant 0 : index
    %c0_411 = arith.constant 0 : index
    %584 = vector.load %arg19[%c0_409, %c0_410, %c0_411] : memref<2x2x64xf32, #tpu.memory_space<vmem>>, vector<1x2x64xf32>
    %585 = vector.shape_cast %584 : vector<1x2x64xf32> to vector<2x64xf32>
    %c0_412 = arith.constant 0 : index
    %c0_413 = arith.constant 0 : index
    %c0_414 = arith.constant 0 : index
    %586 = vector.load %arg9[%c0_412, %c0_413, %c0_414] : memref<2x64x128xf32, #tpu.memory_space<vmem>>, vector<1x64x128xf32>
    %587 = vector.shape_cast %586 : vector<1x64x128xf32> to vector<64x128xf32>
    %cst_415 = arith.constant dense<0.000000e+00> : vector<2x128xf32>
    %588 = tpu.matmul %585, %587, %cst_415 {dimension_numbers = #tpu.dot_dimension_numbers<[1], [0], [0], [1], [0, 0, 1, 1], [], []>} : vector<2x64xf32>, vector<64x128xf32>, vector<2x128xf32> -> vector<2x128xf32>
    %c0_416 = arith.constant 0 : index
    %c0_417 = arith.constant 0 : index
    %c0_418 = arith.constant 0 : index
    %589 = vector.load %arg10[%c0_416, %c0_417, %c0_418] : memref<2x1x128xf32, #tpu.memory_space<vmem>>, vector<1x1x128xf32>
    %590 = vector.shape_cast %589 : vector<1x1x128xf32> to vector<1x128xf32>
    %591 = vector.broadcast %590 : vector<1x128xf32> to vector<2x128xf32>
    %592 = arith.addf %588, %591 : vector<2x128xf32>
    %593 = arith.addf %592, %583 : vector<2x128xf32>
    %c0_419 = arith.constant 0 : index
    %c0_420 = arith.constant 0 : index
    %c0_421 = arith.constant 0 : index
    %594 = vector.load %arg20[%c0_419, %c0_420, %c0_421] : memref<2x2x32xf32, #tpu.memory_space<vmem>>, vector<1x2x32xf32>
    %595 = vector.shape_cast %594 : vector<1x2x32xf32> to vector<2x32xf32>
    %596 = arith.negf %593 : vector<2x128xf32>
    %597 = math.exp %596 : vector<2x128xf32>
    %cst_422 = arith.constant 1.000000e+00 : f32
    %598 = vector.broadcast %cst_422 : f32 to vector<2x128xf32>
    %599 = arith.addf %598, %597 : vector<2x128xf32>
    %600 = arith.divf %598, %599 : vector<2x128xf32>
    %601 = math.tanh %593 : vector<2x128xf32>
    %602 = vector.extract_strided_slice %600 {offsets = [0, 0], sizes = [2, 32], strides = [1, 1]} : vector<2x128xf32> to vector<2x32xf32>
    %603 = vector.extract_strided_slice %600 {offsets = [0, 32], sizes = [2, 32], strides = [1, 1]} : vector<2x128xf32> to vector<2x32xf32>
    %604 = vector.extract_strided_slice %601 {offsets = [0, 64], sizes = [2, 32], strides = [1, 1]} : vector<2x128xf32> to vector<2x32xf32>
    %605 = vector.extract_strided_slice %600 {offsets = [0, 96], sizes = [2, 32], strides = [1, 1]} : vector<2x128xf32> to vector<2x32xf32>
    %606 = arith.mulf %603, %595 : vector<2x32xf32>
    %607 = arith.mulf %602, %604 : vector<2x32xf32>
    %608 = arith.addf %606, %607 : vector<2x32xf32>
    %609 = math.tanh %608 : vector<2x32xf32>
    %610 = arith.mulf %605, %609 : vector<2x32xf32>
    %c0_423 = arith.constant 0 : index
    %c0_424 = arith.constant 0 : index
    %c0_425 = arith.constant 0 : index
    %611 = vector.load %arg20[%c0_423, %c0_424, %c0_425] : memref<2x2x32xf32, #tpu.memory_space<vmem>>, vector<1x2x32xf32>
    %612 = vector.shape_cast %611 : vector<1x2x32xf32> to vector<2x32xf32>
    %613 = vector.shape_cast %608 : vector<2x32xf32> to vector<1x2x32xf32>
    tpu.vector_store %arg20[%c0_423, %c0_424, %c0_425], %613 {strides = array<i32>} : memref<2x2x32xf32, #tpu.memory_space<vmem>>, vector<1x2x32xf32>,
    %c0_426 = arith.constant 0 : index
    %c0_427 = arith.constant 0 : index
    %c32_428 = arith.constant 32 : index
    %614 = vector.load %arg19[%c0_426, %c0_427, %c32_428] : memref<2x2x64xf32, #tpu.memory_space<vmem>>, vector<1x2x32xf32>
    %615 = vector.shape_cast %614 : vector<1x2x32xf32> to vector<2x32xf32>
    %616 = vector.shape_cast %610 : vector<2x32xf32> to vector<1x2x32xf32>
    tpu.vector_store %arg19[%c0_426, %c0_427, %c32_428], %616 {strides = array<i32>} : memref<2x2x64xf32, #tpu.memory_space<vmem>>, vector<1x2x32xf32>,
    %c1_429 = arith.constant 1 : index
    %c0_430 = arith.constant 0 : index
    %c0_431 = arith.constant 0 : index
    %617 = vector.load %arg19[%c1_429, %c0_430, %c0_431] : memref<2x2x64xf32, #tpu.memory_space<vmem>>, vector<1x2x32xf32>
    %618 = vector.shape_cast %617 : vector<1x2x32xf32> to vector<2x32xf32>
    %619 = vector.shape_cast %610 : vector<2x32xf32> to vector<1x2x32xf32>
    tpu.vector_store %arg19[%c1_429, %c0_430, %c0_431], %619 {strides = array<i32>} : memref<2x2x64xf32, #tpu.memory_space<vmem>>, vector<1x2x32xf32>,
    %c1_432 = arith.constant 1 : index
    %c0_433 = arith.constant 0 : index
    %c0_434 = arith.constant 0 : index
    %620 = vector.load %arg19[%c1_432, %c0_433, %c0_434] : memref<2x2x64xf32, #tpu.memory_space<vmem>>, vector<1x2x64xf32>
    %621 = vector.shape_cast %620 : vector<1x2x64xf32> to vector<2x64xf32>
    %c1_435 = arith.constant 1 : index
    %c0_436 = arith.constant 0 : index
    %c0_437 = arith.constant 0 : index
    %622 = vector.load %arg9[%c1_435, %c0_436, %c0_437] : memref<2x64x128xf32, #tpu.memory_space<vmem>>, vector<1x64x128xf32>
    %623 = vector.shape_cast %622 : vector<1x64x128xf32> to vector<64x128xf32>
    %cst_438 = arith.constant dense<0.000000e+00> : vector<2x128xf32>
    %624 = tpu.matmul %621, %623, %cst_438 {dimension_numbers = #tpu.dot_dimension_numbers<[1], [0], [0], [1], [0, 0, 1, 1], [], []>} : vector<2x64xf32>, vector<64x128xf32>, vector<2x128xf32> -> vector<2x128xf32>
    %c1_439 = arith.constant 1 : index
    %c0_440 = arith.constant 0 : index
    %c0_441 = arith.constant 0 : index
    %625 = vector.load %arg10[%c1_439, %c0_440, %c0_441] : memref<2x1x128xf32, #tpu.memory_space<vmem>>, vector<1x1x128xf32>
    %626 = vector.shape_cast %625 : vector<1x1x128xf32> to vector<1x128xf32>
    %627 = vector.broadcast %626 : vector<1x128xf32> to vector<2x128xf32>
    %628 = arith.addf %624, %627 : vector<2x128xf32>
    %c1_442 = arith.constant 1 : index
    %c0_443 = arith.constant 0 : index
    %c0_444 = arith.constant 0 : index
    %629 = vector.load %arg20[%c1_442, %c0_443, %c0_444] : memref<2x2x32xf32, #tpu.memory_space<vmem>>, vector<1x2x32xf32>
    %630 = vector.shape_cast %629 : vector<1x2x32xf32> to vector<2x32xf32>
    %631 = arith.negf %628 : vector<2x128xf32>
    %632 = math.exp %631 : vector<2x128xf32>
    %cst_445 = arith.constant 1.000000e+00 : f32
    %633 = vector.broadcast %cst_445 : f32 to vector<2x128xf32>
    %634 = arith.addf %633, %632 : vector<2x128xf32>
    %635 = arith.divf %633, %634 : vector<2x128xf32>
    %636 = math.tanh %628 : vector<2x128xf32>
    %637 = vector.extract_strided_slice %635 {offsets = [0, 0], sizes = [2, 32], strides = [1, 1]} : vector<2x128xf32> to vector<2x32xf32>
    %638 = vector.extract_strided_slice %635 {offsets = [0, 32], sizes = [2, 32], strides = [1, 1]} : vector<2x128xf32> to vector<2x32xf32>
    %639 = vector.extract_strided_slice %636 {offsets = [0, 64], sizes = [2, 32], strides = [1, 1]} : vector<2x128xf32> to vector<2x32xf32>
    %640 = vector.extract_strided_slice %635 {offsets = [0, 96], sizes = [2, 32], strides = [1, 1]} : vector<2x128xf32> to vector<2x32xf32>
    %641 = arith.mulf %638, %630 : vector<2x32xf32>
    %642 = arith.mulf %637, %639 : vector<2x32xf32>
    %643 = arith.addf %641, %642 : vector<2x32xf32>
    %644 = math.tanh %643 : vector<2x32xf32>
    %645 = arith.mulf %640, %644 : vector<2x32xf32>
    %c1_446 = arith.constant 1 : index
    %c0_447 = arith.constant 0 : index
    %c0_448 = arith.constant 0 : index
    %646 = vector.load %arg20[%c1_446, %c0_447, %c0_448] : memref<2x2x32xf32, #tpu.memory_space<vmem>>, vector<1x2x32xf32>
    %647 = vector.shape_cast %646 : vector<1x2x32xf32> to vector<2x32xf32>
    %648 = vector.shape_cast %643 : vector<2x32xf32> to vector<1x2x32xf32>
    tpu.vector_store %arg20[%c1_446, %c0_447, %c0_448], %648 {strides = array<i32>} : memref<2x2x32xf32, #tpu.memory_space<vmem>>, vector<1x2x32xf32>,
    %c1_449 = arith.constant 1 : index
    %c0_450 = arith.constant 0 : index
    %c32_451 = arith.constant 32 : index
    %649 = vector.load %arg19[%c1_449, %c0_450, %c32_451] : memref<2x2x64xf32, #tpu.memory_space<vmem>>, vector<1x2x32xf32>
    %650 = vector.shape_cast %649 : vector<1x2x32xf32> to vector<2x32xf32>
    %651 = vector.shape_cast %645 : vector<2x32xf32> to vector<1x2x32xf32>
    tpu.vector_store %arg19[%c1_449, %c0_450, %c32_451], %651 {strides = array<i32>} : memref<2x2x64xf32, #tpu.memory_space<vmem>>, vector<1x2x32xf32>,
    %c0_452 = arith.constant 0 : index
    %c0_453 = arith.constant 0 : index
    %c0_454 = arith.constant 0 : index
    %652 = vector.load %arg6[%c0_452, %c0_453, %c0_454] : memref<2x8x32xf32, #tpu.memory_space<vmem>>, vector<2x8x32xf32>
    %653 = vector.shape_cast %645 : vector<2x32xf32> to vector<2x1x32xf32>
    %654 = vector.broadcast %653 : vector<2x1x32xf32> to vector<2x8x32xf32>
    %655 = arith.mulf %652, %654 : vector<2x8x32xf32>
    %cst_455 = arith.constant dense<0.000000e+00> : vector<2x8xf32>
    %656 = vector.multi_reduction <add>, %655, %cst_455 [2] : vector<2x8x32xf32> to vector<2x8xf32>
    %c0_456 = arith.constant 0 : index
    %c0_457 = arith.constant 0 : index
    %657 = vector.load %arg7[%c0_456, %c0_457] : memref<2x8xf32, #tpu.memory_space<vmem>>, vector<2x8xf32>
    %658 = arith.addf %656, %657 : vector<2x8xf32>
    %cst_458 = arith.constant dense<0xFF800000> : vector<2xf32>
    %659 = vector.multi_reduction <maximumf>, %658, %cst_458 [1] : vector<2x8xf32> to vector<2xf32>
    %660 = vector.shape_cast %659 : vector<2xf32> to vector<2x1xf32>
    %661 = vector.broadcast %660 : vector<2x1xf32> to vector<2x8xf32>
    %662 = arith.subf %658, %661 : vector<2x8xf32>
    %663 = math.exp %662 : vector<2x8xf32>
    %cst_459 = arith.constant dense<0.000000e+00> : vector<2xf32>
    %664 = vector.multi_reduction <add>, %663, %cst_459 [1] : vector<2x8xf32> to vector<2xf32>
    %665 = vector.shape_cast %664 : vector<2xf32> to vector<2x1xf32>
    %c0_460 = arith.constant 0 : index
    %c0_461 = arith.constant 0 : index
    %c0_462 = arith.constant 0 : index
    %666 = vector.load %arg5[%c0_460, %c0_461, %c0_462] : memref<2x8x32xf32, #tpu.memory_space<vmem>>, vector<2x8x32xf32>
    %667 = vector.shape_cast %663 : vector<2x8xf32> to vector<2x8x1xf32>
    %668 = vector.broadcast %667 : vector<2x8x1xf32> to vector<2x8x32xf32>
    %669 = arith.mulf %666, %668 : vector<2x8x32xf32>
    %cst_463 = arith.constant dense<0.000000e+00> : vector<2x32xf32>
    %670 = vector.multi_reduction <add>, %669, %cst_463 [1] : vector<2x8x32xf32> to vector<2x32xf32>
    %671 = tpu.reciprocal %665 : vector<2x1xf32> -> vector<2x1xf32>
    %672 = vector.broadcast %671 : vector<2x1xf32> to vector<2x32xf32>
    %673 = arith.mulf %670, %672 : vector<2x32xf32>
    %c0_464 = arith.constant 0 : index
    %c0_465 = arith.constant 0 : index
    %674 = vector.load %arg21[%c0_464, %c0_465] : memref<2x64xf32, #tpu.memory_space<vmem>>, vector<2x32xf32>
    tpu.vector_store %arg21[%c0_464, %c0_465], %673 {strides = array<i32>} : memref<2x64xf32, #tpu.memory_space<vmem>>, vector<2x32xf32>,
    %c0_466 = arith.constant 0 : index
    %c32_467 = arith.constant 32 : index
    %675 = vector.load %arg21[%c0_466, %c32_467] : memref<2x64xf32, #tpu.memory_space<vmem>>, vector<2x32xf32>
    tpu.vector_store %arg21[%c0_466, %c32_467], %645 {strides = array<i32>} : memref<2x64xf32, #tpu.memory_space<vmem>>, vector<2x32xf32>,
    %c0_468 = arith.constant 0 : index
    %c0_469 = arith.constant 0 : index
    %676 = vector.load %arg21[%c0_468, %c0_469] : memref<2x64xf32, #tpu.memory_space<vmem>>, vector<2x64xf32>
    %c0_470 = arith.constant 0 : index
    %c0_471 = arith.constant 0 : index
    %677 = vector.load %arg11[%c0_470, %c0_471] : memref<64x32xf32, #tpu.memory_space<vmem>>, vector<64x32xf32>
    %cst_472 = arith.constant dense<0.000000e+00> : vector<2x32xf32>
    %678 = tpu.matmul %676, %677, %cst_472 {dimension_numbers = #tpu.dot_dimension_numbers<[1], [0], [0], [1], [0, 0, 1, 1], [], []>} : vector<2x64xf32>, vector<64x32xf32>, vector<2x32xf32> -> vector<2x32xf32>
    %c0_473 = arith.constant 0 : index
    %c0_474 = arith.constant 0 : index
    %679 = vector.load %arg12[%c0_473, %c0_474] : memref<1x32xf32, #tpu.memory_space<vmem>>, vector<1x32xf32>
    %680 = vector.broadcast %679 : vector<1x32xf32> to vector<2x32xf32>
    %681 = arith.addf %678, %680 : vector<2x32xf32>
    %682 = math.tanh %681 : vector<2x32xf32>
    %c0_475 = arith.constant 0 : index
    %c0_476 = arith.constant 0 : index
    %c0_477 = arith.constant 0 : index
    %683 = vector.load %arg19[%c0_475, %c0_476, %c0_477] : memref<2x2x64xf32, #tpu.memory_space<vmem>>, vector<1x2x32xf32>
    %684 = vector.shape_cast %683 : vector<1x2x32xf32> to vector<2x32xf32>
    %685 = vector.shape_cast %682 : vector<2x32xf32> to vector<1x2x32xf32>
    tpu.vector_store %arg19[%c0_475, %c0_476, %c0_477], %685 {strides = array<i32>} : memref<2x2x64xf32, #tpu.memory_space<vmem>>, vector<1x2x32xf32>,
    %c2_i32_478 = arith.constant 2 : i32
    %686 = arith.muli %580, %c2_i32_478 : i32
    %687 = arith.index_cast %686 : i32 to index
    %c0_479 = arith.constant 0 : index
    %688 = vector.load %arg23[%687, %c0_479] : memref<12x32xf32, #tpu.memory_space<vmem>>, vector<2x32xf32>
    tpu.vector_store %arg23[%687, %c0_479], %682 {strides = array<i32>} : memref<12x32xf32, #tpu.memory_space<vmem>>, vector<2x32xf32>,
    %c6_i32 = arith.constant 6 : i32
    %c0_480 = arith.constant 0 : index
    %c0_481 = arith.constant 0 : index
    %689 = vector.load %arg23[%c0_480, %c0_481] : memref<12x32xf32, #tpu.memory_space<vmem>>, vector<12x32xf32>
    %c0_482 = arith.constant 0 : index
    %c0_483 = arith.constant 0 : index
    %690 = vector.load %arg13[%c0_482, %c0_483] : memref<32x128xf32, #tpu.memory_space<vmem>>, vector<32x128xf32>
    %cst_484 = arith.constant dense<0.000000e+00> : vector<12x128xf32>
    %691 = tpu.matmul %689, %690, %cst_484 {dimension_numbers = #tpu.dot_dimension_numbers<[1], [0], [0], [1], [0, 0, 1, 1], [], []>} : vector<12x32xf32>, vector<32x128xf32>, vector<12x128xf32> -> vector<12x128xf32>
    %c0_485 = arith.constant 0 : index
    %c0_486 = arith.constant 0 : index
    %692 = vector.load %arg14[%c0_485, %c0_486] : memref<1x128xf32, #tpu.memory_space<vmem>>, vector<1x128xf32>
    %693 = vector.broadcast %692 : vector<1x128xf32> to vector<12x128xf32>
    %694 = arith.addf %691, %693 : vector<12x128xf32>
    %cst_487 = arith.constant dense<0xFF800000> : vector<12xf32>
    %695 = vector.multi_reduction <maximumf>, %694, %cst_487 [1] : vector<12x128xf32> to vector<12xf32>
    %696 = vector.shape_cast %695 : vector<12xf32> to vector<12x1xf32>
    %697 = vector.broadcast %696 : vector<12x1xf32> to vector<12x128xf32>
    %698 = arith.subf %694, %697 : vector<12x128xf32>
    %699 = math.exp %698 : vector<12x128xf32>
    %cst_488 = arith.constant dense<0.000000e+00> : vector<12xf32>
    %700 = vector.multi_reduction <add>, %699, %cst_488 [1] : vector<12x128xf32> to vector<12xf32>
    %701 = vector.shape_cast %700 : vector<12xf32> to vector<12x1xf32>
    %702 = math.log %701 : vector<12x1xf32>
    %703 = vector.broadcast %702 : vector<12x1xf32> to vector<12x128xf32>
    %704 = arith.subf %698, %703 : vector<12x128xf32>
    %c0_489 = arith.constant 0 : index
    %c0_490 = arith.constant 0 : index
    %705 = vector.load %arg15[%c0_489, %c0_490] : memref<12x128xf32, #tpu.memory_space<vmem>>, vector<12x128xf32>
    tpu.vector_store %arg15[%c0_489, %c0_490], %704 {strides = array<i32>} : memref<12x128xf32, #tpu.memory_space<vmem>>, vector<12x128xf32>,
    %c0_491 = arith.constant 0 : index
    %c0_492 = arith.constant 0 : index
    %c0_493 = arith.constant 0 : index
    %706 = vector.load %arg19[%c0_491, %c0_492, %c0_493] : memref<2x2x64xf32, #tpu.memory_space<vmem>>, vector<1x2x32xf32>
    %707 = vector.shape_cast %706 : vector<1x2x32xf32> to vector<2x32xf32>
    %c0_494 = arith.constant 0 : index
    %c0_495 = arith.constant 0 : index
    %708 = vector.load %arg16[%c0_494, %c0_495] : memref<2x32xf32, #tpu.memory_space<vmem>>, vector<2x32xf32>
    tpu.vector_store %arg16[%c0_494, %c0_495], %707 {strides = array<i32>} : memref<2x32xf32, #tpu.memory_space<vmem>>, vector<2x32xf32>,
    %c0_496 = arith.constant 0 : index
    %c0_497 = arith.constant 0 : index
    %c32_498 = arith.constant 32 : index
    %709 = vector.load %arg19[%c0_496, %c0_497, %c32_498] : memref<2x2x64xf32, #tpu.memory_space<vmem>>, vector<1x2x32xf32>
    %710 = vector.shape_cast %709 : vector<1x2x32xf32> to vector<2x32xf32>
    %c0_499 = arith.constant 0 : index
    %c0_500 = arith.constant 0 : index
    %c0_501 = arith.constant 0 : index
    %711 = vector.load %arg17[%c0_499, %c0_500, %c0_501] : memref<2x2x32xf32, #tpu.memory_space<vmem>>, vector<1x2x32xf32>
    %712 = vector.shape_cast %711 : vector<1x2x32xf32> to vector<2x32xf32>
    %713 = vector.shape_cast %710 : vector<2x32xf32> to vector<1x2x32xf32>
    tpu.vector_store %arg17[%c0_499, %c0_500, %c0_501], %713 {strides = array<i32>} : memref<2x2x32xf32, #tpu.memory_space<vmem>>, vector<1x2x32xf32>,
    %c1_502 = arith.constant 1 : index
    %c0_503 = arith.constant 0 : index
    %c32_504 = arith.constant 32 : index
    %714 = vector.load %arg19[%c1_502, %c0_503, %c32_504] : memref<2x2x64xf32, #tpu.memory_space<vmem>>, vector<1x2x32xf32>
    %715 = vector.shape_cast %714 : vector<1x2x32xf32> to vector<2x32xf32>
    %c1_505 = arith.constant 1 : index
    %c0_506 = arith.constant 0 : index
    %c0_507 = arith.constant 0 : index
    %716 = vector.load %arg17[%c1_505, %c0_506, %c0_507] : memref<2x2x32xf32, #tpu.memory_space<vmem>>, vector<1x2x32xf32>
    %717 = vector.shape_cast %716 : vector<1x2x32xf32> to vector<2x32xf32>
    %718 = vector.shape_cast %715 : vector<2x32xf32> to vector<1x2x32xf32>
    tpu.vector_store %arg17[%c1_505, %c0_506, %c0_507], %718 {strides = array<i32>} : memref<2x2x32xf32, #tpu.memory_space<vmem>>, vector<1x2x32xf32>,
    %c0_508 = arith.constant 0 : index
    %c0_509 = arith.constant 0 : index
    %c0_510 = arith.constant 0 : index
    %719 = vector.load %arg20[%c0_508, %c0_509, %c0_510] : memref<2x2x32xf32, #tpu.memory_space<vmem>>, vector<2x2x32xf32>
    %c0_511 = arith.constant 0 : index
    %c0_512 = arith.constant 0 : index
    %c0_513 = arith.constant 0 : index
    %720 = vector.load %arg18[%c0_511, %c0_512, %c0_513] : memref<2x2x32xf32, #tpu.memory_space<vmem>>, vector<2x2x32xf32>
    tpu.vector_store %arg18[%c0_511, %c0_512, %c0_513], %719 {strides = array<i32>} : memref<2x2x32xf32, #tpu.memory_space<vmem>>, vector<2x2x32xf32>,
    return
  }
  func.func @transform_0(%arg0: i32) -> (i32, i32) {
    %c0_i32 = arith.constant 0 : i32
    %c0_i32_0 = arith.constant 0 : i32
    %c0_i32_1 = arith.constant 0 : i32
    return %c0_i32, %c0_i32_0 : i32, i32
  }
  func.func @transform_1(%arg0: i32) -> (i32, i32, i32) {
    %c0_i32 = arith.constant 0 : i32
    %c0_i32_0 = arith.constant 0 : i32
    %c0_i32_1 = arith.constant 0 : i32
    %c0_i32_2 = arith.constant 0 : i32
    return %c0_i32, %c0_i32_0, %c0_i32_1 : i32, i32, i32
  }
  func.func @transform_2(%arg0: i32) -> (i32, i32, i32) {
    %c0_i32 = arith.constant 0 : i32
    %c0_i32_0 = arith.constant 0 : i32
    %c0_i32_1 = arith.constant 0 : i32
    %c0_i32_2 = arith.constant 0 : i32
    return %c0_i32, %c0_i32_0, %c0_i32_1 : i32, i32, i32
  }
  func.func @transform_3(%arg0: i32) -> (i32, i32) {
    %c0_i32 = arith.constant 0 : i32
    %c0_i32_0 = arith.constant 0 : i32
    %c0_i32_1 = arith.constant 0 : i32
    return %c0_i32, %c0_i32_0 : i32, i32
  }
  func.func @transform_4(%arg0: i32) -> (i32, i32, i32) {
    %c0_i32 = arith.constant 0 : i32
    %c0_i32_0 = arith.constant 0 : i32
    %c0_i32_1 = arith.constant 0 : i32
    %c0_i32_2 = arith.constant 0 : i32
    return %c0_i32, %c0_i32_0, %c0_i32_1 : i32, i32, i32
  }
  func.func @transform_5(%arg0: i32) -> (i32, i32, i32) {
    %c0_i32 = arith.constant 0 : i32
    %c0_i32_0 = arith.constant 0 : i32
    %c0_i32_1 = arith.constant 0 : i32
    %c0_i32_2 = arith.constant 0 : i32
    return %c0_i32, %c0_i32_0, %c0_i32_1 : i32, i32, i32
  }
  func.func @transform_6(%arg0: i32) -> (i32, i32) {
    %c0_i32 = arith.constant 0 : i32
    %c0_i32_0 = arith.constant 0 : i32
    %c0_i32_1 = arith.constant 0 : i32
    return %c0_i32, %c0_i32_0 : i32, i32
  }
  func.func @transform_7(%arg0: i32) -> (i32, i32) {
    %c0_i32 = arith.constant 0 : i32
    %c0_i32_0 = arith.constant 0 : i32
    %c0_i32_1 = arith.constant 0 : i32
    return %c0_i32, %c0_i32_0 : i32, i32
  }
  func.func @transform_8(%arg0: i32) -> (i32, i32, i32) {
    %c0_i32 = arith.constant 0 : i32
    %c0_i32_0 = arith.constant 0 : i32
    %c0_i32_1 = arith.constant 0 : i32
    %c0_i32_2 = arith.constant 0 : i32
    return %c0_i32, %c0_i32_0, %c0_i32_1 : i32, i32, i32
  }
  func.func @transform_9(%arg0: i32) -> (i32, i32, i32) {
    %c0_i32 = arith.constant 0 : i32
    %c0_i32_0 = arith.constant 0 : i32
    %c0_i32_1 = arith.constant 0 : i32
    %c0_i32_2 = arith.constant 0 : i32
    return %c0_i32, %c0_i32_0, %c0_i32_1 : i32, i32, i32
  }
  func.func @transform_10(%arg0: i32) -> (i32, i32) {
    %c0_i32 = arith.constant 0 : i32
    %c0_i32_0 = arith.constant 0 : i32
    %c0_i32_1 = arith.constant 0 : i32
    return %c0_i32, %c0_i32_0 : i32, i32
  }
  func.func @transform_11(%arg0: i32) -> (i32, i32) {
    %c0_i32 = arith.constant 0 : i32
    %c0_i32_0 = arith.constant 0 : i32
    %c0_i32_1 = arith.constant 0 : i32
    return %c0_i32, %c0_i32_0 : i32, i32
  }
  func.func @transform_12(%arg0: i32) -> (i32, i32) {
    %c0_i32 = arith.constant 0 : i32
    %c0_i32_0 = arith.constant 0 : i32
    %c0_i32_1 = arith.constant 0 : i32
    return %c0_i32, %c0_i32_0 : i32, i32
  }
  func.func @transform_13(%arg0: i32) -> (i32, i32) {
    %c0_i32 = arith.constant 0 : i32
    %c0_i32_0 = arith.constant 0 : i32
    %c0_i32_1 = arith.constant 0 : i32
    return %c0_i32, %c0_i32_0 : i32, i32
  }
  func.func @transform_14(%arg0: i32) -> (i32, i32) {
    %c0_i32 = arith.constant 0 : i32
    %c0_i32_0 = arith.constant 0 : i32
    %c0_i32_1 = arith.constant 0 : i32
    return %c0_i32, %c0_i32_0 : i32, i32
  }
  func.func @transform_15(%arg0: i32) -> (i32, i32) {
    %c0_i32 = arith.constant 0 : i32
    %c0_i32_0 = arith.constant 0 : i32
    %c0_i32_1 = arith.constant 0 : i32
    return %c0_i32, %c0_i32_0 : i32, i32
  }
  func.func @transform_16(%arg0: i32) -> (i32, i32, i32) {
    %c0_i32 = arith.constant 0 : i32
    %c0_i32_0 = arith.constant 0 : i32
    %c0_i32_1 = arith.constant 0 : i32
    %c0_i32_2 = arith.constant 0 : i32
    return %c0_i32, %c0_i32_0, %c0_i32_1 : i32, i32, i32
  }
  func.func @transform_17(%arg0: i32) -> (i32, i32, i32) {
    %c0_i32 = arith.constant 0 : i32
    %c0_i32_0 = arith.constant 0 : i32
    %c0_i32_1 = arith.constant 0 : i32
    %c0_i32_2 = arith.constant 0 : i32
    return %c0_i32, %c0_i32_0, %c0_i32_1 : i32, i32, i32
  }
}

</mosaic_0001>

<bundles_post_ra>
// kernel: decoder_forward_seq.1
= control target key start
LH: loop header
LB: loop body
LE: loop exit
PB: predicated region body
PF: predicated region fallthrough
CT: control target
= control target key end

     0   :  { %s3678_s0 = inlined_call_operand.vmem [shape: s32[12,1], index: 0, kind: input, shape index: {}]   ;;  %s3679_s1 = inlined_call_operand.vmem [shape: f32[2,2,32], index: 1, kind: input, shape index: {}]   ;;  %s3680_s2 = inlined_call_operand.vmem [shape: f32[2,2,32], index: 2, kind: input, shape index: {}]   ;;  %s3681_s3 = inlined_call_operand.vmem [shape: f32[2,32], index: 3, kind: input, shape index: {}]   ;;  %s3682_s4 = inlined_call_operand.vmem [shape: f32[2,8,32], index: 4, kind: input, shape index: {}]   ;;  %s3683_s5 = inlined_call_operand.vmem [shape: f32[2,8,32], index: 5, kind: input, shape index: {}]   ;;  %s3684_s6 = inlined_call_operand.vmem [shape: f32[2,8], index: 6, kind: input, shape index: {}]   ;;  %s3685_s7 = inlined_call_operand.hbm [shape: f32[50,128], index: 7, kind: input, shape index: {}]   ;;  %s3686_s8 = inlined_call_operand.vmem [shape: f32[2,64,128], index: 8, kind: input, shape index: {}]   ;;  %s3687_s9 = inlined_call_operand.vmem [shape: f32[2,1,128], index: 9, kind: input, shape index: {}]   ;;  %s3688_s10 = inlined_call_operand.vmem [shape: f32[64,32], index: 10, kind: input, shape index: {}]   ;;  %s3689_s11 = inlined_call_operand.vmem [shape: f32[1,32], index: 11, kind: input, shape index: {}]   ;;  %s3690_s12 = inlined_call_operand.hbm [shape: f32[32,128], index: 12, kind: input, shape index: {}]   ;;  %s3691_s13 = inlined_call_operand.vmem [shape: f32[1,128], index: 13, kind: input, shape index: {}]   ;;  %s3692_s14 = inlined_call_operand.vmem [shape: f32[12,128], index: 14, kind: output, shape index: {0}]   ;;  %s3693_s15 = inlined_call_operand.hbm [shape: f32[2,32], index: 15, kind: output, shape index: {1}]   ;;  %s3694_s16 = inlined_call_operand.hbm [shape: f32[2,2,32], index: 16, kind: output, shape index: {2}]   ;;  %s3695_s17 = inlined_call_operand.hbm [shape: f32[2,2,32], index: 17, kind: output, shape index: {3}]  }
   0x1   :  { %3698 = sst [smem:[#allocation20_spill]] %s3678_s0 }
   0x2   :  { %3699 = sst [smem:[#allocation21_spill]] %s3679_s1 }
   0x3   :  { %23 = vsyncpa [#allocation8], 0 }
   0x4   :  { %24 = vsyncpa [#allocation11], 0 }
   0x5   :  { %25 = vsyncpa [#allocation9], 0 }
   0x6   :  { %26 = vsyncpa [#allocation14], 0  ;;  %s45_s26 = sshll.u32 %s3685_s7, 4  ;;  %s2820_s27 = smov [#allocation7]   ;;  %s46_s26 = int_to_ptr.hbm [resolvable:$true] %s45_s26 }
   0x7   :  { %s47_s28 = sshll.u32 %s2820_s27, 4  ;;  %s66_s30 = sshll.u32 %s3690_s12, 4  ;;  %s48_s28 = int_to_ptr.vmem [resolvable:$true] %s47_s28  ;;  %s67_s30 = int_to_ptr.hbm [resolvable:$true] %s66_s30 }
   0x8   :  { %s2821_s18 = smov 128   ;;  %s2822_s19 = smov 8  }
   0x9   :  { %53 = dma.hbm_to_vmem [thread:$0]  %s46_s26, 896, %s48_s28, [#allocation8], %s2821_s18, %s2821_s18, %s2822_s19  }
   0xa   :  { %s2823_s1 = smov [#allocation10]  }
   0xb   :  { %s68_s20 = sshll.u32 %s2823_s1, 4  ;;  %s69_s20 = int_to_ptr.vmem [resolvable:$true] %s68_s20 }
   0xc   :  { %74 = dma.hbm_to_vmem [thread:$0]  %s67_s30, 512, %s69_s20, [#allocation11], %s2821_s18, %s2821_s18, %s2822_s19  }
   0xd   :  { %2812 = dma.done.wait [#allocation8], 896  }
   0xe   :  { %2813 = vsyncadd [#allocation8], 4294966400 }
   0xf   :  { %2814 = dma.done.wait [#allocation11], 512  }
  0x10   :  { %2815 = vsyncadd [#allocation11], 4294966784  ;;  %v2824_v0 = vmov 0   ;;  %vm138_vm0 = vcmask 1041408   ;;  %s3700_s21 = sld [smem:[#allocation21_spill]]  ;;  %v176_v2 = vld [vmem:[%s3686_s8 + $0x38] sm:$0xff]  ;;  %v108_v20 = vlaneseq }
  0x11   :  { %2507 = vset.pattern.permute.xlu0 %v2824_v0  ;;  %2510 = vset.pattern.permute.xlu1 %v2824_v0  ;;  %s2825_s24 = smov 32   ;;  %v175_v3 = vld [vmem:[%s3686_s8 + $0x30] sm:$0xff]  ;;  %v130_v4 = vld [vmem:[#allocation7 + $0x30] sm:$0x3]  ;;  %v174_v5 = vld [vmem:[%s3686_s8 + $0x28] sm:$0xff]  ;;  %s3701_s19 = sld [smem:[#allocation20_spill]] }
  0x12   :  { %193 = vmatpush.msra.mxu1 %v176_v2  ;;  %2405 = vmatpush.msk.msra.mxu0 %vm138_vm0, %v130_v4  ;;  %v129_v6 = vld [vmem:[#allocation7 + $0x28] sm:$0xff]  ;;  %v173_v7 = vld [vmem:[%s3686_s8 + $0x20] sm:$0xff]  ;;  %vm87_vm1 = vcmask 254976   ;;  %v128_v10 = vld [vmem:[#allocation7 + $0x20] sm:$0xff]  ;;  %vm97_vm2 = vcmask 517376   ;;  %v2968_v21 = vand.u32 127, %v108_v20 }
  0x13   :  { %v90_v9 = vld [vmem:[%s3681_s3] sm:$0x3]  ;;  %v172_v11 = vld [vmem:[%s3686_s8 + $0x18] sm:$0xff]  ;;  %v127_v12 = vld [vmem:[#allocation7 + $0x18] sm:$0xff]  ;;  %vm181_vm3 = vcmask 523264   ;;  %vm131_vm4 = vcmask 408576  }
  0x14   :  { %194 = vmatpush.msra.mxu1 %v175_v3  ;;  %152 = vmatpush.msra.mxu0 %v129_v6  ;;  %91 = vst.msk [vmem:[#allocation2] sm:$0x3] %vm87_vm1, %v90_v9  ;;  %v171_v13 = vld [vmem:[%s3686_s8 + $0x10] sm:$0xff]  ;;  %v126_v14 = vld [vmem:[#allocation7 + $0x10] sm:$0xff]  ;;  %v170_v15 = vld [vmem:[%s3686_s8 + $0x8] sm:$0xff]  ;;  %v2826_v24 = vmov 0.0  }
  0x15   :  { %v125_v16 = vld [vmem:[#allocation7 + $0x8] sm:$0xff]  ;;  %v169_v17 = vld [vmem:[%s3686_s8] sm:$0xff]  ;;  %v124_v18 = vld [vmem:[#allocation7] sm:$0xff]  ;;  %s2827_s18 = smov 64   ;;  %vm366_vm14 = vcmask 261120   ;;  %vm403_vm15 = vcmask 1041409  }
  0x16   :  { %v92_v1 = vld [vmem:[%s3700_s21] sm:$0x3]  ;;  %195 = vmatpush.msra.mxu1 %v174_v5  ;;  %153 = vmatpush.msra.mxu0 %v128_v10  ;;  %v2402_v50 = vld [vmem:[%s3700_s21 + $0x2] sm:$0x3]  ;;  %v2417_v56 = vld [vmem:[%s3686_s8 + $0x78] sm:$0xff]  ;;  %vm406_vm0 = vcmask 58368  }
  0x17   :  { %94 = vrot.lane.b32.xlu0 %v92_v1, %s2825_s24  ;;  %v110_v8 = vld [vmem:[%s3701_s19] sm:$0xff]  ;;  %v2416_v57 = vld [vmem:[%s3686_s8 + $0x70] sm:$0xff]  ;;  %288 = vmatpush.msra.mxu2 %v2417_v56  ;;  %v2415_v58 = vld [vmem:[%s3686_s8 + $0x68] sm:$0xff]  ;;  %s2354_s29 = sshll.u32 %s3693_s15, 4  ;;  %s2831_s30 = smov [#allocation15]   ;;  %s2355_s29 = int_to_ptr.hbm [resolvable:$true] %s2354_s29 }
  0x18   :  { %196 = vmatpush.msra.mxu1 %v173_v7  ;;  %154 = vmatpush.msra.mxu0 %v127_v12  ;;  %v85_v26 = vld [vmem:[%s3680_s2] sm:$0x3]  ;;  %v2413_v63 = vld [vmem:[%s3686_s8 + $0x58] sm:$0xff]  ;;  %v2412_v1 = vld [vmem:[%s3686_s8 + $0x50] sm:$0xff]  ;;  %s2375_s1 = sshll.u32 %s2831_s30, 4  ;;  %s2832_s20 = smov 2   ;;  %s2376_s1 = int_to_ptr.vmem [resolvable:$true] %s2375_s1 }
  0x19   :  { %88 = vst.msk [vmem:[#allocation3] sm:$0x3] %vm87_vm1, %v85_v26  ;;  %v2521_v28 = vld [vmem:[%s3687_s9] ss:$0 sm:$0xff]  ;;  %289 = vmatpush.msra.mxu2 %v2416_v57  ;;  %v86_v4 = vld [vmem:[%s3680_s2 + $0x2] sm:$0x3] }
  0x1a   :  { %197 = vmatpush.msra.mxu1 %v172_v11  ;;  %155 = vmatpush.msra.mxu0 %v126_v14  ;;  %v2414_v59 = vld [vmem:[%s3686_s8 + $0x60] sm:$0xff]  ;;  %89 = vst.msk [vmem:[#allocation3 + $0x2] sm:$0x3] %vm87_vm1, %v86_v4 }
  0x1b   :  { %290 = vmatpush.msra.mxu2 %v2415_v58 }
  0x1c   :  { %198 = vmatpush.msra.mxu1 %v171_v13  ;;  %156 = vmatpush.msra.mxu0 %v125_v16 }
  0x1d   :  { %291 = vmatpush.msra.mxu2 %v2414_v59 }
  0x1e   :  { %199 = vmatpush.msra.mxu1 %v170_v15  ;;  %157 = vmatpush.msra.mxu0 %v124_v18 }
  0x1f   :  { %113 = vperm.xlu0 %2507, %v110_v8   ;;  %292 = vmatpush.msra.mxu2 %v2413_v63  ;;  %v2522_v8 = vld [vmem:[%s3687_s9 + $0x1] ss:$0 sm:$0xff] }
  0x20   :  { %200 = vmatpush.msra.mxu1 %v169_v17  ;;  %547 = vmatpush.msrb.mxu0 %v176_v2  ;;  %v206_v34 = vld [vmem:[#allocation3] sm:$0x3]  ;;  %v2411_v2 = vld [vmem:[%s3686_s8 + $0x48] sm:$0xff] }
  0x21   :  { %293 = vmatpush.msra.mxu2 %v2412_v1 }
  0x22   :  { %548 = vmatpush.msrb.mxu0 %v175_v3  ;;  %640 = vmatpush.msrb.mxu1 %v2417_v56  ;;  %v2410_v3 = vld [vmem:[%s3686_s8 + $0x40] sm:$0xff] }
  0x23   :  { %294 = vmatpush.msra.mxu2 %v2411_v2 }
  0x24   :  { %549 = vmatpush.msrb.mxu0 %v174_v5  ;;  %641 = vmatpush.msrb.mxu1 %v2416_v57  ;;  %v301_v5 = vld [vmem:[#allocation3 + $0x2] sm:$0x3] }
  0x25   :  { %295 = vmatpush.msra.mxu2 %v2410_v3 }
  0x26   :  { %550 = vmatpush.msrb.mxu0 %v173_v7  ;;  %642 = vmatpush.msrb.mxu1 %v2415_v58 }
  0x28   :  { %551 = vmatpush.msrb.mxu0 %v172_v11  ;;  %643 = vmatpush.msrb.mxu1 %v2414_v59 }
  0x2a   :  { %552 = vmatpush.msrb.mxu0 %v171_v13  ;;  %644 = vmatpush.msrb.mxu1 %v2413_v63 }
  0x2c   :  { %553 = vmatpush.msrb.mxu0 %v170_v15  ;;  %645 = vmatpush.msrb.mxu1 %v2412_v1 }
  0x2e   :  { %554 = vmatpush.msrb.mxu0 %v169_v17  ;;  %646 = vmatpush.msrb.mxu1 %v2411_v2 }
  0x30   :  { %647 = vmatpush.msrb.mxu1 %v2410_v3 }
  0x89   :  { %v95_v19 = vpop.permute.xlu0 %94 }
  0x8a   :  { %98 = vst.msk [vmem:[#allocation2] sm:$0x3] %vm97_vm2, %v95_v19 }
  0x91   :  { %v168_v22 = vld [vmem:[#allocation2] sm:$0x3]  ;;  %v114_v23 = vpop.permute.xlu0 %113 }
  0x92   :  { %vm118_vm5 = vcmp.eq.s32.totalorder %v2968_v21, %v114_v23  ;;  %2408 = vmatmul.msk.f32.vlgmr.msra.gmra.mxu1 %vm181_vm3, %v168_v22 }
  0x93   :  { %v2403_v25 = vsel %vm118_vm5, 1.0, %v2826_v24 }
  0x94   :  { %2406 = vmatmul.msk.f32.vlgmr.msra.gmra.mxu0 %vm131_vm4, %v2403_v25 }
  0x95   :  { %988 = vmatpush.msra.mxu0 %v2417_v56 }
  0x97   :  { %989 = vmatpush.msra.mxu0 %v2416_v57 }
  0x99   :  { %990 = vmatpush.msra.mxu0 %v2415_v58 }
  0x9b   :  { %991 = vmatpush.msra.mxu0 %v2414_v59 }
  0x9d   :  { %992 = vmatpush.msra.mxu0 %v2413_v63 }
  0x9f   :  { %993 = vmatpush.msra.mxu0 %v2412_v1 }
  0xa1   :  { %994 = vmatpush.msra.mxu0 %v2411_v2  ;;  %v111_v2 = vld [vmem:[%s3701_s19 + $0x8] sm:$0xf]  ;;  %s2828_s19 = smov 96  }
  0xa3   :  { %995 = vmatpush.msra.mxu0 %v2410_v3 }
 0x10f   :  { %v202_v29 = vpop.f32.mrf.mxu1 }
 0x110   :  { %v203_v30 = vadd.f32 %v2521_v28, %v202_v29 }
 0x111   :  { %v159_v27 = vpop.f32.mrf.mxu0 }
 0x112   :  { %165 = vst [vmem:[#allocation5] sm:$0xff] %v159_v27 }
 0x119   :  { %v167_v31 = vld [vmem:[#allocation5] sm:$0x3] }
 0x11a   :  { %v205_v32 = vadd.f32 %v203_v30, %v167_v31 }
 0x11c   :  { %2540 = vtanh.f32 %v205_v32  ;;  %v2409_v35 = vmul.f32 -1.442695, %v205_v32 }
 0x11e   :  { %2542 = vpow2.f32 %v2409_v35 }
 0x122   :  { %v2541_v33 = vpop.eup %2540 }
 0x123   :  { %233 = vrot.lane.b32.xlu1 %v2541_v33, %s2827_s18 }
 0x124   :  { %v2543_v36 = vpop.eup %2542 }
 0x125   :  { %v210_v37 = vadd.f32 1.0, %v2543_v36 }
 0x127   :  { %2544 = vrcp.f32 %v210_v37  ;;  %v222_v43 = vand.u32 2147483648, %v210_v37  ;;  %vm216_vm7 = vweird.f32 %v210_v37  ;;  %v220_v44 = vand.u32 2147483647, %v210_v37 }
 0x129   :  { %v223_v46 = vor.u32 1.1754944e-38, %v222_v43  ;;  %vm221_vm9 = vcmp.eq.f32.partialorder %v220_v44, 8.507059e+37  ;;  %v3051_v44 = vld [vmem:[%s3683_s5 + $0x8] sm:$0xff] }
 0x12b   :  { %228 = vrot.lane.b32.xlu1 %v206_v34, %s2825_s24 }
 0x12d   :  { %v2545_v38 = vpop.eup %2544 }
 0x12e   :  { %v212_v39 = vmul.f32 %v2545_v38, %v210_v37  ;;  %vm217_vm6 = vweird.f32 %v2545_v38 }
 0x12f   :  { %vm218_vm8 = vmor %vm216_vm7, %vm217_vm6 }
 0x130   :  { %v213_v40 = vsub.f32 1.0, %v212_v39 }
 0x132   :  { %v214_v41 = vmul.f32 %v2545_v38, %v213_v40  ;;  %v3042_v40 = vshrl.u32 %v108_v20, 7 }
 0x133   :  { %102 = vrot.lane.b32.xlu1 %v2402_v50, %s2825_s24 }
 0x134   :  { %v215_v42 = vadd.f32 %v2545_v38, %v214_v41  ;;  %2508 = vset.pattern.permute.xlu2 %v3042_v40  ;;  %v373_v41 = vld [vmem:[%s3684_s6] sm:$0x3] }
 0x135   :  { %v382_v43 = vperm.slane %v373_v41, 1 }
 0x136   :  { %v219_v45 = vsel %vm218_vm8, %v2545_v38, %v215_v42  ;;  %v375_v42 = vperm.slane %v373_v41, 0  ;;  %v484_v41 = vld [vmem:[%s3688_s10] sm:$0xff] }
 0x137   :  { %v224_v48 = vsel %vm221_vm9, %v223_v46, %v219_v45 }
 0x13b   :  { %323 = vrot.lane.b32.xlu1 %v301_v5, %s2825_s24 }
 0x195   :  { %v234_v47 = vpop.permute.xlu1 %233 }
 0x196   :  { %v236_v49 = vmul.f32 %v234_v47, %v224_v48  ;;  %v3059_v47 = vld [vmem:[%s3683_s5] sm:$0xff] }
 0x198   :  { %238 = vrot.lane.b32.xlu2 %v236_v49, %s2825_s24 }
 0x19d   :  { %v229_v51 = vpop.permute.xlu1 %228 }
 0x19e   :  { %v231_v52 = vmul.f32 %v229_v51, %v224_v48 }
 0x1a5   :  { %v103_v60 = vpop.permute.xlu1 %102 }
 0x1a6   :  { %106 = vst.msk [vmem:[#allocation2 + $0x2] sm:$0x3] %vm97_vm2, %v103_v60 }
 0x1a7   :  { %107 = vst.msk [vmem:[#allocation2 + $0x2] sm:$0x3] %vm87_vm1, %v2826_v24 }
 0x1ad   :  { %v324_v30 = vpop.permute.xlu1 %323 }
 0x1f2   :  { %v239_v53 = vpop.permute.xlu2 %238 }
 0x1f3   :  { %v2988_v54 = vadd.f32 %v239_v53, %v231_v52 }
 0x1f5   :  { %2546 = vtanh.f32 %v2988_v54 }
 0x1fb   :  { %v2547_v55 = vpop.eup %2546 }
 0x1fc   :  { %244 = vrot.lane.b32.xlu2 %v2547_v55, %s2827_s18 }
 0x256   :  { %v245_v61 = vpop.permute.xlu2 %244 }
 0x257   :  { %v3007_v62 = vmul.f32 %v245_v61, %v224_v48 }
 0x259   :  { %258 = vrot.lane.b32.xlu2 %v3007_v62, %s2825_s24 }
 0x2b3   :  { %v259_v6 = vpop.permute.xlu2 %258 }
 0x2b4   :  { %261 = vst.msk [vmem:[#allocation2 + $0x2] sm:$0x3] %vm87_vm1, %v259_v6 }
 0x2bb   :  { %v262_v7 = vld [vmem:[#allocation2 + $0x2] sm:$0x3] }
 0x2bc   :  { %2419 = vmatmul.msk.f32.vlgmr.msra.gmra.mxu2 %vm181_vm3, %v262_v7 }
 0x33f   :  { %v297_v9 = vpop.f32.mrf.mxu2 }
 0x340   :  { %v298_v10 = vadd.f32 %v2522_v8, %v297_v9 }
 0x342   :  { %2548 = vtanh.f32 %v298_v10  ;;  %v2420_v12 = vmul.f32 -1.442695, %v298_v10 }
 0x344   :  { %2550 = vpow2.f32 %v2420_v12 }
 0x348   :  { %v2549_v11 = vpop.eup %2548 }
 0x349   :  { %328 = vrot.lane.b32.xlu0 %v2549_v11, %s2827_s18 }
 0x34a   :  { %v2551_v13 = vpop.eup %2550 }
 0x34b   :  { %v305_v14 = vadd.f32 1.0, %v2551_v13 }
 0x34d   :  { %2552 = vrcp.f32 %v305_v14  ;;  %v317_v22 = vand.u32 2147483648, %v305_v14  ;;  %vm311_vm11 = vweird.f32 %v305_v14  ;;  %v315_v23 = vand.u32 2147483647, %v305_v14 }
 0x34f   :  { %v318_v26 = vor.u32 1.1754944e-38, %v317_v22  ;;  %vm316_vm13 = vcmp.eq.f32.partialorder %v315_v23, 8.507059e+37 }
 0x353   :  { %v2553_v15 = vpop.eup %2552 }
 0x354   :  { %v307_v16 = vmul.f32 %v2553_v15, %v305_v14  ;;  %vm312_vm10 = vweird.f32 %v2553_v15 }
 0x355   :  { %vm313_vm12 = vmor %vm311_vm11, %vm312_vm10 }
 0x356   :  { %v308_v17 = vsub.f32 1.0, %v307_v16 }
 0x358   :  { %v309_v18 = vmul.f32 %v2553_v15, %v308_v17 }
 0x35a   :  { %v310_v19 = vadd.f32 %v2553_v15, %v309_v18 }
 0x35c   :  { %v314_v25 = vsel %vm313_vm12, %v2553_v15, %v310_v19 }
 0x35d   :  { %v319_v27 = vsel %vm316_vm13, %v318_v26, %v314_v25  ;;  %v491_v25 = vld [vmem:[%s3688_s10 + $0x38] sm:$0xff]  ;;  %v3096_v26 = vld [vmem:[%s3682_s4 + $0x8] sm:$0xff] }
 0x35e   :  { %v326_v31 = vmul.f32 %v324_v30, %v319_v27  ;;  %507 = vmatpush.msra.mxu3 %v491_v25  ;;  %855 = vmatpush.msrb.mxu2 %v491_v25 }
 0x35f   :  { %1203 = vmatpush.msra.mxu1 %v491_v25 }
 0x3bb   :  { %v329_v28 = vpop.permute.xlu0 %328 }
 0x3bc   :  { %v331_v29 = vmul.f32 %v329_v28, %v319_v27  ;;  %v3104_v28 = vld [vmem:[%s3682_s4] sm:$0xff] }
 0x3be   :  { %333 = vrot.lane.b32.xlu2 %v331_v29, %s2825_s24  ;;  %v489_v29 = vld [vmem:[%s3688_s10 + $0x28] sm:$0xff] }
 0x418   :  { %v334_v32 = vpop.permute.xlu2 %333 }
 0x419   :  { %v3035_v33 = vadd.f32 %v334_v32, %v326_v31  ;;  %v488_v31 = vld [vmem:[%s3688_s10 + $0x20] sm:$0xff] }
 0x41b   :  { %2554 = vtanh.f32 %v3035_v33 }
 0x421   :  { %v2555_v34 = vpop.eup %2554 }
 0x422   :  { %339 = vrot.lane.b32.xlu0 %v2555_v34, %s2827_s18  ;;  %v487_v34 = vld [vmem:[%s3688_s10 + $0x18] sm:$0xff] }
 0x494   :  { %v340_v35 = vpop.permute.xlu0 %339 }
 0x495   :  { %v342_v36 = vmul.f32 %v340_v35, %v319_v27  ;;  %v490_v27 = vld [vmem:[%s3688_s10 + $0x30] sm:$0xff] }
 0x496   :  { %508 = vmatpush.msra.mxu3 %v490_v27  ;;  %856 = vmatpush.msrb.mxu2 %v490_v27  ;;  %v486_v35 = vld [vmem:[%s3688_s10 + $0x10] sm:$0xff] }
 0x497   :  { %v356_v37 = vperm.slane %v342_v36, 0  ;;  %v355_v38 = vrot.slane %v342_v36, 1  ;;  %1204 = vmatpush.msra.mxu1 %v490_v27 }
 0x498   :  { %509 = vmatpush.msra.mxu3 %v489_v29  ;;  %857 = vmatpush.msrb.mxu2 %v489_v29 }
 0x499   :  { %358 = vrot.lane.b32.xlu1 %v356_v37, %s2825_s24  ;;  %v357_v39 = vperm.slane %v355_v38, 0  ;;  %1205 = vmatpush.msra.mxu1 %v489_v29  ;;  %v485_v37 = vld [vmem:[%s3688_s10 + $0x8] sm:$0xff] }
 0x49a   :  { %510 = vmatpush.msra.mxu3 %v488_v31  ;;  %858 = vmatpush.msrb.mxu2 %v488_v31 }
 0x49b   :  { %360 = vrot.lane.b32.xlu2 %v357_v39, %s2825_s24  ;;  %1206 = vmatpush.msra.mxu1 %v488_v31 }
 0x49c   :  { %511 = vmatpush.msra.mxu3 %v487_v34  ;;  %859 = vmatpush.msrb.mxu2 %v487_v34 }
 0x49d   :  { %1207 = vmatpush.msra.mxu1 %v487_v34 }
 0x49e   :  { %512 = vmatpush.msra.mxu3 %v486_v35  ;;  %860 = vmatpush.msrb.mxu2 %v486_v35 }
 0x49f   :  { %1208 = vmatpush.msra.mxu1 %v486_v35 }
 0x4a0   :  { %513 = vmatpush.msra.mxu3 %v485_v37  ;;  %861 = vmatpush.msrb.mxu2 %v485_v37 }
 0x4a1   :  { %1209 = vmatpush.msra.mxu1 %v485_v37 }
 0x4a2   :  { %514 = vmatpush.msra.mxu3 %v484_v41  ;;  %862 = vmatpush.msrb.mxu2 %v484_v41 }
 0x4a3   :  { %380 = vperm.xlu2 %2508, %v375_v42   ;;  %1210 = vmatpush.msra.mxu1 %v484_v41 }
 0x4ab   :  { %387 = vperm.xlu2 %2508, %v382_v43  }
 0x4b3   :  { %2509 = vset.pattern.permute.xlu2 %v2824_v0 }
 0x4f5   :  { %v361_v45 = vpop.permute.xlu2 %360 }
 0x4f6   :  { %v365_v20 = vmul.f32 %v361_v45, %v3051_v44 }
 0x4f8   :  { %v370_v46 = vsel %vm366_vm14, %v365_v20, 0.0 }
 0x4f9   :  { %371 = vadd.xlane.f32.xlu1 %v370_v46 }
 0x4fd   :  { %v381_v51 = vpop.permute.xlu2 %380 }
 0x505   :  { %v388_v56 = vpop.permute.xlu2 %387 }
 0x50b   :  { %v359_v48 = vpop.permute.xlu1 %358 }
 0x50c   :  { %v364_v49 = vmul.f32 %v359_v48, %v3059_v47 }
 0x50e   :  { %v367_v50 = vsel %vm366_vm14, %v364_v49, 0.0 }
 0x50f   :  { %368 = vadd.xlane.f32.xlu0 %v367_v50 }
 0x56c   :  { %v372_v55 = vpop.xlane.xlu1 %371 }
 0x56d   :  { %v392_v57 = vadd.f32 %v388_v56, %v372_v55 }
 0x582   :  { %v369_v52 = vpop.xlane.xlu0 %368 }
 0x583   :  { %v391_v53 = vadd.f32 %v381_v51, %v369_v52 }
 0x585   :  { %396 = vperm.xlu2 %2509, %v391_v53  }
 0x58d   :  { %399 = vperm.xlu2 %2509, %v392_v57  }
 0x5df   :  { %v397_v58 = vpop.permute.xlu2 %396 }
 0x5e0   :  { %v401_v60 = vperm.slane %v397_v58, %v2968_v21 }
 0x5e7   :  { %v400_v59 = vpop.permute.xlu2 %399 }
 0x5e8   :  { %v402_v61 = vperm.slane %v400_v59, %v2968_v21 }
 0x5ea   :  { %v404_v63 = vsel %vm403_vm15, %v402_v61, %v401_v60 }
 0x5eb   :  { %v407_v1 = vsel %vm406_vm0, %v404_v63, -inf }
 0x5ec   :  { %408 = vmax.xlane.f32.xlu2 %v407_v1 }
 0x604   :  { %116 = vperm.xlu2 %2509, %v111_v2  }
 0x60c   :  { %2511 = vset.pattern.permute.xlu2 %v3042_v40 }
 0x65f   :  { %v409_v3 = vpop.xlane.xlu2 %408 }
 0x660   :  { %v411_v4 = vperm.slane %v409_v3, 0  ;;  %v412_v5 = vperm.slane %v409_v3, 1 }
 0x662   :  { %v415_v6 = vsub.f32 %v391_v53, %v411_v4  ;;  %v416_v7 = vsub.f32 %v392_v57, %v412_v5 }
 0x664   :  { %v417_v8 = vmul.f32 1.442695, %v415_v6  ;;  %v419_v9 = vmul.f32 1.442695, %v416_v7 }
 0x666   :  { %2556 = vpow2.f32 %v417_v8 }
 0x667   :  { %2558 = vpow2.f32 %v419_v9  ;;  %v117_v10 = vpop.permute.xlu2 %116 }
 0x668   :  { %vm119_vm5 = vcmp.eq.s32.totalorder %v2968_v21, %v117_v10  ;;  %v2523_v10 = vld [vmem:[%s3689_s11] ss:$0 sm:$0xff] }
 0x669   :  { %v2404_v11 = vsel %vm119_vm5, 1.0, %v2826_v24 }
 0x66a   :  { %2407 = vmatmul.msk.f32.gmra.mxu0 %vm131_vm4, %v2404_v11 }
 0x66c   :  { %v2557_v12 = vpop.eup %2556 }
 0x66d   :  { %v2559_v13 = vpop.eup %2558  ;;  %424 = vperm.xlu0 %2507, %v2557_v12  }
 0x66e   :  { %427 = vperm.xlu1 %2510, %v2559_v13  }
 0x676   :  { %349 = vrot.lane.b32.xlu1 %v342_v36, %s2827_s18 }
 0x67e   :  { %254 = vrot.lane.b32.xlu1 %v3007_v62, %s2827_s18 }
 0x686   :  { %249 = vrot.lane.b32.xlu1 %v2988_v54, %s2828_s19 }
 0x6df   :  { %v425_v14 = vpop.permute.xlu0 %424 }
 0x6e0   :  { %v428_v15 = vpop.permute.xlu1 %427  ;;  %v429_v16 = vperm.slane %v425_v14, %v2968_v21  ;;  %v440_v32 = vmul.f32 %v3104_v28, %v425_v14 }
 0x6e1   :  { %v430_v24 = vperm.slane %v428_v15, %v2968_v21  ;;  %v441_v30 = vmul.f32 %v3096_v26, %v428_v15  ;;  %v2524_v15 = vld [vmem:[%s3687_s9] ss:$0 sm:$0xff] }
 0x6e2   :  { %v442_v38 = vsel %vm366_vm14, %v440_v32, 0.0 }
 0x6e3   :  { %v431_v17 = vsel %vm403_vm15, %v430_v24, %v429_v16  ;;  %v449_v36 = vsel %vm366_vm14, %v441_v30, 0.0  ;;  %v443_v42 = vrot.slane %v442_v38, 4 }
 0x6e4   :  { %v433_v18 = vsel %vm406_vm0, %v431_v17, 0.0  ;;  %v450_v39 = vrot.slane %v449_v36, 4  ;;  %v522_v17 = vld [vmem:[#allocation5 + $0x2] sm:$0x3] }
 0x6e5   :  { %434 = vadd.xlane.f32.xlu0 %v433_v18  ;;  %v444_v20 = vadd.f32 %v443_v42, %v442_v38 }
 0x6e6   :  { %v451_v45 = vadd.f32 %v450_v39, %v449_v36 }
 0x6e7   :  { %v162_v19 = vpop.f32.mrf.mxu0  ;;  %v445_v49 = vrot.slane %v444_v20, 2 }
 0x6e8   :  { %v3083_v22 = vpop.permute.xlu1 %349  ;;  %166 = vst [vmem:[#allocation5 + $0x8] sm:$0xf] %v162_v19  ;;  %v452_v46 = vrot.slane %v451_v45, 2 }
 0x6e9   :  { %352 = vst.msk [vmem:[#allocation2 + $0x2] sm:$0x3] %vm97_vm2, %v3083_v22  ;;  %v446_v55 = vadd.f32 %v445_v49, %v444_v20 }
 0x6ea   :  { %v453_v51 = vadd.f32 %v452_v46, %v451_v45 }
 0x6eb   :  { %v447_v61 = vrot.slane %v446_v55, 1 }
 0x6ec   :  { %v454_v58 = vrot.slane %v453_v51, 1 }
 0x6ed   :  { %v448_v4 = vadd.f32 %v447_v61, %v446_v55 }
 0x6ee   :  { %v455_v2 = vadd.f32 %v454_v58, %v453_v51  ;;  %v2525_v51 = vld [vmem:[%s3687_s9 + $0x1] ss:$0 sm:$0xff] }
 0x6f0   :  { %v255_v62 = vpop.permute.xlu1 %254 }
 0x6f1   :  { %257 = vst.msk [vmem:[#allocation2] sm:$0x3] %vm97_vm2, %v255_v62 }
 0x6f8   :  { %v250_v54 = vpop.permute.xlu1 %249 }
 0x6f9   :  { %252 = vst.msk [vmem:[#allocation3] sm:$0x3] %vm87_vm1, %v250_v54 }
 0x700   :  { %v560_v23 = vld [vmem:[#allocation3] sm:$0x3] }
 0x701   :  { %582 = vrot.lane.b32.xlu2 %v560_v23, %s2825_s24 }
 0x758   :  { %v435_v43 = vpop.xlane.xlu0 %434 }
 0x759   :  { %2560 = vrcp.f32 %v435_v43  ;;  %v467_v53 = vand.u32 2147483648, %v435_v43  ;;  %v465_v57 = vand.u32 2147483647, %v435_v43  ;;  %vm461_vm6 = vweird.f32 %v435_v43 }
 0x75b   :  { %v468_v60 = vor.u32 1.1754944e-38, %v467_v53  ;;  %vm466_vm8 = vcmp.eq.f32.partialorder %v465_v57, 8.507059e+37  ;;  %v583_v39 = vpop.permute.xlu2 %582 }
 0x75f   :  { %v2561_v48 = vpop.eup %2560 }
 0x760   :  { %v457_v50 = vmul.f32 %v2561_v48, %v435_v43  ;;  %vm462_vm4 = vweird.f32 %v2561_v48 }
 0x761   :  { %vm463_vm7 = vmor %vm461_vm6, %vm462_vm4 }
 0x762   :  { %v458_v52 = vsub.f32 1.0, %v457_v50 }
 0x764   :  { %v459_v56 = vmul.f32 %v2561_v48, %v458_v52 }
 0x766   :  { %v460_v59 = vadd.f32 %v2561_v48, %v459_v56 }
 0x768   :  { %v464_v63 = vsel %vm463_vm7, %v2561_v48, %v460_v59 }
 0x769   :  { %v469_v1 = vsel %vm466_vm8, %v468_v60, %v464_v63 }
 0x76a   :  { %v471_v3 = vrot.slane %v469_v1, 1  ;;  %v474_v6 = vmul.f32 %v469_v1, %v448_v4 }
 0x76c   :  { %v475_v5 = vmul.f32 %v471_v3, %v455_v2 }
 0x76e   :  { %v478_v7 = vrot.slane %v475_v5, 7 }
 0x770   :  { %v479_v8 = vsel %vm403_vm15, %v478_v7, %v474_v6 }
 0x771   :  { %481 = vst.msk [vmem:[#allocation4] sm:$0x3] %vm87_vm1, %v479_v8 }
 0x772   :  { %482 = vst.msk [vmem:[#allocation4] sm:$0x3] %vm97_vm2, %v3083_v22 }
 0x779   :  { %v483_v9 = vld [vmem:[#allocation4] sm:$0x3] }
 0x77a   :  { %2421 = vmatmul.msk.f32.vlgmr.msra.gmra.mxu3 %vm181_vm3, %v483_v9 }
 0x7fd   :  { %v516_v11 = vpop.f32.mrf.mxu3 }
 0x7fe   :  { %v517_v12 = vadd.f32 %v2523_v10, %v516_v11 }
 0x800   :  { %2562 = vtanh.f32 %v517_v12 }
 0x806   :  { %v2563_v13 = vpop.eup %2562 }
 0x807   :  { %520 = vst.msk [vmem:[#allocation2] sm:$0x3] %vm87_vm1, %v2563_v13 }
 0x808   :  { %521 = vst.msk [vmem:[#allocation6] sm:$0x3] %vm87_vm1, %v2563_v13 }
 0x80e   :  { %v523_v14 = vld [vmem:[#allocation2] sm:$0x3] }
 0x80f   :  { %2422 = vmatmul.msk.f32.vlgmr.msrb.gmra.mxu0 %vm181_vm3, %v523_v14 }
 0x88c   :  { %v556_v16 = vpop.f32.mrf.mxu0 }
 0x88d   :  { %v557_v24 = vadd.f32 %v2524_v15, %v556_v16 }
 0x88f   :  { %v559_v18 = vadd.f32 %v557_v24, %v522_v17 }
 0x891   :  { %2564 = vtanh.f32 %v559_v18  ;;  %v2423_v22 = vmul.f32 -1.442695, %v559_v18  ;;  %v723_v18 = vld [vmem:[%s3684_s6] sm:$0x3] }
 0x893   :  { %2566 = vpow2.f32 %v2423_v22  ;;  %v732_v22 = vperm.slane %v723_v18, 1 }
 0x897   :  { %v2565_v19 = vpop.eup %2564 }
 0x898   :  { %587 = vrot.lane.b32.xlu1 %v2565_v19, %s2827_s18  ;;  %v725_v19 = vperm.slane %v723_v18, 0 }
 0x899   :  { %v2567_v62 = vpop.eup %2566 }
 0x89a   :  { %v564_v54 = vadd.f32 1.0, %v2567_v62 }
 0x89c   :  { %2568 = vrcp.f32 %v564_v54  ;;  %v576_v31 = vand.u32 2147483648, %v564_v54  ;;  %vm570_vm10 = vweird.f32 %v564_v54  ;;  %v574_v32 = vand.u32 2147483647, %v564_v54 }
 0x89e   :  { %v577_v35 = vor.u32 1.1754944e-38, %v576_v31  ;;  %vm575_vm12 = vcmp.eq.f32.partialorder %v574_v32, 8.507059e+37 }
 0x8a2   :  { %v2569_v23 = vpop.eup %2568 }
 0x8a3   :  { %v566_v25 = vmul.f32 %v2569_v23, %v564_v54  ;;  %vm571_vm9 = vweird.f32 %v2569_v23 }
 0x8a4   :  { %vm572_vm11 = vmor %vm570_vm10, %vm571_vm9 }
 0x8a5   :  { %v567_v27 = vsub.f32 1.0, %v566_v25 }
 0x8a7   :  { %v568_v29 = vmul.f32 %v2569_v23, %v567_v27 }
 0x8a9   :  { %v569_v30 = vadd.f32 %v2569_v23, %v568_v29 }
 0x8ab   :  { %v573_v34 = vsel %vm572_vm11, %v2569_v23, %v569_v30 }
 0x8ac   :  { %v578_v37 = vsel %vm575_vm12, %v577_v35, %v573_v34 }
 0x8ad   :  { %v585_v41 = vmul.f32 %v583_v39, %v578_v37 }
 0x90a   :  { %v588_v36 = vpop.permute.xlu1 %587 }
 0x90b   :  { %v590_v38 = vmul.f32 %v588_v36, %v578_v37 }
 0x90d   :  { %592 = vrot.lane.b32.xlu1 %v590_v38, %s2825_s24 }
 0x915   :  { %344 = vrot.lane.b32.xlu1 %v3035_v33, %s2828_s19 }
 0x97f   :  { %v593_v42 = vpop.permute.xlu1 %592 }
 0x980   :  { %v3146_v43 = vadd.f32 %v593_v42, %v585_v41 }
 0x982   :  { %2570 = vtanh.f32 %v3146_v43 }
 0x987   :  { %v345_v45 = vpop.permute.xlu1 %344 }
 0x988   :  { %v2571_v20 = vpop.eup %2570  ;;  %347 = vst.msk [vmem:[#allocation3 + $0x2] sm:$0x3] %vm87_vm1, %v345_v45 }
 0x989   :  { %598 = vrot.lane.b32.xlu0 %v2571_v20, %s2827_s18 }
 0x98f   :  { %v652_v46 = vld [vmem:[#allocation3 + $0x2] sm:$0x3] }
 0x990   :  { %674 = vrot.lane.b32.xlu1 %v652_v46, %s2825_s24 }
 0x9fb   :  { %v599_v48 = vpop.permute.xlu0 %598 }
 0x9fc   :  { %v3152_v49 = vmul.f32 %v599_v48, %v578_v37 }
 0x9fe   :  { %612 = vrot.lane.b32.xlu2 %v3152_v49, %s2825_s24 }
 0xa02   :  { %v675_v9 = vpop.permute.xlu1 %674 }
 0xa58   :  { %v613_v33 = vpop.permute.xlu2 %612 }
 0xa59   :  { %615 = vst.msk [vmem:[#allocation2 + $0x2] sm:$0x3] %vm87_vm1, %v613_v33 }
 0xa60   :  { %v616_v50 = vld [vmem:[#allocation2 + $0x2] sm:$0x3] }
 0xa61   :  { %2433 = vmatmul.msk.f32.vlgmr.msrb.gmra.mxu1 %vm181_vm3, %v616_v50 }
 0xade   :  { %v649_v52 = vpop.f32.mrf.mxu1 }
 0xadf   :  { %v650_v53 = vadd.f32 %v2525_v51, %v649_v52 }
 0xae1   :  { %2572 = vtanh.f32 %v650_v53  ;;  %v2434_v56 = vmul.f32 -1.442695, %v650_v53 }
 0xae3   :  { %2574 = vpow2.f32 %v2434_v56 }
 0xae7   :  { %v2573_v55 = vpop.eup %2572 }
 0xae8   :  { %679 = vrot.lane.b32.xlu2 %v2573_v55, %s2827_s18 }
 0xae9   :  { %v2575_v57 = vpop.eup %2574 }
 0xaea   :  { %v656_v58 = vadd.f32 1.0, %v2575_v57 }
 0xaec   :  { %2576 = vrcp.f32 %v656_v58  ;;  %v668_v2 = vand.u32 2147483648, %v656_v58  ;;  %vm662_vm5 = vweird.f32 %v656_v58  ;;  %v666_v3 = vand.u32 2147483647, %v656_v58 }
 0xaee   :  { %v669_v5 = vor.u32 1.1754944e-38, %v668_v2  ;;  %vm667_vm6 = vcmp.eq.f32.partialorder %v666_v3, 8.507059e+37 }
 0xaf2   :  { %v2577_v59 = vpop.eup %2576 }
 0xaf3   :  { %v658_v60 = vmul.f32 %v2577_v59, %v656_v58  ;;  %vm663_vm13 = vweird.f32 %v2577_v59 }
 0xaf4   :  { %vm664_vm4 = vmor %vm662_vm5, %vm663_vm13 }
 0xaf5   :  { %v659_v61 = vsub.f32 1.0, %v658_v60 }
 0xaf7   :  { %v660_v63 = vmul.f32 %v2577_v59, %v659_v61 }
 0xaf9   :  { %v661_v1 = vadd.f32 %v2577_v59, %v660_v63 }
 0xafb   :  { %v665_v4 = vsel %vm664_vm4, %v2577_v59, %v661_v1 }
 0xafc   :  { %v670_v7 = vsel %vm667_vm6, %v669_v5, %v665_v4 }
 0xafd   :  { %v677_v10 = vmul.f32 %v675_v9, %v670_v7 }
 0xb42   :  { %v680_v6 = vpop.permute.xlu2 %679 }
 0xb43   :  { %v682_v8 = vmul.f32 %v680_v6, %v670_v7 }
 0xb45   :  { %684 = vrot.lane.b32.xlu2 %v682_v8, %s2825_s24 }
 0xb9f   :  { %v685_v11 = vpop.permute.xlu2 %684 }
 0xba0   :  { %v3163_v12 = vadd.f32 %v685_v11, %v677_v10 }
 0xba2   :  { %2578 = vtanh.f32 %v3163_v12 }
 0xba8   :  { %v2579_v13 = vpop.eup %2578 }
 0xba9   :  { %690 = vrot.lane.b32.xlu1 %v2579_v13, %s2827_s18 }
 0xc1b   :  { %v691_v14 = vpop.permute.xlu1 %690 }
 0xc1c   :  { %v693_v15 = vmul.f32 %v691_v14, %v670_v7 }
 0xc1e   :  { %v707_v16 = vperm.slane %v693_v15, 0  ;;  %v706_v24 = vrot.slane %v693_v15, 1 }
 0xc20   :  { %709 = vrot.lane.b32.xlu0 %v707_v16, %s2825_s24  ;;  %v708_v17 = vperm.slane %v706_v24, 0 }
 0xc22   :  { %711 = vrot.lane.b32.xlu2 %v708_v17, %s2825_s24 }
 0xc2a   :  { %730 = vperm.xlu2 %2511, %v725_v19  }
 0xc32   :  { %737 = vperm.xlu2 %2511, %v732_v22  }
 0xc3a   :  { %2512 = vset.pattern.permute.xlu2 %v2824_v0 }
 0xc7c   :  { %v712_v62 = vpop.permute.xlu2 %711 }
 0xc7d   :  { %v716_v54 = vmul.f32 %v712_v62, %v3051_v44 }
 0xc7f   :  { %v720_v23 = vsel %vm366_vm14, %v716_v54, 0.0 }
 0xc80   :  { %721 = vadd.xlane.f32.xlu0 %v720_v23 }
 0xc84   :  { %v731_v30 = vpop.permute.xlu2 %730 }
 0xc8c   :  { %v738_v35 = vpop.permute.xlu2 %737 }
 0xc92   :  { %v710_v25 = vpop.permute.xlu0 %709 }
 0xc93   :  { %v715_v27 = vmul.f32 %v710_v25, %v3059_v47 }
 0xc95   :  { %v717_v29 = vsel %vm366_vm14, %v715_v27, 0.0 }
 0xc96   :  { %718 = vadd.xlane.f32.xlu1 %v717_v29 }
 0xcf3   :  { %v722_v34 = vpop.xlane.xlu0 %721 }
 0xcf4   :  { %v742_v36 = vadd.f32 %v738_v35, %v722_v34 }
 0xd09   :  { %v719_v31 = vpop.xlane.xlu1 %718 }
 0xd0a   :  { %v741_v32 = vadd.f32 %v731_v30, %v719_v31 }
 0xd0c   :  { %746 = vperm.xlu2 %2512, %v741_v32  }
 0xd14   :  { %749 = vperm.xlu2 %2512, %v742_v36  }
 0xd1c   :  { %2513 = vset.pattern.permute.xlu2 %v3042_v40 }
 0xd66   :  { %v747_v37 = vpop.permute.xlu2 %746 }
 0xd67   :  { %v751_v39 = vperm.slane %v747_v37, %v2968_v21 }
 0xd6e   :  { %v750_v38 = vpop.permute.xlu2 %749 }
 0xd6f   :  { %v752_v41 = vperm.slane %v750_v38, %v2968_v21  ;;  %v879_v38 = vld [vmem:[%s3686_s8 + $0x38] sm:$0xff] }
 0xd70   :  { %895 = vmatpush.msrb.mxu3 %v879_v38  ;;  %1243 = vmatpush.msra.mxu2 %v879_v38 }
 0xd71   :  { %v753_v42 = vsel %vm403_vm15, %v752_v41, %v751_v39  ;;  %v878_v39 = vld [vmem:[%s3686_s8 + $0x30] sm:$0xff]  ;;  %1591 = vmatpush.msrb.mxu1 %v879_v38  ;;  %v877_v41 = vld [vmem:[%s3686_s8 + $0x28] sm:$0xff] }
 0xd72   :  { %v755_v45 = vsel %vm406_vm0, %v753_v42, -inf  ;;  %896 = vmatpush.msrb.mxu3 %v878_v39  ;;  %1244 = vmatpush.msra.mxu2 %v878_v39  ;;  %v876_v42 = vld [vmem:[%s3686_s8 + $0x20] sm:$0xff] }
 0xd73   :  { %756 = vmax.xlane.f32.xlu2 %v755_v45  ;;  %1592 = vmatpush.msrb.mxu1 %v878_v39  ;;  %v875_v45 = vld [vmem:[%s3686_s8 + $0x18] sm:$0xff] }
 0xd74   :  { %897 = vmatpush.msrb.mxu3 %v877_v41  ;;  %1245 = vmatpush.msra.mxu2 %v877_v41 }
 0xd75   :  { %1593 = vmatpush.msrb.mxu1 %v877_v41 }
 0xd76   :  { %898 = vmatpush.msrb.mxu3 %v876_v42  ;;  %1246 = vmatpush.msra.mxu2 %v876_v42 }
 0xd77   :  { %1594 = vmatpush.msrb.mxu1 %v876_v42 }
 0xd78   :  { %899 = vmatpush.msrb.mxu3 %v875_v45  ;;  %1247 = vmatpush.msra.mxu2 %v875_v45 }
 0xd79   :  { %1595 = vmatpush.msrb.mxu1 %v875_v45 }
 0xd8b   :  { %603 = vrot.lane.b32.xlu2 %v3146_v43, %s2828_s19 }
 0xde6   :  { %v757_v20 = vpop.xlane.xlu2 %756 }
 0xde7   :  { %v759_v46 = vperm.slane %v757_v20, 0  ;;  %v760_v48 = vperm.slane %v757_v20, 1  ;;  %v874_v20 = vld [vmem:[%s3686_s8 + $0x10] sm:$0xff] }
 0xde8   :  { %900 = vmatpush.msrb.mxu3 %v874_v20  ;;  %1248 = vmatpush.msra.mxu2 %v874_v20 }
 0xde9   :  { %v763_v33 = vsub.f32 %v741_v32, %v759_v46  ;;  %v764_v50 = vsub.f32 %v742_v36, %v760_v48  ;;  %v873_v46 = vld [vmem:[%s3686_s8 + $0x8] sm:$0xff]  ;;  %v872_v48 = vld [vmem:[%s3686_s8] sm:$0xff]  ;;  %1596 = vmatpush.msrb.mxu1 %v874_v20 }
 0xdea   :  { %901 = vmatpush.msrb.mxu3 %v873_v46  ;;  %1249 = vmatpush.msra.mxu2 %v873_v46 }
 0xdeb   :  { %v765_v51 = vmul.f32 1.442695, %v763_v33  ;;  %v767_v52 = vmul.f32 1.442695, %v764_v50  ;;  %1597 = vmatpush.msrb.mxu1 %v873_v46  ;;  %v2526_v33 = vld [vmem:[%s3689_s11] ss:$0 sm:$0xff] }
 0xdec   :  { %902 = vmatpush.msrb.mxu3 %v872_v48  ;;  %1250 = vmatpush.msra.mxu2 %v872_v48 }
 0xded   :  { %2580 = vpow2.f32 %v765_v51  ;;  %1598 = vmatpush.msrb.mxu1 %v872_v48 }
 0xdee   :  { %2582 = vpow2.f32 %v767_v52  ;;  %v604_v53 = vpop.permute.xlu2 %603 }
 0xdef   :  { %606 = vst.msk [vmem:[#allocation3] sm:$0x3] %vm87_vm1, %v604_v53 }
 0xdf3   :  { %v2581_v55 = vpop.eup %2580 }
 0xdf4   :  { %v2583_v56 = vpop.eup %2582  ;;  %772 = vperm.xlu1 %2510, %v2581_v55   ;;  %v2527_v55 = vld [vmem:[%s3687_s9] ss:$0 sm:$0xff] }
 0xdf5   :  { %775 = vperm.xlu0 %2507, %v2583_v56  }
 0xdfc   :  { %700 = vrot.lane.b32.xlu1 %v693_v15, %s2827_s18 }
 0xe04   :  { %608 = vrot.lane.b32.xlu1 %v3152_v49, %s2827_s18 }
 0xe66   :  { %v773_v43 = vpop.permute.xlu1 %772 }
 0xe67   :  { %v776_v57 = vpop.permute.xlu0 %775  ;;  %v777_v58 = vperm.slane %v773_v43, %v2968_v21  ;;  %v788_v49 = vmul.f32 %v773_v43, %v3104_v28 }
 0xe68   :  { %v778_v59 = vperm.slane %v776_v57, %v2968_v21  ;;  %v789_v2 = vmul.f32 %v776_v57, %v3096_v26  ;;  %v870_v57 = vld [vmem:[#allocation5 + $0x4] sm:$0x3] }
 0xe69   :  { %v790_v4 = vsel %vm366_vm14, %v788_v49, 0.0 }
 0xe6a   :  { %v779_v60 = vsel %vm403_vm15, %v778_v59, %v777_v58  ;;  %v797_v3 = vsel %vm366_vm14, %v789_v2, 0.0  ;;  %v791_v6 = vrot.slane %v790_v4, 4 }
 0xe6b   :  { %v781_v61 = vsel %vm406_vm0, %v779_v60, 0.0  ;;  %v798_v5 = vrot.slane %v797_v3, 4  ;;  %v908_v60 = vld [vmem:[#allocation3] sm:$0x3] }
 0xe6c   :  { %782 = vadd.xlane.f32.xlu0 %v781_v61  ;;  %v792_v9 = vadd.f32 %v791_v6, %v790_v4 }
 0xe6d   :  { %v799_v8 = vadd.f32 %v798_v5, %v797_v3 }
 0xe6e   :  { %v701_v63 = vpop.permute.xlu1 %700  ;;  %v793_v13 = vrot.slane %v792_v9, 2 }
 0xe6f   :  { %703 = vst.msk [vmem:[#allocation2 + $0x2] sm:$0x3] %vm97_vm2, %v701_v63  ;;  %v800_v10 = vrot.slane %v799_v8, 2 }
 0xe70   :  { %v794_v17 = vadd.f32 %v793_v13, %v792_v9 }
 0xe71   :  { %v801_v15 = vadd.f32 %v800_v10, %v799_v8 }
 0xe72   :  { %v795_v23 = vrot.slane %v794_v17, 1 }
 0xe73   :  { %v802_v22 = vrot.slane %v801_v15, 1 }
 0xe74   :  { %v796_v31 = vadd.f32 %v795_v23, %v794_v17  ;;  %v2528_v23 = vld [vmem:[%s3687_s9 + $0x1] ss:$0 sm:$0xff] }
 0xe75   :  { %v803_v29 = vadd.f32 %v802_v22, %v801_v15 }
 0xe76   :  { %v609_v1 = vpop.permute.xlu1 %608 }
 0xe77   :  { %611 = vst.msk [vmem:[#allocation2] sm:$0x3] %vm97_vm2, %v609_v1 }
 0xedf   :  { %v783_v7 = vpop.xlane.xlu0 %782 }
 0xee0   :  { %2584 = vrcp.f32 %v783_v7  ;;  %v815_v24 = vand.u32 2147483648, %v783_v7  ;;  %v813_v19 = vand.u32 2147483647, %v783_v7  ;;  %vm809_vm8 = vweird.f32 %v783_v7 }
 0xee2   :  { %v816_v54 = vor.u32 1.1754944e-38, %v815_v24  ;;  %vm814_vm10 = vcmp.eq.f32.partialorder %v813_v19, 8.507059e+37 }
 0xee6   :  { %v2585_v11 = vpop.eup %2584 }
 0xee7   :  { %v805_v14 = vmul.f32 %v2585_v11, %v783_v7  ;;  %vm810_vm7 = vweird.f32 %v2585_v11 }
 0xee8   :  { %vm811_vm9 = vmor %vm809_vm8, %vm810_vm7 }
 0xee9   :  { %v806_v16 = vsub.f32 1.0, %v805_v14 }
 0xeeb   :  { %v807_v18 = vmul.f32 %v2585_v11, %v806_v16 }
 0xeed   :  { %v808_v62 = vadd.f32 %v2585_v11, %v807_v18 }
 0xeef   :  { %v812_v25 = vsel %vm811_vm9, %v2585_v11, %v808_v62 }
 0xef0   :  { %v817_v27 = vsel %vm814_vm10, %v816_v54, %v812_v25 }
 0xef1   :  { %v819_v30 = vrot.slane %v817_v27, 1  ;;  %v822_v34 = vmul.f32 %v817_v27, %v796_v31 }
 0xef3   :  { %v823_v32 = vmul.f32 %v819_v30, %v803_v29 }
 0xef5   :  { %v826_v35 = vrot.slane %v823_v32, 7 }
 0xef7   :  { %v827_v36 = vsel %vm403_vm15, %v826_v35, %v822_v34 }
 0xef8   :  { %829 = vst.msk [vmem:[#allocation4] sm:$0x3] %vm87_vm1, %v827_v36 }
 0xef9   :  { %830 = vst.msk [vmem:[#allocation4] sm:$0x3] %vm97_vm2, %v701_v63 }
 0xf00   :  { %v831_v37 = vld [vmem:[#allocation4] sm:$0x3] }
 0xf01   :  { %2435 = vmatmul.msk.f32.vlgmr.msrb.gmra.mxu2 %vm181_vm3, %v831_v37 }
 0xf84   :  { %v864_v50 = vpop.f32.mrf.mxu2 }
 0xf85   :  { %v865_v51 = vadd.f32 %v2526_v33, %v864_v50 }
 0xf87   :  { %2586 = vtanh.f32 %v865_v51 }
 0xf8d   :  { %v2587_v52 = vpop.eup %2586 }
 0xf8e   :  { %869 = vst.msk [vmem:[#allocation6 + $0x2] sm:$0x3] %vm87_vm1, %v2587_v52 }
 0xf8f   :  { %868 = vst.msk [vmem:[#allocation2] sm:$0x3] %vm87_vm1, %v2587_v52 }
 0xf96   :  { %v871_v53 = vld [vmem:[#allocation2] sm:$0x3] }
 0xf97   :  { %2436 = vmatmul.msk.f32.vlgmr.msrb.gmra.mxu3 %vm181_vm3, %v871_v53 }
0x101a   :  { %v904_v56 = vpop.f32.mrf.mxu3 }
0x101b   :  { %v905_v43 = vadd.f32 %v2527_v55, %v904_v56 }
0x101d   :  { %v907_v58 = vadd.f32 %v905_v43, %v870_v57 }
0x101f   :  { %2588 = vtanh.f32 %v907_v58  ;;  %v2437_v61 = vmul.f32 -1.442695, %v907_v58 }
0x1021   :  { %2590 = vpow2.f32 %v2437_v61 }
0x1025   :  { %v2589_v59 = vpop.eup %2588 }
0x1026   :  { %935 = vrot.lane.b32.xlu1 %v2589_v59, %s2827_s18  ;;  %v1071_v59 = vld [vmem:[%s3684_s6] sm:$0x3] }
0x1027   :  { %v2591_v63 = vpop.eup %2590  ;;  %v1080_v61 = vperm.slane %v1071_v59, 1 }
0x1028   :  { %v912_v1 = vadd.f32 1.0, %v2591_v63 }
0x102a   :  { %2592 = vrcp.f32 %v912_v1  ;;  %v924_v6 = vand.u32 2147483648, %v912_v1  ;;  %vm918_vm12 = vweird.f32 %v912_v1  ;;  %v922_v7 = vand.u32 2147483647, %v912_v1 }
0x102c   :  { %v925_v9 = vor.u32 1.1754944e-38, %v924_v6  ;;  %vm923_vm5 = vcmp.eq.f32.partialorder %v922_v7, 8.507059e+37 }
0x102e   :  { %930 = vrot.lane.b32.xlu1 %v908_v60, %s2825_s24  ;;  %v1073_v60 = vperm.slane %v1071_v59, 0 }
0x1030   :  { %v2593_v2 = vpop.eup %2592 }
0x1031   :  { %v914_v49 = vmul.f32 %v2593_v2, %v912_v1  ;;  %vm919_vm11 = vweird.f32 %v2593_v2 }
0x1032   :  { %vm920_vm13 = vmor %vm918_vm12, %vm919_vm11 }
0x1033   :  { %v915_v3 = vsub.f32 1.0, %v914_v49 }
0x1035   :  { %v916_v4 = vmul.f32 %v2593_v2, %v915_v3 }
0x1037   :  { %v917_v5 = vadd.f32 %v2593_v2, %v916_v4 }
0x1039   :  { %v921_v8 = vsel %vm920_vm13, %v2593_v2, %v917_v5 }
0x103a   :  { %v926_v11 = vsel %vm923_vm5, %v925_v9, %v921_v8 }
0x1098   :  { %v936_v10 = vpop.permute.xlu1 %935 }
0x1099   :  { %v938_v13 = vmul.f32 %v936_v10, %v926_v11 }
0x109b   :  { %940 = vrot.lane.b32.xlu1 %v938_v13, %s2825_s24 }
0x10a0   :  { %v931_v14 = vpop.permute.xlu1 %930 }
0x10a1   :  { %v933_v15 = vmul.f32 %v931_v14, %v926_v11 }
0x10a3   :  { %695 = vrot.lane.b32.xlu1 %v3163_v12, %s2828_s19 }
0x110d   :  { %v941_v16 = vpop.permute.xlu1 %940 }
0x110e   :  { %v3240_v24 = vadd.f32 %v941_v16, %v933_v15 }
0x1110   :  { %2594 = vtanh.f32 %v3240_v24 }
0x1115   :  { %v696_v17 = vpop.permute.xlu1 %695 }
0x1116   :  { %v2595_v18 = vpop.eup %2594  ;;  %698 = vst.msk [vmem:[#allocation3 + $0x2] sm:$0x3] %vm87_vm1, %v696_v17 }
0x1117   :  { %946 = vrot.lane.b32.xlu2 %v2595_v18, %s2827_s18 }
0x111d   :  { %v1000_v19 = vld [vmem:[#allocation3 + $0x2] sm:$0x3] }
0x111e   :  { %1022 = vrot.lane.b32.xlu1 %v1000_v19, %s2825_s24 }
0x1171   :  { %v947_v22 = vpop.permute.xlu2 %946 }
0x1172   :  { %v3246_v62 = vmul.f32 %v947_v22, %v926_v11 }
0x1174   :  { %960 = vrot.lane.b32.xlu0 %v3246_v62, %s2825_s24 }
0x1190   :  { %v1023_v33 = vpop.permute.xlu1 %1022 }
0x11e6   :  { %v961_v12 = vpop.permute.xlu0 %960 }
0x11e7   :  { %963 = vst.msk [vmem:[#allocation2 + $0x2] sm:$0x3] %vm87_vm1, %v961_v12 }
0x11ee   :  { %v964_v54 = vld [vmem:[#allocation2 + $0x2] sm:$0x3] }
0x11ef   :  { %2447 = vmatmul.msk.f32.vlgmr.msra.gmra.mxu0 %vm181_vm3, %v964_v54 }
0x126c   :  { %v997_v25 = vpop.f32.mrf.mxu0 }
0x126d   :  { %v998_v27 = vadd.f32 %v2528_v23, %v997_v25 }
0x126f   :  { %2596 = vtanh.f32 %v998_v27  ;;  %v2448_v30 = vmul.f32 -1.442695, %v998_v27 }
0x1271   :  { %2598 = vpow2.f32 %v2448_v30 }
0x1275   :  { %v2597_v29 = vpop.eup %2596 }
0x1276   :  { %1027 = vrot.lane.b32.xlu2 %v2597_v29, %s2827_s18 }
0x1277   :  { %v2599_v31 = vpop.eup %2598 }
0x1278   :  { %v1004_v32 = vadd.f32 1.0, %v2599_v31 }
0x127a   :  { %2600 = vrcp.f32 %v1004_v32  ;;  %v1016_v39 = vand.u32 2147483648, %v1004_v32  ;;  %vm1010_vm6 = vweird.f32 %v1004_v32  ;;  %v1014_v41 = vand.u32 2147483647, %v1004_v32 }
0x127c   :  { %v1017_v45 = vor.u32 1.1754944e-38, %v1016_v39  ;;  %vm1015_vm8 = vcmp.eq.f32.partialorder %v1014_v41, 8.507059e+37 }
0x1280   :  { %v2601_v34 = vpop.eup %2600 }
0x1281   :  { %v1006_v35 = vmul.f32 %v2601_v34, %v1004_v32  ;;  %vm1011_vm4 = vweird.f32 %v2601_v34 }
0x1282   :  { %vm1012_vm7 = vmor %vm1010_vm6, %vm1011_vm4 }
0x1283   :  { %v1007_v36 = vsub.f32 1.0, %v1006_v35 }
0x1285   :  { %v1008_v37 = vmul.f32 %v2601_v34, %v1007_v36 }
0x1287   :  { %v1009_v38 = vadd.f32 %v2601_v34, %v1008_v37 }
0x1289   :  { %v1013_v42 = vsel %vm1012_vm7, %v2601_v34, %v1009_v38 }
0x128a   :  { %v1018_v46 = vsel %vm1015_vm8, %v1017_v45, %v1013_v42 }
0x128b   :  { %v1025_v50 = vmul.f32 %v1023_v33, %v1018_v46 }
0x12d0   :  { %v1028_v20 = vpop.permute.xlu2 %1027 }
0x12d1   :  { %v1030_v48 = vmul.f32 %v1028_v20, %v1018_v46 }
0x12d3   :  { %1032 = vrot.lane.b32.xlu2 %v1030_v48, %s2825_s24 }
0x132d   :  { %v1033_v51 = vpop.permute.xlu2 %1032 }
0x132e   :  { %v3257_v52 = vadd.f32 %v1033_v51, %v1025_v50 }
0x1330   :  { %2602 = vtanh.f32 %v3257_v52 }
0x1336   :  { %v2603_v53 = vpop.eup %2602 }
0x1337   :  { %1038 = vrot.lane.b32.xlu1 %v2603_v53, %s2827_s18 }
0x13a9   :  { %v1039_v55 = vpop.permute.xlu1 %1038 }
0x13aa   :  { %v1041_v56 = vmul.f32 %v1039_v55, %v1018_v46 }
0x13ac   :  { %v1055_v43 = vperm.slane %v1041_v56, 0  ;;  %v1054_v57 = vrot.slane %v1041_v56, 1 }
0x13ae   :  { %1057 = vrot.lane.b32.xlu0 %v1055_v43, %s2825_s24  ;;  %v1056_v58 = vperm.slane %v1054_v57, 0 }
0x13b0   :  { %1059 = vrot.lane.b32.xlu2 %v1056_v58, %s2825_s24 }
0x13b8   :  { %1078 = vperm.xlu2 %2513, %v1073_v60  }
0x13c0   :  { %1085 = vperm.xlu2 %2513, %v1080_v61  }
0x13c8   :  { %2514 = vset.pattern.permute.xlu2 %v2824_v0 }
0x140a   :  { %v1060_v63 = vpop.permute.xlu2 %1059 }
0x140b   :  { %v1064_v1 = vmul.f32 %v1060_v63, %v3051_v44 }
0x140d   :  { %v1068_v2 = vsel %vm366_vm14, %v1064_v1, 0.0 }
0x140e   :  { %1069 = vadd.xlane.f32.xlu0 %v1068_v2 }
0x1412   :  { %v1079_v5 = vpop.permute.xlu2 %1078 }
0x141a   :  { %v1086_v9 = vpop.permute.xlu2 %1085 }
0x1420   :  { %v1058_v49 = vpop.permute.xlu0 %1057 }
0x1421   :  { %v1063_v3 = vmul.f32 %v1058_v49, %v3059_v47 }
0x1423   :  { %v1065_v4 = vsel %vm366_vm14, %v1063_v3, 0.0 }
0x1424   :  { %1066 = vadd.xlane.f32.xlu1 %v1065_v4 }
0x1481   :  { %v1070_v8 = vpop.xlane.xlu0 %1069 }
0x1482   :  { %v1090_v10 = vadd.f32 %v1086_v9, %v1070_v8  ;;  %v2529_v8 = vld [vmem:[%s3689_s11] ss:$0 sm:$0xff] }
0x1497   :  { %v1067_v6 = vpop.xlane.xlu1 %1066 }
0x1498   :  { %v1089_v7 = vadd.f32 %v1079_v5, %v1067_v6 }
0x149a   :  { %1094 = vperm.xlu2 %2514, %v1089_v7  }
0x14a2   :  { %1097 = vperm.xlu2 %2514, %v1090_v10  }
0x14f4   :  { %v1095_v44 = vpop.permute.xlu2 %1094 }
0x14f5   :  { %v1099_v13 = vperm.slane %v1095_v44, %v2968_v21 }
0x14fc   :  { %v1098_v11 = vpop.permute.xlu2 %1097 }
0x14fd   :  { %v1100_v14 = vperm.slane %v1098_v11, %v2968_v21 }
0x14ff   :  { %v1101_v15 = vsel %vm403_vm15, %v1100_v14, %v1099_v13  ;;  %v2530_v13 = vld [vmem:[%s3687_s9] ss:$0 sm:$0xff] }
0x1500   :  { %v1103_v47 = vsel %vm406_vm0, %v1101_v15, -inf }
0x1501   :  { %1104 = vmax.xlane.f32.xlu2 %v1103_v47  ;;  %v1218_v47 = vld [vmem:[#allocation5 + $0x6] sm:$0x3] }
0x1519   :  { %951 = vrot.lane.b32.xlu2 %v3240_v24, %s2828_s19 }
0x1574   :  { %v1105_v16 = vpop.xlane.xlu2 %1104 }
0x1575   :  { %v1107_v17 = vperm.slane %v1105_v16, 0  ;;  %v1108_v18 = vperm.slane %v1105_v16, 1 }
0x1577   :  { %v1111_v19 = vsub.f32 %v1089_v7, %v1107_v17  ;;  %v1112_v22 = vsub.f32 %v1090_v10, %v1108_v18 }
0x1579   :  { %v1113_v12 = vmul.f32 1.442695, %v1111_v19  ;;  %v1115_v54 = vmul.f32 1.442695, %v1112_v22 }
0x157b   :  { %2604 = vpow2.f32 %v1113_v12 }
0x157c   :  { %2606 = vpow2.f32 %v1115_v54  ;;  %v952_v23 = vpop.permute.xlu2 %951 }
0x157d   :  { %954 = vst.msk [vmem:[#allocation3] sm:$0x3] %vm87_vm1, %v952_v23 }
0x1581   :  { %v2605_v25 = vpop.eup %2604 }
0x1582   :  { %v2607_v27 = vpop.eup %2606  ;;  %1120 = vperm.xlu1 %2510, %v2605_v25  }
0x1583   :  { %1123 = vperm.xlu0 %2507, %v2607_v27  }
0x1584   :  { %v1256_v18 = vld [vmem:[#allocation3] sm:$0x3] }
0x158a   :  { %1048 = vrot.lane.b32.xlu1 %v1041_v56, %s2827_s18 }
0x158b   :  { %2515 = vset.pattern.permute.xlu0 %v3042_v40 }
0x1592   :  { %956 = vrot.lane.b32.xlu1 %v3246_v62, %s2827_s18 }
0x15f4   :  { %v1121_v24 = vpop.permute.xlu1 %1120 }
0x15f5   :  { %v1124_v29 = vpop.permute.xlu0 %1123  ;;  %v1125_v30 = vperm.slane %v1121_v24, %v2968_v21  ;;  %v1136_v62 = vmul.f32 %v1121_v24, %v3104_v28 }
0x15f6   :  { %v1126_v31 = vperm.slane %v1124_v29, %v2968_v21  ;;  %v1137_v37 = vmul.f32 %v1124_v29, %v3096_v26 }
0x15f7   :  { %v1138_v39 = vsel %vm366_vm14, %v1136_v62, 0.0 }
0x15f8   :  { %v1127_v32 = vsel %vm403_vm15, %v1126_v31, %v1125_v30  ;;  %v1145_v38 = vsel %vm366_vm14, %v1137_v37, 0.0  ;;  %v1139_v42 = vrot.slane %v1138_v39, 4 }
0x15f9   :  { %v1129_v34 = vsel %vm406_vm0, %v1127_v32, 0.0  ;;  %v1146_v41 = vrot.slane %v1145_v38, 4 }
0x15fa   :  { %1130 = vadd.xlane.f32.xlu0 %v1129_v34  ;;  %v1140_v46 = vadd.f32 %v1139_v42, %v1138_v39 }
0x15fb   :  { %v1147_v20 = vadd.f32 %v1146_v41, %v1145_v38 }
0x15fc   :  { %v1049_v35 = vpop.permute.xlu1 %1048  ;;  %v1141_v50 = vrot.slane %v1140_v46, 2 }
0x15fd   :  { %1051 = vst.msk [vmem:[#allocation2 + $0x2] sm:$0x3] %vm97_vm2, %v1049_v35  ;;  %v1148_v48 = vrot.slane %v1147_v20, 2 }
0x15fe   :  { %v1142_v26 = vadd.f32 %v1141_v50, %v1140_v46  ;;  %v2456_v50 = vld [vmem:[%s3686_s8 + $0x60] sm:$0xff] }
0x15ff   :  { %v1149_v53 = vadd.f32 %v1148_v48, %v1147_v20  ;;  %v2458_v20 = vld [vmem:[%s3686_s8 + $0x70] sm:$0xff] }
0x1600   :  { %v1143_v60 = vrot.slane %v1142_v26, 1 }
0x1601   :  { %v1150_v57 = vrot.slane %v1149_v53, 1 }
0x1602   :  { %v1144_v49 = vadd.f32 %v1143_v60, %v1142_v26 }
0x1603   :  { %v1151_v1 = vadd.f32 %v1150_v57, %v1149_v53  ;;  %v2454_v53 = vld [vmem:[%s3686_s8 + $0x50] sm:$0xff] }
0x1604   :  { %v957_v36 = vpop.permute.xlu1 %956 }
0x1605   :  { %959 = vst.msk [vmem:[#allocation2] sm:$0x3] %vm97_vm2, %v957_v36 }
0x166d   :  { %v1131_v45 = vpop.xlane.xlu0 %1130 }
0x166e   :  { %2608 = vrcp.f32 %v1131_v45  ;;  %v1163_v56 = vand.u32 2147483648, %v1131_v45  ;;  %v1161_v28 = vand.u32 2147483647, %v1131_v45  ;;  %vm1157_vm10 = vweird.f32 %v1131_v45 }
0x1670   :  { %v1164_v59 = vor.u32 1.1754944e-38, %v1163_v56  ;;  %vm1162_vm12 = vcmp.eq.f32.partialorder %v1161_v28, 8.507059e+37  ;;  %v2452_v56 = vld [vmem:[%s3686_s8 + $0x40] sm:$0xff] }
0x1671   :  { %v2531_v28 = vld [vmem:[%s3687_s9 + $0x1] ss:$0 sm:$0xff] }
0x1674   :  { %v2609_v33 = vpop.eup %2608 }
0x1675   :  { %v1153_v51 = vmul.f32 %v2609_v33, %v1131_v45  ;;  %vm1158_vm9 = vweird.f32 %v2609_v33 }
0x1676   :  { %vm1159_vm11 = vmor %vm1157_vm10, %vm1158_vm9 }
0x1677   :  { %v1154_v55 = vsub.f32 1.0, %v1153_v51  ;;  %v2455_v51 = vld [vmem:[%s3686_s8 + $0x58] sm:$0xff] }
0x1679   :  { %v1155_v43 = vmul.f32 %v2609_v33, %v1154_v55  ;;  %v2453_v55 = vld [vmem:[%s3686_s8 + $0x48] sm:$0xff] }
0x167b   :  { %v1156_v58 = vadd.f32 %v2609_v33, %v1155_v43 }
0x167d   :  { %v1160_v61 = vsel %vm1159_vm11, %v2609_v33, %v1156_v58  ;;  %v2457_v33 = vld [vmem:[%s3686_s8 + $0x68] sm:$0xff] }
0x167e   :  { %v1165_v63 = vsel %vm1162_vm12, %v1164_v59, %v1160_v61 }
0x167f   :  { %v1167_v2 = vrot.slane %v1165_v63, 1  ;;  %v1170_v4 = vmul.f32 %v1165_v63, %v1144_v49 }
0x1681   :  { %v1171_v3 = vmul.f32 %v1167_v2, %v1151_v1 }
0x1683   :  { %v1174_v5 = vrot.slane %v1171_v3, 7 }
0x1685   :  { %v1175_v6 = vsel %vm403_vm15, %v1174_v5, %v1170_v4 }
0x1686   :  { %1177 = vst.msk [vmem:[#allocation4] sm:$0x3] %vm87_vm1, %v1175_v6 }
0x1687   :  { %1178 = vst.msk [vmem:[#allocation4] sm:$0x3] %vm97_vm2, %v1049_v35 }
0x168e   :  { %v1179_v7 = vld [vmem:[#allocation4] sm:$0x3] }
0x168f   :  { %2449 = vmatmul.msk.f32.vlgmr.msra.gmra.mxu1 %vm181_vm3, %v1179_v7 }
0x170c   :  { %v1212_v9 = vpop.f32.mrf.mxu1 }
0x170d   :  { %v1213_v10 = vadd.f32 %v2529_v8, %v1212_v9 }
0x170f   :  { %2610 = vtanh.f32 %v1213_v10 }
0x1715   :  { %v2611_v44 = vpop.eup %2610 }
0x1716   :  { %1217 = vst.msk [vmem:[#allocation6 + $0x4] sm:$0x3] %vm87_vm1, %v2611_v44 }
0x1717   :  { %1216 = vst.msk [vmem:[#allocation2] sm:$0x3] %vm87_vm1, %v2611_v44 }
0x171e   :  { %v1219_v11 = vld [vmem:[#allocation2] sm:$0x3] }
0x171f   :  { %2450 = vmatmul.msk.f32.vlgmr.msra.gmra.mxu2 %vm181_vm3, %v1219_v11 }
0x17a2   :  { %v1252_v14 = vpop.f32.mrf.mxu2 }
0x17a3   :  { %v1253_v15 = vadd.f32 %v2530_v13, %v1252_v14 }
0x17a5   :  { %v1255_v16 = vadd.f32 %v1253_v15, %v1218_v47 }
0x17a7   :  { %2612 = vtanh.f32 %v1255_v16  ;;  %v2451_v19 = vmul.f32 -1.442695, %v1255_v16 }
0x17a9   :  { %2614 = vpow2.f32 %v2451_v19 }
0x17ad   :  { %v2613_v17 = vpop.eup %2612 }
0x17ae   :  { %1283 = vrot.lane.b32.xlu1 %v2613_v17, %s2827_s18 }
0x17af   :  { %v2615_v22 = vpop.eup %2614 }
0x17b0   :  { %v1260_v12 = vadd.f32 1.0, %v2615_v22 }
0x17b2   :  { %2616 = vrcp.f32 %v1260_v12  ;;  %v1272_v29 = vand.u32 2147483648, %v1260_v12  ;;  %vm1266_vm5 = vweird.f32 %v1260_v12  ;;  %v1270_v30 = vand.u32 2147483647, %v1260_v12 }
0x17b4   :  { %v1273_v32 = vor.u32 1.1754944e-38, %v1272_v29  ;;  %vm1271_vm6 = vcmp.eq.f32.partialorder %v1270_v30, 8.507059e+37  ;;  %v3371_v30 = vld [vmem:[%s3683_s5 + $0x8] sm:$0xff] }
0x17b6   :  { %1278 = vrot.lane.b32.xlu1 %v1256_v18, %s2825_s24 }
0x17b8   :  { %v2617_v54 = vpop.eup %2616 }
0x17b9   :  { %v1262_v23 = vmul.f32 %v2617_v54, %v1260_v12  ;;  %vm1267_vm13 = vweird.f32 %v2617_v54  ;;  %v1419_v12 = vld [vmem:[%s3684_s6] sm:$0x3] }
0x17ba   :  { %vm1268_vm4 = vmor %vm1266_vm5, %vm1267_vm13 }
0x17bb   :  { %v1263_v25 = vsub.f32 1.0, %v1262_v23  ;;  %v1428_v23 = vperm.slane %v1419_v12, 1 }
0x17bd   :  { %v1264_v27 = vmul.f32 %v2617_v54, %v1263_v25  ;;  %v3364_v25 = vld [vmem:[%s3683_s5] sm:$0xff] }
0x17bf   :  { %v1265_v24 = vadd.f32 %v2617_v54, %v1264_v27 }
0x17c1   :  { %v1269_v31 = vsel %vm1268_vm4, %v2617_v54, %v1265_v24  ;;  %v1421_v54 = vperm.slane %v1419_v12, 0 }
0x17c2   :  { %v1274_v35 = vsel %vm1271_vm6, %v1273_v32, %v1269_v31 }
0x1820   :  { %v1284_v34 = vpop.permute.xlu1 %1283 }
0x1821   :  { %v1286_v36 = vmul.f32 %v1284_v34, %v1274_v35 }
0x1823   :  { %1288 = vrot.lane.b32.xlu1 %v1286_v36, %s2825_s24 }
0x1828   :  { %v1279_v37 = vpop.permute.xlu1 %1278 }
0x1829   :  { %v1281_v62 = vmul.f32 %v1279_v37, %v1274_v35 }
0x182b   :  { %1043 = vrot.lane.b32.xlu1 %v3257_v52, %s2828_s19  ;;  %v2459_v52 = vld [vmem:[%s3686_s8 + $0x78] sm:$0xff] }
0x182c   :  { %1336 = vmatpush.msra.mxu3 %v2459_v52  ;;  %1684 = vmatpush.msrb.mxu2 %v2459_v52 }
0x182d   :  { %2032 = vmatpush.msra.mxu1 %v2459_v52 }
0x182e   :  { %1337 = vmatpush.msra.mxu3 %v2458_v20  ;;  %1685 = vmatpush.msrb.mxu2 %v2458_v20 }
0x182f   :  { %2033 = vmatpush.msra.mxu1 %v2458_v20 }
0x1830   :  { %1338 = vmatpush.msra.mxu3 %v2457_v33  ;;  %1686 = vmatpush.msrb.mxu2 %v2457_v33 }
0x1831   :  { %2034 = vmatpush.msra.mxu1 %v2457_v33 }
0x1832   :  { %1339 = vmatpush.msra.mxu3 %v2456_v50  ;;  %1687 = vmatpush.msrb.mxu2 %v2456_v50 }
0x1833   :  { %2035 = vmatpush.msra.mxu1 %v2456_v50 }
0x1834   :  { %1340 = vmatpush.msra.mxu3 %v2455_v51  ;;  %1688 = vmatpush.msrb.mxu2 %v2455_v51 }
0x1835   :  { %2036 = vmatpush.msra.mxu1 %v2455_v51 }
0x1836   :  { %1341 = vmatpush.msra.mxu3 %v2454_v53  ;;  %1689 = vmatpush.msrb.mxu2 %v2454_v53 }
0x1837   :  { %2037 = vmatpush.msra.mxu1 %v2454_v53 }
0x1838   :  { %1342 = vmatpush.msra.mxu3 %v2453_v55  ;;  %1690 = vmatpush.msrb.mxu2 %v2453_v55 }
0x1839   :  { %2038 = vmatpush.msra.mxu1 %v2453_v55 }
0x183a   :  { %1343 = vmatpush.msra.mxu3 %v2452_v56  ;;  %1691 = vmatpush.msrb.mxu2 %v2452_v56 }
0x183b   :  { %2039 = vmatpush.msra.mxu1 %v2452_v56 }
0x1895   :  { %v1289_v38 = vpop.permute.xlu1 %1288 }
0x1896   :  { %v3310_v39 = vadd.f32 %v1289_v38, %v1281_v62 }
0x1898   :  { %2618 = vtanh.f32 %v3310_v39 }
0x189d   :  { %v1044_v41 = vpop.permute.xlu1 %1043 }
0x189e   :  { %v2619_v42 = vpop.eup %2618  ;;  %1046 = vst.msk [vmem:[#allocation3 + $0x2] sm:$0x3] %vm87_vm1, %v1044_v41 }
0x189f   :  { %1294 = vrot.lane.b32.xlu2 %v2619_v42, %s2827_s18 }
0x18a5   :  { %v1348_v45 = vld [vmem:[#allocation3 + $0x2] sm:$0x3] }
0x18a6   :  { %1370 = vrot.lane.b32.xlu1 %v1348_v45, %s2825_s24 }
0x18f9   :  { %v1295_v46 = vpop.permute.xlu2 %1294 }
0x18fa   :  { %v3322_v48 = vmul.f32 %v1295_v46, %v1274_v35 }
0x18fc   :  { %1308 = vrot.lane.b32.xlu0 %v3322_v48, %s2825_s24 }
0x1918   :  { %v1371_v11 = vpop.permute.xlu1 %1370 }
0x196e   :  { %v1309_v26 = vpop.permute.xlu0 %1308 }
0x196f   :  { %1311 = vst.msk [vmem:[#allocation2 + $0x2] sm:$0x3] %vm87_vm1, %v1309_v26 }
0x1976   :  { %v1312_v43 = vld [vmem:[#allocation2 + $0x2] sm:$0x3] }
0x1977   :  { %2461 = vmatmul.msk.f32.vlgmr.msra.gmra.mxu3 %vm181_vm3, %v1312_v43 }
0x19fa   :  { %v1345_v57 = vpop.f32.mrf.mxu3 }
0x19fb   :  { %v1346_v58 = vadd.f32 %v2531_v28, %v1345_v57 }
0x19fd   :  { %2620 = vtanh.f32 %v1346_v58  ;;  %v2462_v60 = vmul.f32 -1.442695, %v1346_v58 }
0x19ff   :  { %2622 = vpow2.f32 %v2462_v60 }
0x1a03   :  { %v2621_v59 = vpop.eup %2620 }
0x1a04   :  { %1375 = vrot.lane.b32.xlu2 %v2621_v59, %s2827_s18 }
0x1a05   :  { %v2623_v61 = vpop.eup %2622 }
0x1a06   :  { %v1352_v63 = vadd.f32 1.0, %v2623_v61 }
0x1a08   :  { %2624 = vrcp.f32 %v1352_v63  ;;  %v1364_v5 = vand.u32 2147483648, %v1352_v63  ;;  %vm1358_vm8 = vweird.f32 %v1352_v63  ;;  %v1362_v6 = vand.u32 2147483647, %v1352_v63 }
0x1a0a   :  { %v1365_v8 = vor.u32 1.1754944e-38, %v1364_v5  ;;  %vm1363_vm10 = vcmp.eq.f32.partialorder %v1362_v6, 8.507059e+37  ;;  %v3409_v5 = vld [vmem:[%s3682_s4] sm:$0xff]  ;;  %v1533_v6 = vld [vmem:[%s3688_s10 + $0x28] sm:$0xff] }
0x1a0e   :  { %v2625_v1 = vpop.eup %2624 }
0x1a0f   :  { %v1354_v2 = vmul.f32 %v2625_v1, %v1352_v63  ;;  %vm1359_vm7 = vweird.f32 %v2625_v1 }
0x1a10   :  { %vm1360_vm9 = vmor %vm1358_vm8, %vm1359_vm7 }
0x1a11   :  { %v1355_v49 = vsub.f32 1.0, %v1354_v2 }
0x1a13   :  { %v1356_v3 = vmul.f32 %v2625_v1, %v1355_v49 }
0x1a15   :  { %v1357_v4 = vadd.f32 %v2625_v1, %v1356_v3  ;;  %v3401_v3 = vld [vmem:[%s3682_s4 + $0x8] sm:$0xff]  ;;  %s2364_s4 = sshll.u32 %s3694_s16, 4  ;;  %s2377_s16 = sshll.u32 %s3695_s17, 4  ;;  %s2365_s4 = int_to_ptr.hbm [resolvable:$true] %s2364_s4  ;;  %s2378_s16 = int_to_ptr.hbm [resolvable:$true] %s2377_s16 }
0x1a17   :  { %v1361_v7 = vsel %vm1360_vm9, %v2625_v1, %v1357_v4  ;;  %v1534_v4 = vld [vmem:[%s3688_s10 + $0x30] sm:$0xff] }
0x1a18   :  { %v1366_v10 = vsel %vm1363_vm10, %v1365_v8, %v1361_v7  ;;  %v1532_v8 = vld [vmem:[%s3688_s10 + $0x20] sm:$0xff] }
0x1a19   :  { %v1373_v13 = vmul.f32 %v1371_v11, %v1366_v10 }
0x1a5e   :  { %v1376_v9 = vpop.permute.xlu2 %1375 }
0x1a5f   :  { %v1378_v44 = vmul.f32 %v1376_v9, %v1366_v10 }
0x1a61   :  { %1380 = vrot.lane.b32.xlu2 %v1378_v44, %s2825_s24  ;;  %v1530_v44 = vld [vmem:[%s3688_s10 + $0x10] sm:$0xff] }
0x1abb   :  { %v1381_v14 = vpop.permute.xlu2 %1380 }
0x1abc   :  { %v3351_v15 = vadd.f32 %v1381_v14, %v1373_v13  ;;  %v1529_v13 = vld [vmem:[%s3688_s10 + $0x8] sm:$0xff] }
0x1abe   :  { %2626 = vtanh.f32 %v3351_v15 }
0x1ac4   :  { %v2627_v47 = vpop.eup %2626 }
0x1ac5   :  { %1386 = vrot.lane.b32.xlu1 %v2627_v47, %s2827_s18 }
0x1b37   :  { %v1387_v16 = vpop.permute.xlu1 %1386 }
0x1b38   :  { %v1389_v17 = vmul.f32 %v1387_v16, %v1366_v10  ;;  %v1531_v10 = vld [vmem:[%s3688_s10 + $0x18] sm:$0xff]  ;;  %v1528_v16 = vld [vmem:[%s3688_s10] sm:$0xff] }
0x1b3a   :  { %v1403_v18 = vperm.slane %v1389_v17, 0  ;;  %v1402_v19 = vrot.slane %v1389_v17, 1 }
0x1b3c   :  { %1405 = vrot.lane.b32.xlu2 %v1403_v18, %s2825_s24  ;;  %v1404_v22 = vperm.slane %v1402_v19, 0 }
0x1b3e   :  { %1407 = vrot.lane.b32.xlu0 %v1404_v22, %s2825_s24 }
0x1b46   :  { %1426 = vperm.xlu0 %2515, %v1421_v54  }
0x1b4e   :  { %1433 = vperm.xlu0 %2515, %v1428_v23  }
0x1b56   :  { %2516 = vset.pattern.permute.xlu0 %v2824_v0 }
0x1b96   :  { %v1406_v27 = vpop.permute.xlu2 %1405 }
0x1b97   :  { %v1411_v24 = vmul.f32 %v1406_v27, %v3364_v25 }
0x1b99   :  { %v1413_v29 = vsel %vm366_vm14, %v1411_v24, 0.0 }
0x1b9a   :  { %1414 = vadd.xlane.f32.xlu1 %v1413_v29 }
0x1bb0   :  { %v1408_v31 = vpop.permute.xlu0 %1407 }
0x1bb1   :  { %v1412_v32 = vmul.f32 %v1408_v31, %v3371_v30 }
0x1bb3   :  { %v1416_v34 = vsel %vm366_vm14, %v1412_v32, 0.0 }
0x1bb4   :  { %1417 = vadd.xlane.f32.xlu2 %v1416_v34 }
0x1bb8   :  { %v1427_v35 = vpop.permute.xlu0 %1426 }
0x1bc0   :  { %v1434_v62 = vpop.permute.xlu0 %1433 }
0x1c0d   :  { %v1415_v36 = vpop.xlane.xlu1 %1414 }
0x1c0e   :  { %v1437_v37 = vadd.f32 %v1427_v35, %v1415_v36 }
0x1c10   :  { %1442 = vperm.xlu0 %2516, %v1437_v37  }
0x1c27   :  { %v1418_v38 = vpop.xlane.xlu2 %1417 }
0x1c28   :  { %v1438_v41 = vadd.f32 %v1434_v62, %v1418_v38 }
0x1c2a   :  { %1445 = vperm.xlu1 %2510, %v1438_v41  }
0x1c82   :  { %v1443_v42 = vpop.permute.xlu0 %1442 }
0x1c83   :  { %v1447_v52 = vperm.slane %v1443_v42, %v2968_v21 }
0x1c9c   :  { %v1446_v45 = vpop.permute.xlu1 %1445 }
0x1c9d   :  { %v1448_v20 = vperm.slane %v1446_v45, %v2968_v21 }
0x1c9f   :  { %v1449_v46 = vsel %vm403_vm15, %v1448_v20, %v1447_v52 }
0x1ca0   :  { %v1451_v33 = vsel %vm406_vm0, %v1449_v46, -inf }
0x1ca1   :  { %1452 = vmax.xlane.f32.xlu0 %v1451_v33 }
0x1cb5   :  { %1299 = vrot.lane.b32.xlu0 %v3310_v39, %s2828_s19 }
0x1d14   :  { %v1453_v50 = vpop.xlane.xlu0 %1452 }
0x1d15   :  { %v1455_v51 = vperm.slane %v1453_v50, 0  ;;  %v1456_v53 = vperm.slane %v1453_v50, 1 }
0x1d17   :  { %v1459_v55 = vsub.f32 %v1437_v37, %v1455_v51  ;;  %v1460_v56 = vsub.f32 %v1438_v41, %v1456_v53 }
0x1d19   :  { %v1461_v26 = vmul.f32 1.442695, %v1459_v55  ;;  %v1463_v43 = vmul.f32 1.442695, %v1460_v56  ;;  %v2532_v55 = vld [vmem:[%s3689_s11] ss:$0 sm:$0xff] }
0x1d1b   :  { %2628 = vpow2.f32 %v1461_v26 }
0x1d1c   :  { %2630 = vpow2.f32 %v1463_v43 }
0x1d21   :  { %v2629_v28 = vpop.eup %2628 }
0x1d22   :  { %v2631_v57 = vpop.eup %2630  ;;  %1468 = vperm.xlu2 %2514, %v2629_v28  }
0x1d23   :  { %1471 = vperm.xlu1 %2510, %v2631_v57   ;;  %v2533_v57 = vld [vmem:[%s3687_s9] ss:$0 sm:$0xff] }
0x1d27   :  { %v1300_v58 = vpop.permute.xlu0 %1299 }
0x1d28   :  { %1302 = vst.msk [vmem:[#allocation3] sm:$0x3] %vm87_vm1, %v1300_v58 }
0x1d2a   :  { %2517 = vset.pattern.permute.xlu2 %v3042_v40 }
0x1d2b   :  { %1396 = vrot.lane.b32.xlu1 %v1389_v17, %s2827_s18 }
0x1d33   :  { %1304 = vrot.lane.b32.xlu1 %v3322_v48, %s2827_s18  ;;  %v1535_v48 = vld [vmem:[%s3688_s10 + $0x38] sm:$0xff] }
0x1d34   :  { %1551 = vmatpush.msrb.mxu0 %v1535_v48  ;;  %1899 = vmatpush.msrb.mxu3 %v1535_v48 }
0x1d36   :  { %1552 = vmatpush.msrb.mxu0 %v1534_v4  ;;  %1900 = vmatpush.msrb.mxu3 %v1534_v4 }
0x1d38   :  { %1553 = vmatpush.msrb.mxu0 %v1533_v6  ;;  %1901 = vmatpush.msrb.mxu3 %v1533_v6 }
0x1d3a   :  { %1554 = vmatpush.msrb.mxu0 %v1532_v8  ;;  %1902 = vmatpush.msrb.mxu3 %v1532_v8 }
0x1d3c   :  { %1555 = vmatpush.msrb.mxu0 %v1531_v10  ;;  %1903 = vmatpush.msrb.mxu3 %v1531_v10 }
0x1d3e   :  { %1556 = vmatpush.msrb.mxu0 %v1530_v44  ;;  %1904 = vmatpush.msrb.mxu3 %v1530_v44 }
0x1d40   :  { %1557 = vmatpush.msrb.mxu0 %v1529_v13  ;;  %1905 = vmatpush.msrb.mxu3 %v1529_v13 }
0x1d42   :  { %1558 = vmatpush.msrb.mxu0 %v1528_v16  ;;  %1906 = vmatpush.msrb.mxu3 %v1528_v16 }
0x1d7c   :  { %v1469_v39 = vpop.permute.xlu2 %1468 }
0x1d7d   :  { %v1473_v60 = vperm.slane %v1469_v39, %v2968_v21  ;;  %v1484_v9 = vmul.f32 %v3409_v5, %v1469_v39 }
0x1d7f   :  { %v1486_v14 = vsel %vm366_vm14, %v1484_v9, 0.0 }
0x1d80   :  { %v1487_v17 = vrot.slane %v1486_v14, 4 }
0x1d82   :  { %v1488_v22 = vadd.f32 %v1487_v17, %v1486_v14 }
0x1d84   :  { %v1489_v23 = vrot.slane %v1488_v22, 2 }
0x1d86   :  { %v1490_v32 = vadd.f32 %v1489_v23, %v1488_v22 }
0x1d88   :  { %v1491_v38 = vrot.slane %v1490_v32, 1 }
0x1d8a   :  { %v1492_v20 = vadd.f32 %v1491_v38, %v1490_v32 }
0x1d95   :  { %v1472_v59 = vpop.permute.xlu1 %1471 }
0x1d96   :  { %v1474_v61 = vperm.slane %v1472_v59, %v2968_v21  ;;  %v1485_v7 = vmul.f32 %v3401_v3, %v1472_v59  ;;  %v1566_v59 = vld [vmem:[#allocation5 + $0x8] sm:$0x3] }
0x1d98   :  { %v1475_v63 = vsel %vm403_vm15, %v1474_v61, %v1473_v60  ;;  %v1493_v11 = vsel %vm366_vm14, %v1485_v7, 0.0 }
0x1d99   :  { %v1477_v1 = vsel %vm406_vm0, %v1475_v63, 0.0  ;;  %v1494_v47 = vrot.slane %v1493_v11, 4  ;;  %v1604_v63 = vld [vmem:[#allocation3] sm:$0x3] }
0x1d9a   :  { %1478 = vadd.xlane.f32.xlu2 %v1477_v1 }
0x1d9b   :  { %v1495_v19 = vadd.f32 %v1494_v47, %v1493_v11 }
0x1d9d   :  { %v3390_v2 = vpop.permute.xlu1 %1396  ;;  %v1496_v12 = vrot.slane %v1495_v19, 2 }
0x1d9e   :  { %1399 = vst.msk [vmem:[#allocation2 + $0x2] sm:$0x3] %vm97_vm2, %v3390_v2 }
0x1d9f   :  { %v1497_v24 = vadd.f32 %v1496_v12, %v1495_v19 }
0x1da1   :  { %v1498_v36 = vrot.slane %v1497_v24, 1 }
0x1da3   :  { %v1499_v45 = vadd.f32 %v1498_v36, %v1497_v24 }
0x1da5   :  { %v1305_v49 = vpop.permute.xlu1 %1304 }
0x1da6   :  { %1307 = vst.msk [vmem:[#allocation2] sm:$0x3] %vm97_vm2, %v1305_v49 }
0x1e0d   :  { %v1479_v18 = vpop.xlane.xlu2 %1478 }
0x1e0e   :  { %2632 = vrcp.f32 %v1479_v18  ;;  %v1511_v31 = vand.u32 2147483648, %v1479_v18  ;;  %v1509_v35 = vand.u32 2147483647, %v1479_v18  ;;  %vm1505_vm12 = vweird.f32 %v1479_v18 }
0x1e10   :  { %v1512_v62 = vor.u32 1.1754944e-38, %v1511_v31  ;;  %vm1510_vm5 = vcmp.eq.f32.partialorder %v1509_v35, 8.507059e+37 }
0x1e14   :  { %v2633_v54 = vpop.eup %2632 }
0x1e15   :  { %v1501_v27 = vmul.f32 %v2633_v54, %v1479_v18  ;;  %vm1506_vm11 = vweird.f32 %v2633_v54 }
0x1e16   :  { %vm1507_vm13 = vmor %vm1505_vm12, %vm1506_vm11 }
0x1e17   :  { %v1502_v29 = vsub.f32 1.0, %v1501_v27 }
0x1e19   :  { %v1503_v34 = vmul.f32 %v2633_v54, %v1502_v29  ;;  %v2534_v29 = vld [vmem:[%s3687_s9 + $0x1] ss:$0 sm:$0xff] }
0x1e1b   :  { %v1504_v37 = vadd.f32 %v2633_v54, %v1503_v34 }
0x1e1d   :  { %v1508_v41 = vsel %vm1507_vm13, %v2633_v54, %v1504_v37 }
0x1e1e   :  { %v1513_v42 = vsel %vm1510_vm5, %v1512_v62, %v1508_v41 }
0x1e1f   :  { %v1515_v52 = vrot.slane %v1513_v42, 1  ;;  %v1518_v33 = vmul.f32 %v1513_v42, %v1492_v20 }
0x1e21   :  { %v1519_v46 = vmul.f32 %v1515_v52, %v1499_v45 }
0x1e23   :  { %v1522_v50 = vrot.slane %v1519_v46, 7 }
0x1e25   :  { %v1523_v51 = vsel %vm403_vm15, %v1522_v50, %v1518_v33 }
0x1e26   :  { %1525 = vst.msk [vmem:[#allocation4] sm:$0x3] %vm87_vm1, %v1523_v51 }
0x1e27   :  { %1526 = vst.msk [vmem:[#allocation4] sm:$0x3] %vm97_vm2, %v3390_v2 }
0x1e2e   :  { %v1527_v53 = vld [vmem:[#allocation4] sm:$0x3] }
0x1e2f   :  { %2463 = vmatmul.msk.f32.vlgmr.msrb.gmra.mxu0 %vm181_vm3, %v1527_v53 }
0x1eac   :  { %v1560_v56 = vpop.f32.mrf.mxu0 }
0x1ead   :  { %v1561_v26 = vadd.f32 %v2532_v55, %v1560_v56 }
0x1eaf   :  { %2634 = vtanh.f32 %v1561_v26 }
0x1eb5   :  { %v2635_v43 = vpop.eup %2634 }
0x1eb6   :  { %1565 = vst.msk [vmem:[#allocation6 + $0x6] sm:$0x3] %vm87_vm1, %v2635_v43 }
0x1eb7   :  { %1564 = vst.msk [vmem:[#allocation2] sm:$0x3] %vm87_vm1, %v2635_v43 }
0x1ebe   :  { %v1567_v28 = vld [vmem:[#allocation2] sm:$0x3] }
0x1ebf   :  { %2464 = vmatmul.msk.f32.vlgmr.msrb.gmra.mxu1 %vm181_vm3, %v1567_v28 }
0x1f3c   :  { %v1600_v58 = vpop.f32.mrf.mxu1 }
0x1f3d   :  { %v1601_v39 = vadd.f32 %v2533_v57, %v1600_v58 }
0x1f3f   :  { %v1603_v60 = vadd.f32 %v1601_v39, %v1566_v59 }
0x1f41   :  { %2636 = vtanh.f32 %v1603_v60  ;;  %v2465_v1 = vmul.f32 -1.442695, %v1603_v60 }
0x1f43   :  { %2638 = vpow2.f32 %v2465_v1 }
0x1f47   :  { %v2637_v61 = vpop.eup %2636 }
0x1f48   :  { %1631 = vrot.lane.b32.xlu1 %v2637_v61, %s2827_s18  ;;  %v1767_v61 = vld [vmem:[%s3684_s6] sm:$0x3] }
0x1f49   :  { %v2639_v2 = vpop.eup %2638  ;;  %v1776_v1 = vperm.slane %v1767_v61, 1 }
0x1f4a   :  { %v1608_v49 = vadd.f32 1.0, %v2639_v2 }
0x1f4c   :  { %2640 = vrcp.f32 %v1608_v49  ;;  %v1620_v9 = vand.u32 2147483648, %v1608_v49  ;;  %vm1614_vm6 = vweird.f32 %v1608_v49  ;;  %v1618_v10 = vand.u32 2147483647, %v1608_v49 }
0x1f4e   :  { %v1621_v11 = vor.u32 1.1754944e-38, %v1620_v9  ;;  %vm1619_vm8 = vcmp.eq.f32.partialorder %v1618_v10, 8.507059e+37 }
0x1f50   :  { %1626 = vrot.lane.b32.xlu1 %v1604_v63, %s2825_s24  ;;  %v1769_v63 = vperm.slane %v1767_v61, 0 }
0x1f52   :  { %v2641_v48 = vpop.eup %2640 }
0x1f53   :  { %v1610_v4 = vmul.f32 %v2641_v48, %v1608_v49  ;;  %vm1615_vm4 = vweird.f32 %v2641_v48 }
0x1f54   :  { %vm1616_vm7 = vmor %vm1614_vm6, %vm1615_vm4 }
0x1f55   :  { %v1611_v6 = vsub.f32 1.0, %v1610_v4 }
0x1f57   :  { %v1612_v7 = vmul.f32 %v2641_v48, %v1611_v6 }
0x1f59   :  { %v1613_v8 = vadd.f32 %v2641_v48, %v1612_v7 }
0x1f5b   :  { %v1617_v44 = vsel %vm1616_vm7, %v2641_v48, %v1613_v8 }
0x1f5c   :  { %v1622_v14 = vsel %vm1619_vm8, %v1621_v11, %v1617_v44 }
0x1fba   :  { %v1632_v13 = vpop.permute.xlu1 %1631 }
0x1fbb   :  { %v1634_v47 = vmul.f32 %v1632_v13, %v1622_v14 }
0x1fbd   :  { %1636 = vrot.lane.b32.xlu0 %v1634_v47, %s2825_s24 }
0x1fc2   :  { %v1627_v16 = vpop.permute.xlu1 %1626 }
0x1fc3   :  { %v1629_v17 = vmul.f32 %v1627_v16, %v1622_v14 }
0x1fc5   :  { %1391 = vrot.lane.b32.xlu0 %v3351_v15, %s2828_s19 }
0x202f   :  { %v1637_v18 = vpop.permute.xlu0 %1636 }
0x2030   :  { %v3452_v19 = vadd.f32 %v1637_v18, %v1629_v17 }
0x2032   :  { %2642 = vtanh.f32 %v3452_v19 }
0x2037   :  { %v1392_v22 = vpop.permute.xlu0 %1391 }
0x2038   :  { %v2643_v12 = vpop.eup %2642  ;;  %1394 = vst.msk [vmem:[#allocation3 + $0x2] sm:$0x3] %vm87_vm1, %v1392_v22 }
0x2039   :  { %1642 = vrot.lane.b32.xlu1 %v2643_v12, %s2827_s18 }
0x203f   :  { %v1696_v54 = vld [vmem:[#allocation3 + $0x2] sm:$0x3] }
0x2040   :  { %1718 = vrot.lane.b32.xlu0 %v1696_v54, %s2825_s24 }
0x20ab   :  { %v1643_v23 = vpop.permute.xlu1 %1642 }
0x20ac   :  { %v3458_v27 = vmul.f32 %v1643_v23, %v1622_v14 }
0x20ae   :  { %1656 = vrot.lane.b32.xlu2 %v3458_v27, %s2825_s24 }
0x20b2   :  { %v1719_v55 = vpop.permute.xlu0 %1718 }
0x2108   :  { %v1657_v15 = vpop.permute.xlu2 %1656 }
0x2109   :  { %1659 = vst.msk [vmem:[#allocation2 + $0x2] sm:$0x3] %vm87_vm1, %v1657_v15 }
0x2110   :  { %v1660_v24 = vld [vmem:[#allocation2 + $0x2] sm:$0x3] }
0x2111   :  { %2475 = vmatmul.msk.f32.vlgmr.msrb.gmra.mxu2 %vm181_vm3, %v1660_v24 }
0x2194   :  { %v1693_v31 = vpop.f32.mrf.mxu2 }
0x2195   :  { %v1694_v32 = vadd.f32 %v2534_v29, %v1693_v31 }
0x2197   :  { %2644 = vtanh.f32 %v1694_v32  ;;  %v2476_v35 = vmul.f32 -1.442695, %v1694_v32 }
0x2199   :  { %2646 = vpow2.f32 %v2476_v35 }
0x219d   :  { %v2645_v34 = vpop.eup %2644 }
0x219e   :  { %1723 = vrot.lane.b32.xlu1 %v2645_v34, %s2827_s18 }
0x219f   :  { %v2647_v36 = vpop.eup %2646 }
0x21a0   :  { %v1700_v37 = vadd.f32 1.0, %v2647_v36 }
0x21a2   :  { %2648 = vrcp.f32 %v1700_v37  ;;  %v1712_v52 = vand.u32 2147483648, %v1700_v37  ;;  %vm1706_vm10 = vweird.f32 %v1700_v37  ;;  %v1710_v20 = vand.u32 2147483647, %v1700_v37 }
0x21a4   :  { %v1713_v33 = vor.u32 1.1754944e-38, %v1712_v52  ;;  %vm1711_vm12 = vcmp.eq.f32.partialorder %v1710_v20, 8.507059e+37 }
0x21a8   :  { %v2649_v62 = vpop.eup %2648 }
0x21a9   :  { %v1702_v38 = vmul.f32 %v2649_v62, %v1700_v37  ;;  %vm1707_vm9 = vweird.f32 %v2649_v62 }
0x21aa   :  { %vm1708_vm11 = vmor %vm1706_vm10, %vm1707_vm9 }
0x21ab   :  { %v1703_v41 = vsub.f32 1.0, %v1702_v38 }
0x21ad   :  { %v1704_v42 = vmul.f32 %v2649_v62, %v1703_v41 }
0x21af   :  { %v1705_v45 = vadd.f32 %v2649_v62, %v1704_v42 }
0x21b1   :  { %v1709_v46 = vsel %vm1708_vm11, %v2649_v62, %v1705_v45 }
0x21b2   :  { %v1714_v51 = vsel %vm1711_vm12, %v1713_v33, %v1709_v46 }
0x21b3   :  { %v1721_v56 = vmul.f32 %v1719_v55, %v1714_v51  ;;  %v2266_v55 = vld [vmem:[#allocation10 + $0x10] sm:$0xff] }
0x2210   :  { %v1724_v50 = vpop.permute.xlu1 %1723 }
0x2211   :  { %v1726_v53 = vmul.f32 %v1724_v50, %v1714_v51 }
0x2213   :  { %1728 = vrot.lane.b32.xlu1 %v1726_v53, %s2825_s24  ;;  %v2267_v53 = vld [vmem:[#allocation10 + $0x18] sm:$0xff] }
0x2214   :  { %2290 = vmatpush.msra.mxu3 %v2267_v53 }
0x2216   :  { %2291 = vmatpush.msra.mxu3 %v2266_v55 }
0x2285   :  { %v1729_v26 = vpop.permute.xlu1 %1728 }
0x2286   :  { %v3469_v43 = vadd.f32 %v1729_v26, %v1721_v56  ;;  %v2265_v26 = vld [vmem:[#allocation10 + $0x8] sm:$0xff] }
0x2287   :  { %2292 = vmatpush.msra.mxu3 %v2265_v26 }
0x2288   :  { %2650 = vtanh.f32 %v3469_v43 }
0x228e   :  { %v2651_v28 = vpop.eup %2650 }
0x228f   :  { %1734 = vrot.lane.b32.xlu0 %v2651_v28, %s2827_s18 }
0x2301   :  { %v1735_v57 = vpop.permute.xlu0 %1734 }
0x2302   :  { %v1737_v58 = vmul.f32 %v1735_v57, %v1714_v51  ;;  %v2264_v57 = vld [vmem:[#allocation10] sm:$0xff] }
0x2303   :  { %2293 = vmatpush.msra.mxu3 %v2264_v57 }
0x2304   :  { %v1751_v39 = vperm.slane %v1737_v58, 0  ;;  %v1750_v59 = vrot.slane %v1737_v58, 1 }
0x2306   :  { %1753 = vrot.lane.b32.xlu1 %v1751_v39, %s2825_s24  ;;  %v1752_v60 = vperm.slane %v1750_v59, 0 }
0x2308   :  { %1755 = vrot.lane.b32.xlu2 %v1752_v60, %s2825_s24 }
0x2310   :  { %1774 = vperm.xlu2 %2517, %v1769_v63  }
0x2318   :  { %1781 = vperm.xlu2 %2517, %v1776_v1  }
0x2320   :  { %2518 = vset.pattern.permute.xlu2 %v2824_v0 }
0x2362   :  { %v1756_v2 = vpop.permute.xlu2 %1755 }
0x2363   :  { %v1760_v49 = vmul.f32 %v1756_v2, %v3371_v30 }
0x2365   :  { %v1764_v48 = vsel %vm366_vm14, %v1760_v49, 0.0 }
0x2366   :  { %1765 = vadd.xlane.f32.xlu1 %v1764_v48 }
0x236a   :  { %v1775_v8 = vpop.permute.xlu2 %1774 }
0x2372   :  { %v1782_v11 = vpop.permute.xlu2 %1781 }
0x2378   :  { %v1754_v4 = vpop.permute.xlu1 %1753 }
0x2379   :  { %v1759_v6 = vmul.f32 %v1754_v4, %v3364_v25 }
0x237b   :  { %v1761_v7 = vsel %vm366_vm14, %v1759_v6, 0.0 }
0x237c   :  { %1762 = vadd.xlane.f32.xlu0 %v1761_v7 }
0x23d9   :  { %v1766_v44 = vpop.xlane.xlu1 %1765 }
0x23da   :  { %v1786_v13 = vadd.f32 %v1782_v11, %v1766_v44 }
0x23ef   :  { %v1763_v9 = vpop.xlane.xlu0 %1762 }
0x23f0   :  { %v1785_v10 = vadd.f32 %v1775_v8, %v1763_v9 }
0x23f2   :  { %1790 = vperm.xlu2 %2518, %v1785_v10  }
0x23fa   :  { %1793 = vperm.xlu2 %2518, %v1786_v13  }
0x244c   :  { %v1791_v14 = vpop.permute.xlu2 %1790 }
0x244d   :  { %v1795_v16 = vperm.slane %v1791_v14, %v2968_v21 }
0x2454   :  { %v1794_v47 = vpop.permute.xlu2 %1793 }
0x2455   :  { %v1796_v17 = vperm.slane %v1794_v47, %v2968_v21 }
0x2457   :  { %v1797_v18 = vsel %vm403_vm15, %v1796_v17, %v1795_v16 }
0x2458   :  { %v1799_v22 = vsel %vm406_vm0, %v1797_v18, -inf  ;;  %v2262_v18 = vld [vmem:[#allocation6] sm:$0xff] }
0x2459   :  { %1800 = vmax.xlane.f32.xlu2 %v1799_v22  ;;  %v1923_v22 = vld [vmem:[%s3686_s8 + $0x38] sm:$0xff] }
0x245a   :  { %1939 = vmatpush.msra.mxu0 %v1923_v22 }
0x2471   :  { %1652 = vrot.lane.b32.xlu2 %v3458_v27, %s2827_s18 }
0x24cc   :  { %v1801_v12 = vpop.xlane.xlu2 %1800 }
0x24cd   :  { %v1803_v54 = vperm.slane %v1801_v12, 0  ;;  %v1804_v23 = vperm.slane %v1801_v12, 1  ;;  %v1922_v12 = vld [vmem:[%s3686_s8 + $0x30] sm:$0xff] }
0x24ce   :  { %1940 = vmatpush.msra.mxu0 %v1922_v12 }
0x24cf   :  { %v1807_v15 = vsub.f32 %v1785_v10, %v1803_v54  ;;  %v1808_v24 = vsub.f32 %v1786_v13, %v1804_v23  ;;  %v1921_v54 = vld [vmem:[%s3686_s8 + $0x28] sm:$0xff]  ;;  %v1920_v23 = vld [vmem:[%s3686_s8 + $0x20] sm:$0xff] }
0x24d0   :  { %1941 = vmatpush.msra.mxu0 %v1921_v54 }
0x24d1   :  { %v1809_v29 = vmul.f32 1.442695, %v1807_v15  ;;  %v1811_v31 = vmul.f32 1.442695, %v1808_v24  ;;  %v1919_v15 = vld [vmem:[%s3686_s8 + $0x18] sm:$0xff]  ;;  %v1918_v24 = vld [vmem:[%s3686_s8 + $0x10] sm:$0xff] }
0x24d2   :  { %1942 = vmatpush.msra.mxu0 %v1920_v23 }
0x24d3   :  { %2652 = vpow2.f32 %v1809_v29  ;;  %v1917_v29 = vld [vmem:[%s3686_s8 + $0x8] sm:$0xff] }
0x24d4   :  { %2654 = vpow2.f32 %v1811_v31  ;;  %v1653_v32 = vpop.permute.xlu2 %1652  ;;  %1943 = vmatpush.msra.mxu0 %v1919_v15  ;;  %v1916_v31 = vld [vmem:[%s3686_s8] sm:$0xff] }
0x24d5   :  { %1655 = vst.msk [vmem:[#allocation2] sm:$0x3] %vm97_vm2, %v1653_v32  ;;  %v2535_v32 = vld [vmem:[%s3689_s11] ss:$0 sm:$0xff] }
0x24d6   :  { %1944 = vmatpush.msra.mxu0 %v1918_v24 }
0x24d8   :  { %1945 = vmatpush.msra.mxu0 %v1917_v29 }
0x24d9   :  { %v2653_v34 = vpop.eup %2652 }
0x24da   :  { %v2655_v35 = vpop.eup %2654  ;;  %1816 = vperm.xlu0 %2516, %v2653_v34   ;;  %1946 = vmatpush.msra.mxu0 %v1916_v31 }
0x24db   :  { %1819 = vperm.xlu1 %2510, %v2655_v35  }
0x24e3   :  { %1744 = vrot.lane.b32.xlu1 %v1737_v58, %s2827_s18 }
0x24e4   :  { %2519 = vset.pattern.permute.xlu1 %v3042_v40 }
0x24eb   :  { %1647 = vrot.lane.b32.xlu1 %v3452_v19, %s2828_s19 }
0x254c   :  { %v1817_v27 = vpop.permute.xlu0 %1816 }
0x254d   :  { %v1820_v36 = vpop.permute.xlu1 %1819  ;;  %v1821_v37 = vperm.slane %v1817_v27, %v2968_v21  ;;  %v1832_v19 = vmul.f32 %v1817_v27, %v3409_v5 }
0x254e   :  { %v1822_v62 = vperm.slane %v1820_v36, %v2968_v21  ;;  %v1833_v40 = vmul.f32 %v1820_v36, %v3401_v3 }
0x254f   :  { %v1834_v20 = vsel %vm366_vm14, %v1832_v19, 0.0 }
0x2550   :  { %v1823_v38 = vsel %vm403_vm15, %v1822_v62, %v1821_v37  ;;  %v1841_v52 = vsel %vm366_vm14, %v1833_v40, 0.0  ;;  %v1835_v33 = vrot.slane %v1834_v20, 4  ;;  %v2537_v37 = vld [vmem:[%s3687_s9] ss:$0 sm:$0xff] }
0x2551   :  { %v1825_v41 = vsel %vm406_vm0, %v1823_v38, 0.0  ;;  %v1842_v46 = vrot.slane %v1841_v52, 4 }
0x2552   :  { %1826 = vadd.xlane.f32.xlu0 %v1825_v41  ;;  %v1836_v56 = vadd.f32 %v1835_v33, %v1834_v20  ;;  %v1914_v41 = vld [vmem:[#allocation5 + $0xa] sm:$0x3] }
0x2553   :  { %v1843_v51 = vadd.f32 %v1842_v46, %v1841_v52 }
0x2554   :  { %v1837_v39 = vrot.slane %v1836_v56, 2 }
0x2555   :  { %v1745_v42 = vpop.permute.xlu1 %1744  ;;  %v1844_v28 = vrot.slane %v1843_v51, 2 }
0x2556   :  { %1747 = vst.msk [vmem:[#allocation2 + $0x2] sm:$0x3] %vm97_vm2, %v1745_v42  ;;  %v1838_v1 = vadd.f32 %v1837_v39, %v1836_v56 }
0x2557   :  { %v1845_v60 = vadd.f32 %v1844_v28, %v1843_v51 }
0x2558   :  { %v1839_v7 = vrot.slane %v1838_v1, 1 }
0x2559   :  { %v1846_v48 = vrot.slane %v1845_v60, 1 }
0x255a   :  { %v1840_v11 = vadd.f32 %v1839_v7, %v1838_v1  ;;  %v2538_v7 = vld [vmem:[%s3687_s9 + $0x1] ss:$0 sm:$0xff] }
0x255b   :  { %v1847_v10 = vadd.f32 %v1846_v48, %v1845_v60 }
0x255d   :  { %v1648_v45 = vpop.permute.xlu1 %1647 }
0x255e   :  { %1650 = vst.msk [vmem:[#allocation3] sm:$0x3] %vm87_vm1, %v1648_v45 }
0x2565   :  { %v1952_v40 = vld [vmem:[#allocation3] sm:$0x3] }
0x25c5   :  { %v1827_v50 = vpop.xlane.xlu0 %1826 }
0x25c6   :  { %2656 = vrcp.f32 %v1827_v50  ;;  %v1859_v63 = vand.u32 2147483648, %v1827_v50  ;;  %v1857_v49 = vand.u32 2147483647, %v1827_v50  ;;  %vm1853_vm5 = vweird.f32 %v1827_v50 }
0x25c8   :  { %v1860_v6 = vor.u32 1.1754944e-38, %v1859_v63  ;;  %vm1858_vm6 = vcmp.eq.f32.partialorder %v1857_v49, 8.507059e+37 }
0x25cc   :  { %v2657_v58 = vpop.eup %2656 }
0x25cd   :  { %v1849_v59 = vmul.f32 %v2657_v58, %v1827_v50  ;;  %vm1854_vm13 = vweird.f32 %v2657_v58 }
0x25ce   :  { %vm1855_vm4 = vmor %vm1853_vm5, %vm1854_vm13 }
0x25cf   :  { %v1850_v61 = vsub.f32 1.0, %v1849_v59 }
0x25d1   :  { %v1851_v2 = vmul.f32 %v2657_v58, %v1850_v61 }
0x25d3   :  { %v1852_v4 = vadd.f32 %v2657_v58, %v1851_v2 }
0x25d5   :  { %v1856_v8 = vsel %vm1855_vm4, %v2657_v58, %v1852_v4 }
0x25d6   :  { %v1861_v9 = vsel %vm1858_vm6, %v1860_v6, %v1856_v8 }
0x25d7   :  { %v1863_v44 = vrot.slane %v1861_v9, 1  ;;  %v1866_v14 = vmul.f32 %v1861_v9, %v1840_v11 }
0x25d9   :  { %v1867_v13 = vmul.f32 %v1863_v44, %v1847_v10 }
0x25db   :  { %v1870_v47 = vrot.slane %v1867_v13, 7 }
0x25dd   :  { %v1871_v16 = vsel %vm403_vm15, %v1870_v47, %v1866_v14 }
0x25de   :  { %1873 = vst.msk [vmem:[#allocation4] sm:$0x3] %vm87_vm1, %v1871_v16 }
0x25df   :  { %1874 = vst.msk [vmem:[#allocation4] sm:$0x3] %vm97_vm2, %v1745_v42 }
0x25e6   :  { %v1875_v17 = vld [vmem:[#allocation4] sm:$0x3] }
0x25e7   :  { %2477 = vmatmul.msk.f32.vlgmr.msrb.gmra.mxu3 %vm181_vm3, %v1875_v17 }
0x25ef   :  { %2492 = vmatmul.msk.f32.vlgmr.msra.gmra.mxu3 %vm366_vm14, %v2262_v18 }
0x266a   :  { %v1908_v34 = vpop.f32.mrf.mxu3 }
0x266b   :  { %v1909_v35 = vadd.f32 %v2535_v32, %v1908_v34 }
0x266d   :  { %2658 = vtanh.f32 %v1909_v35 }
0x2673   :  { %v2659_v27 = vpop.eup %2658 }
0x2674   :  { %1913 = vst.msk [vmem:[#allocation6 + $0x8] sm:$0x3] %vm87_vm1, %v2659_v27 }
0x2675   :  { %1912 = vst.msk [vmem:[#allocation2] sm:$0x3] %vm87_vm1, %v2659_v27 }
0x267c   :  { %v1915_v36 = vld [vmem:[#allocation2] sm:$0x3] }
0x267d   :  { %2478 = vmatmul.msk.f32.vlgmr.msra.gmra.mxu0 %vm181_vm3, %v1915_v36 }
0x26fa   :  { %v1948_v62 = vpop.f32.mrf.mxu0 }
0x26fb   :  { %v1949_v38 = vadd.f32 %v2537_v37, %v1948_v62 }
0x26fd   :  { %v1951_v42 = vadd.f32 %v1949_v38, %v1914_v41 }
0x26ff   :  { %2660 = vtanh.f32 %v1951_v42  ;;  %v2479_v19 = vmul.f32 -1.442695, %v1951_v42  ;;  %v2115_v42 = vld [vmem:[%s3684_s6] sm:$0x3] }
0x2701   :  { %2662 = vpow2.f32 %v2479_v19 }
0x2705   :  { %v2661_v45 = vpop.eup %2660 }
0x2706   :  { %1979 = vrot.lane.b32.xlu1 %v2661_v45, %s2827_s18  ;;  %v2117_v45 = vperm.slane %v2115_v42, 0 }
0x2707   :  { %v2663_v52 = vpop.eup %2662 }
0x2708   :  { %v1956_v20 = vadd.f32 1.0, %v2663_v52 }
0x270a   :  { %2664 = vrcp.f32 %v1956_v20  ;;  %v1968_v55 = vand.u32 2147483648, %v1956_v20  ;;  %vm1962_vm8 = vweird.f32 %v1956_v20  ;;  %v1966_v56 = vand.u32 2147483647, %v1956_v20 }
0x270c   :  { %v1969_v28 = vor.u32 1.1754944e-38, %v1968_v55  ;;  %vm1967_vm10 = vcmp.eq.f32.partialorder %v1966_v56, 8.507059e+37 }
0x270e   :  { %1974 = vrot.lane.b32.xlu1 %v1952_v40, %s2825_s24  ;;  %v2124_v40 = vperm.slane %v2115_v42, 1 }
0x2710   :  { %v2665_v46 = vpop.eup %2664 }
0x2711   :  { %v1958_v33 = vmul.f32 %v2665_v46, %v1956_v20  ;;  %vm1963_vm7 = vweird.f32 %v2665_v46 }
0x2712   :  { %vm1964_vm9 = vmor %vm1962_vm8, %vm1963_vm7 }
0x2713   :  { %v1959_v50 = vsub.f32 1.0, %v1958_v33 }
0x2715   :  { %v1960_v51 = vmul.f32 %v2665_v46, %v1959_v50 }
0x2717   :  { %v1961_v53 = vadd.f32 %v2665_v46, %v1960_v51 }
0x2719   :  { %v1965_v26 = vsel %vm1964_vm9, %v2665_v46, %v1961_v53 }
0x271a   :  { %v1970_v58 = vsel %vm1967_vm10, %v1969_v28, %v1965_v26 }
0x2778   :  { %v1980_v57 = vpop.permute.xlu1 %1979 }
0x2779   :  { %v1982_v39 = vmul.f32 %v1980_v57, %v1970_v58 }
0x277b   :  { %1984 = vrot.lane.b32.xlu2 %v1982_v39, %s2825_s24 }
0x2780   :  { %v1975_v59 = vpop.permute.xlu1 %1974 }
0x2781   :  { %v1977_v60 = vmul.f32 %v1975_v59, %v1970_v58  ;;  %v3585_v59 = vld [vmem:[%s3691_s13] ss:$0 sm:$0xff] }
0x2783   :  { %1739 = vrot.lane.b32.xlu2 %v3469_v43, %s2828_s19 }
0x27d5   :  { %v1985_v61 = vpop.permute.xlu2 %1984 }
0x27d6   :  { %v3547_v63 = vadd.f32 %v1985_v61, %v1977_v60  ;;  %v2295_v60 = vpop.f32.mrf.mxu3 }
0x27d7   :  { %v2296_v61 = vadd.f32 %v3585_v59, %v2295_v60 }
0x27d8   :  { %2666 = vtanh.f32 %v3547_v63 }
0x27dd   :  { %v1740_v1 = vpop.permute.xlu2 %1739 }
0x27de   :  { %v2667_v2 = vpop.eup %2666  ;;  %1742 = vst.msk [vmem:[#allocation3 + $0x2] sm:$0x3] %vm87_vm1, %v1740_v1 }
0x27df   :  { %1990 = vrot.lane.b32.xlu1 %v2667_v2, %s2827_s18 }
0x27e5   :  { %v2044_v49 = vld [vmem:[#allocation3 + $0x2] sm:$0x3] }
0x27e6   :  { %2066 = vrot.lane.b32.xlu2 %v2044_v49, %s2825_s24 }
0x2840   :  { %v2067_v31 = vpop.permute.xlu2 %2066 }
0x2851   :  { %v1991_v48 = vpop.permute.xlu1 %1990 }
0x2852   :  { %v3553_v4 = vmul.f32 %v1991_v48, %v1970_v58 }
0x2854   :  { %2004 = vrot.lane.b32.xlu0 %v3553_v4, %s2825_s24 }
0x28c6   :  { %v2005_v43 = vpop.permute.xlu0 %2004 }
0x28c7   :  { %2007 = vst.msk [vmem:[#allocation2 + $0x2] sm:$0x3] %vm87_vm1, %v2005_v43 }
0x28ce   :  { %v2008_v6 = vld [vmem:[#allocation2 + $0x2] sm:$0x3] }
0x28cf   :  { %2489 = vmatmul.msk.f32.vlgmr.msra.gmra.mxu1 %vm181_vm3, %v2008_v6 }
0x294c   :  { %v2041_v8 = vpop.f32.mrf.mxu1 }
0x294d   :  { %v2042_v9 = vadd.f32 %v2538_v7, %v2041_v8 }
0x294f   :  { %2668 = vtanh.f32 %v2042_v9  ;;  %v2490_v44 = vmul.f32 -1.442695, %v2042_v9 }
0x2951   :  { %2670 = vpow2.f32 %v2490_v44 }
0x2955   :  { %v2669_v10 = vpop.eup %2668 }
0x2956   :  { %2071 = vrot.lane.b32.xlu1 %v2669_v10, %s2827_s18 }
0x2957   :  { %v2671_v11 = vpop.eup %2670 }
0x2958   :  { %v2048_v13 = vadd.f32 1.0, %v2671_v11 }
0x295a   :  { %2672 = vrcp.f32 %v2048_v13  ;;  %v2060_v22 = vand.u32 2147483648, %v2048_v13  ;;  %vm2054_vm12 = vweird.f32 %v2048_v13  ;;  %v2058_v12 = vand.u32 2147483647, %v2048_v13 }
0x295c   :  { %v2061_v23 = vor.u32 1.1754944e-38, %v2060_v22  ;;  %vm2059_vm5 = vcmp.eq.f32.partialorder %v2058_v12, 8.507059e+37 }
0x2960   :  { %v2673_v14 = vpop.eup %2672 }
0x2961   :  { %v2050_v47 = vmul.f32 %v2673_v14, %v2048_v13  ;;  %vm2055_vm11 = vweird.f32 %v2673_v14 }
0x2962   :  { %vm2056_vm13 = vmor %vm2054_vm12, %vm2055_vm11 }
0x2963   :  { %v2051_v16 = vsub.f32 1.0, %v2050_v47 }
0x2965   :  { %v2052_v17 = vmul.f32 %v2673_v14, %v2051_v16 }
0x2967   :  { %v2053_v18 = vadd.f32 %v2673_v14, %v2052_v17 }
0x2969   :  { %v2057_v54 = vsel %vm2056_vm13, %v2673_v14, %v2053_v18 }
0x296a   :  { %v2062_v24 = vsel %vm2059_vm5, %v2061_v23, %v2057_v54  ;;  %v2231_v54 = vld [vmem:[%s3688_s10 + $0x38] sm:$0xff]  ;;  %v2229_v23 = vld [vmem:[%s3688_s10 + $0x28] sm:$0xff] }
0x296b   :  { %v2069_v32 = vmul.f32 %v2067_v31, %v2062_v24  ;;  %2247 = vmatpush.msra.mxu2 %v2231_v54 }
0x29c8   :  { %v2072_v15 = vpop.permute.xlu1 %2071 }
0x29c9   :  { %v2074_v29 = vmul.f32 %v2072_v15, %v2062_v24 }
0x29cb   :  { %2076 = vrot.lane.b32.xlu1 %v2074_v29, %s2825_s24  ;;  %v2227_v29 = vld [vmem:[%s3688_s10 + $0x18] sm:$0xff] }
0x2a3d   :  { %v2077_v34 = vpop.permute.xlu1 %2076 }
0x2a3e   :  { %v3564_v35 = vadd.f32 %v2077_v34, %v2069_v32  ;;  %v2226_v32 = vld [vmem:[%s3688_s10 + $0x10] sm:$0xff] }
0x2a40   :  { %2674 = vtanh.f32 %v3564_v35 }
0x2a46   :  { %v2675_v27 = vpop.eup %2674 }
0x2a47   :  { %2082 = vrot.lane.b32.xlu0 %v2675_v27, %s2827_s18  ;;  %v2224_v27 = vld [vmem:[%s3688_s10] sm:$0xff] }
0x2ab9   :  { %v2083_v36 = vpop.permute.xlu0 %2082 }
0x2aba   :  { %v2085_v37 = vmul.f32 %v2083_v36, %v2062_v24 }
0x2abc   :  { %v2098_v62 = vrot.slane %v2085_v37, 1  ;;  %v2099_v38 = vperm.slane %v2085_v37, 0 }
0x2abe   :  { %v2100_v41 = vperm.slane %v2098_v62, 0  ;;  %2101 = vrot.lane.b32.xlu2 %v2099_v38, %s2825_s24 }
0x2ac0   :  { %2103 = vrot.lane.b32.xlu1 %v2100_v41, %s2825_s24 }
0x2ac8   :  { %2122 = vperm.xlu1 %2519, %v2117_v45  }
0x2ad0   :  { %2129 = vperm.xlu1 %2519, %v2124_v40  }
0x2ad8   :  { %2520 = vset.pattern.permute.xlu1 %v2824_v0 }
0x2b18   :  { %v2102_v19 = vpop.permute.xlu2 %2101 }
0x2b19   :  { %v2107_v52 = vmul.f32 %v2102_v19, %v3364_v25 }
0x2b1b   :  { %v2109_v20 = vsel %vm366_vm14, %v2107_v52, 0.0 }
0x2b1c   :  { %2110 = vadd.xlane.f32.xlu0 %v2109_v20 }
0x2b32   :  { %v2104_v46 = vpop.permute.xlu1 %2103 }
0x2b33   :  { %v2108_v33 = vmul.f32 %v2104_v46, %v3371_v30 }
0x2b35   :  { %v2112_v50 = vsel %vm366_vm14, %v2108_v33, 0.0 }
0x2b36   :  { %2113 = vadd.xlane.f32.xlu2 %v2112_v50 }
0x2b3a   :  { %v2123_v51 = vpop.permute.xlu1 %2122 }
0x2b42   :  { %v2130_v56 = vpop.permute.xlu1 %2129 }
0x2b8f   :  { %v2111_v53 = vpop.xlane.xlu0 %2110 }
0x2b90   :  { %v2133_v55 = vadd.f32 %v2123_v51, %v2111_v53 }
0x2b92   :  { %2138 = vperm.xlu1 %2520, %v2133_v55  }
0x2ba9   :  { %v2114_v26 = vpop.xlane.xlu2 %2113 }
0x2baa   :  { %v2134_v28 = vadd.f32 %v2130_v56, %v2114_v26 }
0x2bac   :  { %2141 = vperm.xlu1 %2520, %v2134_v28  }
0x2c04   :  { %v2139_v0 = vpop.permute.xlu1 %2138 }
0x2c05   :  { %v2143_v25 = vperm.slane %v2139_v0, %v2968_v21 }
0x2c1e   :  { %v2142_v57 = vpop.permute.xlu1 %2141 }
0x2c1f   :  { %v2144_v58 = vperm.slane %v2142_v57, %v2968_v21 }
0x2c21   :  { %v2145_v39 = vsel %vm403_vm15, %v2144_v58, %v2143_v25 }
0x2c22   :  { %v2147_v30 = vsel %vm406_vm0, %v2145_v39, -inf }
0x2c23   :  { %2148 = vmax.xlane.f32.xlu1 %v2147_v30 }
0x2c2b   :  { %2301 = vmax.xlane.f32.xlu1 %v2296_v61 }
0x2c44   :  { %2000 = vrot.lane.b32.xlu1 %v3553_v4, %s2827_s18 }
0x2c96   :  { %v2149_v1 = vpop.xlane.xlu1 %2148 }
0x2c97   :  { %v2151_v2 = vperm.slane %v2149_v1, 0  ;;  %v2152_v49 = vperm.slane %v2149_v1, 1 }
0x2c99   :  { %v2155_v48 = vsub.f32 %v2133_v55, %v2151_v2  ;;  %v2156_v43 = vsub.f32 %v2134_v28, %v2152_v49 }
0x2c9b   :  { %v2157_v6 = vmul.f32 1.442695, %v2155_v48  ;;  %v2159_v7 = vmul.f32 1.442695, %v2156_v43 }
0x2c9d   :  { %2676 = vpow2.f32 %v2157_v6 }
0x2c9e   :  { %2678 = vpow2.f32 %v2159_v7  ;;  %v2302_v10 = vpop.xlane.xlu1 %2301  ;;  %v2539_v7 = vld [vmem:[%s3689_s11] ss:$0 sm:$0xff]  ;;  %s2829_s11 = smov [#allocation13]  }
0x2c9f   :  { %v3596_v13 = vsub.f32 %v2296_v61, %v2302_v10  ;;  %s2362_s9 = sshll.u32 %s2829_s11, 4  ;;  %s2363_s9 = int_to_ptr.vmem [resolvable:$true] %s2362_s9 }
0x2ca1   :  { %v2309_v17 = vmul.f32 1.442695, %v3596_v13 }
0x2ca3   :  { %v2677_v8 = vpop.eup %2676  ;;  %2680 = vpow2.f32 %v2309_v17 }
0x2ca4   :  { %v2679_v9 = vpop.eup %2678  ;;  %2164 = vperm.xlu2 %2518, %v2677_v8  }
0x2ca5   :  { %2167 = vperm.xlu0 %2516, %v2679_v9  }
0x2ca9   :  { %v2681_v12 = vpop.eup %2680 }
0x2cac   :  { %2092 = vrot.lane.b32.xlu2 %v2085_v37, %s2827_s18 }
0x2cb6   :  { %v2001_v44 = vpop.permute.xlu1 %2000 }
0x2cb7   :  { %2003 = vst.msk [vmem:[#allocation2] sm:$0x3] %vm97_vm2, %v2001_v44 }
0x2cfe   :  { %v2165_v4 = vpop.permute.xlu2 %2164 }
0x2cff   :  { %v2169_v47 = vperm.slane %v2165_v4, %v2968_v21  ;;  %v2180_v24 = vmul.f32 %v2165_v4, %v3409_v5 }
0x2d01   :  { %v2182_v34 = vsel %vm366_vm14, %v2180_v24, 0.0 }
0x2d02   :  { %v2183_v36 = vrot.slane %v2182_v34, 4 }
0x2d04   :  { %v2184_v38 = vadd.f32 %v2183_v36, %v2182_v34 }
0x2d06   :  { %v3592_v11 = vpop.permute.xlu2 %2092  ;;  %v2185_v45 = vrot.slane %v2184_v38, 2 }
0x2d07   :  { %2095 = vst.msk [vmem:[#allocation2 + $0x2] sm:$0x3] %vm97_vm2, %v3592_v11 }
0x2d08   :  { %v2186_v33 = vadd.f32 %v2185_v45, %v2184_v38 }
0x2d0a   :  { %v2187_v28 = vrot.slane %v2186_v33, 1 }
0x2d0c   :  { %v2188_v60 = vadd.f32 %v2187_v28, %v2186_v33 }
0x2d0e   :  { %v2334_v17 = vld [vmem:[#allocation2 + $0x2] sm:$0x3] }
0x2d17   :  { %v2168_v14 = vpop.permute.xlu0 %2167 }
0x2d18   :  { %v2170_v16 = vperm.slane %v2168_v14, %v2968_v21  ;;  %v2230_v21 = vld [vmem:[%s3688_s10 + $0x30] sm:$0xff]  ;;  %v2181_v15 = vmul.f32 %v2168_v14, %v3401_v3  ;;  %v2225_v3 = vld [vmem:[%s3688_s10 + $0x8] sm:$0xff] }
0x2d19   :  { %2248 = vmatpush.msra.mxu2 %v2230_v21 }
0x2d1a   :  { %v2171_v18 = vsel %vm403_vm15, %v2170_v16, %v2169_v47  ;;  %v2189_v31 = vsel %vm366_vm14, %v2181_v15, 0.0 }
0x2d1b   :  { %v2173_v22 = vsel %vm406_vm0, %v2171_v18, 0.0  ;;  %2249 = vmatpush.msra.mxu2 %v2229_v23  ;;  %v2190_v5 = vrot.slane %v2189_v31, 4 }
0x2d1c   :  { %2174 = vadd.xlane.f32.xlu0 %v2173_v22 }
0x2d1d   :  { %v2191_v62 = vadd.f32 %v2190_v5, %v2189_v31 }
0x2d1f   :  { %v2192_v41 = vrot.slane %v2191_v62, 2 }
0x2d21   :  { %v2193_v52 = vadd.f32 %v2192_v41, %v2191_v62 }
0x2d23   :  { %v2194_v53 = vrot.slane %v2193_v52, 1 }
0x2d24   :  { %2313 = vadd.xlane.f32.xlu0 %v2681_v12 }
0x2d25   :  { %v2195_v58 = vadd.f32 %v2194_v53, %v2193_v52 }
0x2d38   :  { %1995 = vrot.lane.b32.xlu0 %v3547_v63, %s2828_s19  ;;  %v2228_v63 = vld [vmem:[%s3688_s10 + $0x20] sm:$0xff] }
0x2d39   :  { %2250 = vmatpush.msra.mxu2 %v2228_v63 }
0x2d3b   :  { %2251 = vmatpush.msra.mxu2 %v2227_v29 }
0x2d3d   :  { %2252 = vmatpush.msra.mxu2 %v2226_v32 }
0x2d3f   :  { %2253 = vmatpush.msra.mxu2 %v2225_v3 }
0x2d41   :  { %2254 = vmatpush.msra.mxu2 %v2224_v27 }
0x2d8f   :  { %v2175_v37 = vpop.xlane.xlu0 %2174 }
0x2d90   :  { %2682 = vrcp.f32 %v2175_v37  ;;  %v2207_v46 = vand.u32 2147483648, %v2175_v37  ;;  %v2205_v51 = vand.u32 2147483647, %v2175_v37  ;;  %vm2201_vm4 = vweird.f32 %v2175_v37 }
0x2d92   :  { %v2208_v26 = vor.u32 1.1754944e-38, %v2207_v46  ;;  %vm2206_vm7 = vcmp.eq.f32.partialorder %v2205_v51, 8.507059e+37 }
0x2d96   :  { %v2683_v42 = vpop.eup %2682 }
0x2d97   :  { %v2197_v40 = vmul.f32 %v2683_v42, %v2175_v37  ;;  %v2314_v19 = vpop.xlane.xlu0 %2313  ;;  %vm2202_vm0 = vweird.f32 %v2683_v42 }
0x2d98   :  { %2684 = vlog2.f32 %v2314_v19  ;;  %vm2203_vm6 = vmor %vm2201_vm4, %vm2202_vm0 }
0x2d99   :  { %v2198_v20 = vsub.f32 1.0, %v2197_v40 }
0x2d9b   :  { %v2199_v50 = vmul.f32 %v2683_v42, %v2198_v20 }
0x2d9d   :  { %v2200_v55 = vadd.f32 %v2683_v42, %v2199_v50 }
0x2d9e   :  { %v2685_v56 = vpop.eup %2684 }
0x2d9f   :  { %v2204_v0 = vsel %vm2203_vm6, %v2683_v42, %v2200_v55  ;;  %v2319_v57 = vmul.f32 0.6931472, %v2685_v56 }
0x2da0   :  { %v2209_v25 = vsel %vm2206_vm7, %v2208_v26, %v2204_v0 }
0x2da1   :  { %v2211_v39 = vrot.slane %v2209_v25, 1  ;;  %v2322_v30 = vsub.f32 %v3596_v13, %v2319_v57  ;;  %v2214_v1 = vmul.f32 %v2209_v25, %v2188_v60 }
0x2da3   :  { %v2215_v61 = vmul.f32 %v2211_v39, %v2195_v58  ;;  %2324 = vst [vmem:[%s3692_s14] sm:$0xff] %v2322_v30 }
0x2da5   :  { %v2218_v2 = vrot.slane %v2215_v61, 7 }
0x2da7   :  { %v2219_v49 = vsel %vm403_vm15, %v2218_v2, %v2214_v1 }
0x2da8   :  { %2221 = vst.msk [vmem:[#allocation4] sm:$0x3] %vm87_vm1, %v2219_v49 }
0x2da9   :  { %2222 = vst.msk [vmem:[#allocation4] sm:$0x3] %vm97_vm2, %v3592_v11  ;;  %vm2303_vm2 = vcmask 1043456  }
0x2daa   :  { %v1996_v48 = vpop.permute.xlu0 %1995 }
0x2dab   :  { %1998 = vst.msk [vmem:[#allocation3] sm:$0x3] %vm87_vm1, %v1996_v48 }
0x2db0   :  { %v2223_v43 = vld [vmem:[#allocation4] sm:$0x3] }
0x2db1   :  { %2491 = vmatmul.msk.f32.vlgmr.msra.gmra.mxu2 %vm181_vm3, %v2223_v43 }
0x2db2   :  { %v2341_v6 = vld [vmem:[#allocation3] sm:$0x3] }
0x2db3   :  { %2343 = vst.msk [vmem:[#allocation15] sm:$0x3] %vm87_vm1, %v2341_v6 }
0x2e34   :  { %v2256_v8 = vpop.f32.mrf.mxu2 }
0x2e35   :  { %v2257_v9 = vadd.f32 %v2539_v7, %v2256_v8 }
0x2e37   :  { %2686 = vtanh.f32 %v2257_v9 }
0x2e3d   :  { %v2687_v10 = vpop.eup %2686 }
0x2e3e   :  { %2261 = vst.msk [vmem:[#allocation6 + $0xa] sm:$0x3] %vm87_vm1, %v2687_v10 }
0x2e3f   :  { %2260 = vst.msk [vmem:[#allocation2] sm:$0x3] %vm87_vm1, %v2687_v10 }
0x2e45   :  { %v2263_v44 = vld [vmem:[#allocation6 + $0x8] sm:$0xf] }
0x2e46   :  { %2493 = vmatmul.msk.f32.gmra.mxu3 %vm366_vm14, %v2263_v44  ;;  %v2328_v4 = vld [vmem:[#allocation2] sm:$0x3] }
0x2e47   :  { %v2326_v11 = vld [vmem:[#allocation2] sm:$0x3]  ;;  %2330 = vrot.lane.b32.xlu0 %v2328_v4, %s2828_s19 }
0x2e48   :  { %2327 = vst.msk [vmem:[#allocation12] sm:$0x3] %vm87_vm1, %v2326_v11 }
0x2eb9   :  { %v2331_v13 = vpop.permute.xlu0 %2330 }
0x2eba   :  { %2333 = vst.msk [vmem:[#allocation13] sm:$0x3] %vm87_vm1, %v2331_v13 }
0x2ec9   :  { %v2298_v14 = vpop.f32.mrf.mxu3 }
0x2eca   :  { %v2299_v47 = vadd.f32 %v3585_v59, %v2298_v14 }
0x2ecc   :  { %v2304_v16 = vsel %vm2303_vm2, %v2299_v47, -inf }
0x2ecd   :  { %2305 = vmax.xlane.f32.xlu2 %v2304_v16 }
0x2ee5   :  { %2087 = vrot.lane.b32.xlu2 %v3564_v35, %s2828_s19 }
0x2eed   :  { %2336 = vrot.lane.b32.xlu2 %v2334_v17, %s2828_s19  ;;  %s2830_s19 = smov [#allocation12]  }
0x2eee   :  { %s2352_s13 = sshll.u32 %s2830_s19, 4  ;;  %s2353_s13 = int_to_ptr.vmem [resolvable:$true] %s2352_s13 }
0x2eef   :  { %2357 = dma.vmem_to_hbm [thread:$0]  %s2353_s13, 32, %s2355_s29, [#allocation9]  }
0x2f40   :  { %v2306_v18 = vpop.xlane.xlu2 %2305 }
0x2f41   :  { %v2308_v22 = vsub.f32 %v2299_v47, %v2306_v18 }
0x2f43   :  { %v2311_v12 = vmul.f32 1.442695, %v2308_v22 }
0x2f45   :  { %2688 = vpow2.f32 %v2311_v12 }
0x2f48   :  { %v2088_v54 = vpop.permute.xlu2 %2087 }
0x2f49   :  { %2090 = vst.msk [vmem:[#allocation3 + $0x2] sm:$0x3] %vm87_vm1, %v2088_v54 }
0x2f4b   :  { %v2689_v59 = vpop.eup %2688 }
0x2f4c   :  { %v2315_v35 = vsel %vm2303_vm2, %v2689_v59, 0.0 }
0x2f4d   :  { %2316 = vadd.xlane.f32.xlu1 %v2315_v35 }
0x2f50   :  { %v2337_v21 = vpop.permute.xlu2 %2336  ;;  %v2342_v23 = vld [vmem:[#allocation3 + $0x2] sm:$0x3] }
0x2f51   :  { %2340 = vst.msk [vmem:[#allocation13 + $0x2] sm:$0x3] %vm87_vm1, %v2337_v21 }
0x2f52   :  { %2370 = dma.vmem_to_hbm [thread:$0]  %s2363_s9, 64, %s2365_s4, [#allocation14], %s2825_s24, %s2825_s24, %s2832_s20   ;;  %2344 = vst.msk [vmem:[#allocation15 + $0x2] sm:$0x3] %vm87_vm1, %v2342_v23 }
0x2f53   :  { %2383 = dma.vmem_to_hbm [thread:$0]  %s2376_s1, 64, %s2378_s16, [#allocation14], %s2825_s24, %s2825_s24, %s2832_s20  }
0x2fc0   :  { %v2317_v15 = vpop.xlane.xlu1 %2316 }
0x2fc1   :  { %2690 = vlog2.f32 %v2317_v15 }
0x2fc7   :  { %v2691_v63 = vpop.eup %2690 }
0x2fc8   :  { %v2321_v24 = vmul.f32 0.6931472, %v2691_v63 }
0x2fca   :  { %v2323_v29 = vsub.f32 %v2308_v22, %v2321_v24 }
0x2fcc   :  { %2325 = vst [vmem:[%s3692_s14 + $0x8] sm:$0xf] %v2323_v29 }
0x2fcd   :  { %2816 = dma.done.wait [#allocation9], 32  }
0x2fce   :  { %2817 = vsyncadd [#allocation9], 4294967264 }
0x2fcf   :  { %2818 = dma.done.wait [#allocation14], 128  }
0x2fd0   :  { %2819 = vsyncadd [#allocation14], 4294967168 }
0x2fd1   :  { %2398 = vsyncpa [#allocation8], 1 }
0x2fd2   :  { %2399 = vsyncpa [#allocation11], 1 }
0x2fd3   :  { %2400 = vsyncpa [#allocation9], 1 }
0x2fd4   :  { %2401 = vsyncpa [#allocation14], 1 }

</bundles_post_ra>
